<compile_context>
chip_gen: v7x
topology: tpu7x:2x2x1
jax: 0.10.0
libtpu: 0.0.40
codegen_flags: <defaults>
</compile_context>

<pallas_src>
import jax
import jax.numpy as jnp
from jax import lax
from jax.experimental import pallas as pl
from jax.experimental.pallas import tpu as pltpu

# ---- Configuration (mirrors the params dict the torch module expects) ----
P = 8       # Graph['P'] : attention size AND encoder seq length (bmm requires seq == P)
M = 8       # Graph['M'] : decoder input size; must equal n_outputs (output is fed back)
K = 1       # Hyperparameters['K'] : batch size (torch forward only typechecks with K == 1)
N_IN = 8    # Policy['n_inputs'] : encoder input features
H = 32      # Policy['n_hidden']
N_OUT = M   # Policy['n_outputs'] == M
# Policy['typecell'] = 'GRU'

# ---------------- weight-slab layout (one contiguous VMEM input) ----------------
_PIECES = (
    ('enc_wi_s', (N_IN, 3 * H)),   # encoder W_ih^T, gate-stacked [r|z|n]
    ('enc_wh_s', (H, 3 * H)),      # encoder W_hh^T
    ('dec_wi_s', (H, 3 * H)),      # decoder W_ih^T
    ('dec_wh_s', (H, 3 * H)),      # decoder W_hh^T
    ('enc_bi_s', (1, 3 * H)),
    ('enc_bh_s', (1, 3 * H)),
    ('dec_bi_s', (1, 3 * H)),
    ('dec_bh_s', (1, 3 * H)),
    ('wa_h',    (H, P)),           # attn h-weights (used at t=0, x == 0)
    ('wa_tot',  (H, P)),           # attn h-weights with fc folded in (t >= 1)
    ('wc_h',    (H, H)),           # attn_combine ctx-weights
    ('wfcx',    (H, H)),           # fc folded into attn_combine x-weights (t >= 1)
    ('w_fcT',   (H, M)),           # fc weights (exact logits side-output)
    ('b_a',     (1, P)),
    ('b_a_tot', (1, P)),
    ('b_c',     (1, H)),
    ('b_c_tot', (1, H)),
    ('b_fc',    (1, M)),
)


def _build_layout():
    layout, row = {}, 0
    for name, (r, c) in _PIECES:
        layout[name] = (row, r, c)
        row += ((r + 7) // 8) * 8          # keep every piece sublane(8)-aligned
    return layout, row


_LAYOUT, _SLAB_ROWS = _build_layout()
_SLAB_COLS = 3 * H                          # 96 lanes (widest piece)


# ---------------- kernel ----------------
def _policy_kernel(state_ref, slab_ref, out_ref):
    def piece(name):
        r0, r, c = _LAYOUT[name]
        return slab_ref[r0:r0 + r, 0:c]     # static slice of a Ref -> plain load

    enc_wh_s = piece('enc_wh_s')
    enc_bh_s = piece('enc_bh_s')
    dec_wi_s = piece('dec_wi_s')
    dec_wh_s = piece('dec_wh_s')
    dec_bi_s = piece('dec_bi_s')
    dec_bh_s = piece('dec_bh_s')
    wa_h, wa_tot = piece('wa_h'), piece('wa_tot')
    b_a, b_a_tot = piece('b_a'), piece('b_a_tot')
    wc_h, wfcx = piece('wc_h'), piece('wfcx')
    b_c, b_c_tot = piece('b_c'), piece('b_c_tot')
    w_fcT, b_fc = piece('w_fcT'), piece('b_fc')

    def gru(gi, gh, h):
        # PyTorch GRU gate order r, z, n; gates are stacked along the lane axis.
        r = jax.nn.sigmoid(gi[:, 0:H] + gh[:, 0:H])
        z = jax.nn.sigmoid(gi[:, H:2 * H] + gh[:, H:2 * H])
        n = jnp.tanh(gi[:, 2 * H:3 * H] + r * gh[:, 2 * H:3 * H])
        return (1.0 - z) * n + z * h

    # ---- Encoder: input projection hoisted (one (P,N_IN)@(N_IN,3H) matmul) ----
    gi_all = (jnp.dot(state_ref[...], piece('enc_wi_s'),
                      preferred_element_type=jnp.float32) + piece('enc_bi_s'))

    row_h = lax.broadcasted_iota(jnp.int32, (P, H), 0)   # hoisted out of the loops
    row_m = lax.broadcasted_iota(jnp.int32, (P, M), 0)

    h = jnp.zeros((1, H), jnp.float32)                   # init_state(): zeros hidden
    enc = jnp.zeros((P, H), jnp.float32)                 # encoder outputs (carried value)
    for t in range(P):                                   # fully unrolled, h stays in vregs
        gh = jnp.dot(h, enc_wh_s, preferred_element_type=jnp.float32) + enc_bh_s
        h = gru(gi_all[t:t + 1, :], gh, h)
        enc = jnp.where(row_h == t, jnp.broadcast_to(h, (P, H)), enc)

    # ---- Decoder: P autoregressive attention steps (fc folded into the x-path) ----
    outs = jnp.zeros((P, M), jnp.float32)
    for t in range(P):                                   # fully unrolled
        if t == 0:
            # x == zeros(1, M): only the h-contribution of attn(cat(x, h)).
            a = jnp.dot(h, wa_h, preferred_element_type=jnp.float32) + b_a
        else:
            # x == h@Wfc + b_fc  =>  x@wa_x + h@wa_h == h@wa_tot (+ folded bias).
            a = jnp.dot(h, wa_tot, preferred_element_type=jnp.float32) + b_a_tot
        a = a - jnp.max(a, axis=1, keepdims=True)
        e = jnp.exp(a)
        attn_w = e * pl.reciprocal(jnp.sum(e, axis=1, keepdims=True), approx=True)
        ctx = jnp.dot(attn_w, enc, preferred_element_type=jnp.float32)   # torch.bmm
        if t == 0:
            comb = jnp.dot(ctx, wc_h, preferred_element_type=jnp.float32) + b_c
        else:
            comb = (jnp.dot(h, wfcx, preferred_element_type=jnp.float32)
                    + jnp.dot(ctx, wc_h, preferred_element_type=jnp.float32) + b_c_tot)
        comb = jnp.maximum(comb, 0.0)                    # relu(attn_combine(cat(x, ctx)))
        gi = jnp.dot(comb, dec_wi_s, preferred_element_type=jnp.float32) + dec_bi_s
        gh = jnp.dot(h, dec_wh_s, preferred_element_type=jnp.float32) + dec_bh_s
        h = gru(gi, gh, h)
        # exact logits side output (off the recurrent chain thanks to the fc folding)
        logits = jnp.dot(h, w_fcT, preferred_element_type=jnp.float32) + b_fc
        outs = jnp.where(row_m == t, jnp.broadcast_to(logits, (P, M)), outs)

    out_ref[...] = outs                                  # single coalesced store


# ---------------- wrapper ----------------
def policy_forward(state, slab):
    """state: (K=1, P, N_IN) float32 -> (1, P, M) float32."""
    s2d = state.reshape(P, N_IN).astype(jnp.float32)
    out = pl.pallas_call(
        _policy_kernel,
        out_shape=jax.ShapeDtypeStruct((P, M), jnp.float32),
        in_specs=[pl.BlockSpec(memory_space=pltpu.MemorySpace.VMEM),
                  pl.BlockSpec(memory_space=pltpu.MemorySpace.VMEM)],
        out_specs=pl.BlockSpec(memory_space=pltpu.MemorySpace.VMEM),
    )(s2d, slab)
    return out.reshape(1, P, M)


# ---------------- deterministic parameter construction (PyTorch-style init) ----------------
def init_torch_params(key):
    def uni(k, shape, fan):
        b = 1.0 / jnp.sqrt(jnp.float32(fan))
        return jax.random.uniform(k, shape, jnp.float32, -b, b)

    ks = jax.random.split(key, 14)
    tp = {}
    tp['e_wih'] = uni(ks[0], (3 * H, N_IN), H)     # encoder GRU
    tp['e_whh'] = uni(ks[1], (3 * H, H), H)
    tp['e_bih'] = uni(ks[2], (3 * H,), H)
    tp['e_bhh'] = uni(ks[3], (3 * H,), H)
    tp['attn_w'] = uni(ks[4], (P, H + M), H + M)   # Linear(H + M, P)
    tp['attn_b'] = uni(ks[5], (P,), H + M)
    tp['comb_w'] = uni(ks[6], (H, H + M), H + M)   # Linear(H + M, H)
    tp['comb_b'] = uni(ks[7], (H,), H + M)
    tp['d_wih'] = uni(ks[8], (3 * H, H), H)        # decoder GRU
    tp['d_whh'] = uni(ks[9], (3 * H, H), H)
    tp['d_bih'] = uni(ks[10], (3 * H,), H)
    tp['d_bhh'] = uni(ks[11], (3 * H,), H)
    tp['fc_w'] = uni(ks[12], (M, H), H)            # Linear(H, M)
    tp['fc_b'] = uni(ks[13], (M,), H)
    return tp


def to_kernel_slab(tp):
    """Pack all weights (incl. gate-stacking, weight-split of cat(x,.)@W.T, and fc folding)
    into a single (rows, 96) f32 slab consumed by the kernel with static slices."""
    # cat(x[M], h_or_ctx[H]) @ W.T  ==  x @ W[:, :M].T + (h|ctx) @ W[:, M:].T
    wa_x = tp['attn_w'][:, :M].T        # (M, P)
    wa_h = tp['attn_w'][:, M:].T        # (H, P)
    b_a = tp['attn_b'][None, :]         # (1, P)
    wc_x = tp['comb_w'][:, :M].T        # (M, H)
    wc_h = tp['comb_w'][:, M:].T        # (H, H)
    b_c = tp['comb_b'][None, :]         # (1, H)
    w_fcT = tp['fc_w'].T                # (H, M)
    b_fc = tp['fc_b'][None, :]          # (1, M)

    pieces = {
        'enc_wi_s': tp['e_wih'].T,      # (N_IN, 3H) gate-stacked [r|z|n]
        'enc_wh_s': tp['e_whh'].T,      # (H, 3H)
        'dec_wi_s': tp['d_wih'].T,
        'dec_wh_s': tp['d_whh'].T,
        'enc_bi_s': tp['e_bih'][None, :],
        'enc_bh_s': tp['e_bhh'][None, :],
        'dec_bi_s': tp['d_bih'][None, :],
        'dec_bh_s': tp['d_bhh'][None, :],
        'wa_h': wa_h,
        'wa_tot': wa_h + w_fcT @ wa_x,          # fc folded into attn x-path (t >= 1)
        'wc_h': wc_h,
        'wfcx': w_fcT @ wc_x,                   # fc folded into combine x-path (t >= 1)
        'w_fcT': w_fcT,
        'b_a': b_a,
        'b_a_tot': b_a + b_fc @ wa_x,
        'b_c': b_c,
        'b_c_tot': b_c + b_fc @ wc_x,
        'b_fc': b_fc,
    }
    slab = jnp.zeros((_SLAB_ROWS, _SLAB_COLS), jnp.float32)
    for name, (r0, r, c) in _LAYOUT.items():
        slab = slab.at[r0:r0 + r, 0:c].set(pieces[name].astype(jnp.float32))
    return slab


# ---------------- pure-JAX reference (direct transcription of the torch forward) ----------------
def reference_forward(state, tp):
    s = state.reshape(P, N_IN).astype(jnp.float32)

    def gru(x, h, w_ih, w_hh, b_ih, b_hh):
        gi = x @ w_ih.T + b_ih
        gh = h @ w_hh.T + b_hh
        i_r, i_z, i_n = jnp.split(gi, 3, axis=1)
        h_r, h_z, h_n = jnp.split(gh, 3, axis=1)
        r = jax.nn.sigmoid(i_r + h_r)
        z = jax.nn.sigmoid(i_z + h_z)
        n = jnp.tanh(i_n + r * h_n)
        return (1.0 - z) * n + z * h

    h = jnp.zeros((1, H), jnp.float32)
    enc = []
    for t in range(P):
        h = gru(s[t:t + 1], h, tp['e_wih'], tp['e_whh'], tp['e_bih'], tp['e_bhh'])
        enc.append(h)
    enc = jnp.concatenate(enc, axis=0)                       # (P, H)

    x = jnp.zeros((1, M), jnp.float32)
    outs = []
    for _ in range(P):
        a = jnp.concatenate([x, h], axis=1) @ tp['attn_w'].T + tp['attn_b'][None, :]
        a = jax.nn.softmax(a, axis=1)
        ctx = a @ enc
        comb = jnp.concatenate([x, ctx], axis=1) @ tp['comb_w'].T + tp['comb_b'][None, :]
        comb = jax.nn.relu(comb)
        h = gru(comb, h, tp['d_wih'], tp['d_whh'], tp['d_bih'], tp['d_bhh'])
        logits = h @ tp['fc_w'].T + tp['fc_b'][None, :]
        outs.append(logits)
        x = logits
    return jnp.stack(outs, axis=1)                           # (1, P, M)


if __name__ == "__main__":
    key = jax.random.PRNGKey(0)
    k_w, k_x = jax.random.split(key)
    tp = init_torch_params(k_w)
    slab = to_kernel_slab(tp)

    state = jax.random.normal(k_x, (K, P, N_IN), jnp.float32)   # (1, 8, 8)

    out = policy_forward(state, slab)
    out = jax.block_until_ready(out)

    ref = reference_forward(state, tp)
    assert out.shape == (1, P, N_OUT), out.shape
    assert bool(jnp.all(jnp.isfinite(out)))
    # tolerance accounts for the approx-EUP softmax reciprocal on the per-step critical path
    assert bool(jnp.allclose(out, ref, atol=2e-3, rtol=2e-3)), float(jnp.max(jnp.abs(out - ref)))
    print("KERNEL_OK")
</pallas_src>

<mosaic_0001>
module attributes {stable_mosaic.version = 11 : i64} {
  func.func @_policy_kernel(%arg0: memref<8x8xf32, #tpu.memory_space<vmem>>, %arg1: memref<336x96xf32, #tpu.memory_space<vmem>>, %arg2: memref<8x8xf32, #tpu.memory_space<vmem>>) attributes {dimension_semantics = [], scalar_prefetch = 0 : i64, scratch_operands = 0 : i64, tpu.core_type = #tpu.core_type<tc>} {
    %c8 = arith.constant 8 : index
    %c0 = arith.constant 0 : index
    %0 = vector.load %arg1[%c8, %c0] : memref<336x96xf32, #tpu.memory_space<vmem>>, vector<32x96xf32>
    %c112 = arith.constant 112 : index
    %c0_0 = arith.constant 0 : index
    %1 = vector.load %arg1[%c112, %c0_0] : memref<336x96xf32, #tpu.memory_space<vmem>>, vector<1x96xf32>
    %c40 = arith.constant 40 : index
    %c0_1 = arith.constant 0 : index
    %2 = vector.load %arg1[%c40, %c0_1] : memref<336x96xf32, #tpu.memory_space<vmem>>, vector<32x96xf32>
    %c72 = arith.constant 72 : index
    %c0_2 = arith.constant 0 : index
    %3 = vector.load %arg1[%c72, %c0_2] : memref<336x96xf32, #tpu.memory_space<vmem>>, vector<32x96xf32>
    %c120 = arith.constant 120 : index
    %c0_3 = arith.constant 0 : index
    %4 = vector.load %arg1[%c120, %c0_3] : memref<336x96xf32, #tpu.memory_space<vmem>>, vector<1x96xf32>
    %c128 = arith.constant 128 : index
    %c0_4 = arith.constant 0 : index
    %5 = vector.load %arg1[%c128, %c0_4] : memref<336x96xf32, #tpu.memory_space<vmem>>, vector<1x96xf32>
    %c136 = arith.constant 136 : index
    %c0_5 = arith.constant 0 : index
    %6 = vector.load %arg1[%c136, %c0_5] : memref<336x96xf32, #tpu.memory_space<vmem>>, vector<32x8xf32>
    %c168 = arith.constant 168 : index
    %c0_6 = arith.constant 0 : index
    %7 = vector.load %arg1[%c168, %c0_6] : memref<336x96xf32, #tpu.memory_space<vmem>>, vector<32x8xf32>
    %c296 = arith.constant 296 : index
    %c0_7 = arith.constant 0 : index
    %8 = vector.load %arg1[%c296, %c0_7] : memref<336x96xf32, #tpu.memory_space<vmem>>, vector<1x8xf32>
    %c304 = arith.constant 304 : index
    %c0_8 = arith.constant 0 : index
    %9 = vector.load %arg1[%c304, %c0_8] : memref<336x96xf32, #tpu.memory_space<vmem>>, vector<1x8xf32>
    %c200 = arith.constant 200 : index
    %c0_9 = arith.constant 0 : index
    %10 = vector.load %arg1[%c200, %c0_9] : memref<336x96xf32, #tpu.memory_space<vmem>>, vector<32x32xf32>
    %c232 = arith.constant 232 : index
    %c0_10 = arith.constant 0 : index
    %11 = vector.load %arg1[%c232, %c0_10] : memref<336x96xf32, #tpu.memory_space<vmem>>, vector<32x32xf32>
    %c312 = arith.constant 312 : index
    %c0_11 = arith.constant 0 : index
    %12 = vector.load %arg1[%c312, %c0_11] : memref<336x96xf32, #tpu.memory_space<vmem>>, vector<1x32xf32>
    %c320 = arith.constant 320 : index
    %c0_12 = arith.constant 0 : index
    %13 = vector.load %arg1[%c320, %c0_12] : memref<336x96xf32, #tpu.memory_space<vmem>>, vector<1x32xf32>
    %c264 = arith.constant 264 : index
    %c0_13 = arith.constant 0 : index
    %14 = vector.load %arg1[%c264, %c0_13] : memref<336x96xf32, #tpu.memory_space<vmem>>, vector<32x8xf32>
    %c328 = arith.constant 328 : index
    %c0_14 = arith.constant 0 : index
    %15 = vector.load %arg1[%c328, %c0_14] : memref<336x96xf32, #tpu.memory_space<vmem>>, vector<1x8xf32>
    %c0_15 = arith.constant 0 : index
    %c0_16 = arith.constant 0 : index
    %16 = vector.load %arg0[%c0_15, %c0_16] : memref<8x8xf32, #tpu.memory_space<vmem>>, vector<8x8xf32>
    %c0_17 = arith.constant 0 : index
    %c0_18 = arith.constant 0 : index
    %17 = vector.load %arg1[%c0_17, %c0_18] : memref<336x96xf32, #tpu.memory_space<vmem>>, vector<8x96xf32>
    %cst = arith.constant dense<0.000000e+00> : vector<8x96xf32>
    %18 = tpu.matmul %16, %17, %cst {dimension_numbers = #tpu.dot_dimension_numbers<[1], [0], [0], [1], [0, 0, 1, 1], [], []>} : vector<8x8xf32>, vector<8x96xf32>, vector<8x96xf32> -> vector<8x96xf32>
    %c104 = arith.constant 104 : index
    %c0_19 = arith.constant 0 : index
    %19 = vector.load %arg1[%c104, %c0_19] : memref<336x96xf32, #tpu.memory_space<vmem>>, vector<1x96xf32>
    %20 = vector.broadcast %19 : vector<1x96xf32> to vector<8x96xf32>
    %21 = arith.addf %18, %20 : vector<8x96xf32>
    %22 = tpu.iota {dimensions = array<i32: 0>} : vector<8x32xi32>
    %23 = tpu.iota {dimensions = array<i32: 0>} : vector<8x8xi32>
    %cst_20 = arith.constant 0.000000e+00 : f32
    %24 = vector.broadcast %cst_20 : f32 to vector<1x32xf32>
    %cst_21 = arith.constant 0.000000e+00 : f32
    %25 = vector.broadcast %cst_21 : f32 to vector<8x32xf32>
    %cst_22 = arith.constant dense<0.000000e+00> : vector<1x96xf32>
    %26 = tpu.matmul %24, %0, %cst_22 {dimension_numbers = #tpu.dot_dimension_numbers<[1], [0], [0], [1], [0, 0, 1, 1], [], []>} : vector<1x32xf32>, vector<32x96xf32>, vector<1x96xf32> -> vector<1x96xf32>
    %27 = arith.addf %26, %1 : vector<1x96xf32>
    %28 = vector.extract_strided_slice %21 {offsets = [0, 0], sizes = [1, 96], strides = [1, 1]} : vector<8x96xf32> to vector<1x96xf32>
    %29 = vector.extract_strided_slice %28 {offsets = [0, 0], sizes = [1, 32], strides = [1, 1]} : vector<1x96xf32> to vector<1x32xf32>
    %30 = vector.extract_strided_slice %27 {offsets = [0, 0], sizes = [1, 32], strides = [1, 1]} : vector<1x96xf32> to vector<1x32xf32>
    %31 = arith.addf %29, %30 : vector<1x32xf32>
    %32 = arith.negf %31 : vector<1x32xf32>
    %33 = math.exp %32 : vector<1x32xf32>
    %cst_23 = arith.constant 1.000000e+00 : f32
    %34 = vector.broadcast %cst_23 : f32 to vector<1x32xf32>
    %35 = arith.addf %34, %33 : vector<1x32xf32>
    %36 = arith.divf %34, %35 : vector<1x32xf32>
    %37 = vector.extract_strided_slice %28 {offsets = [0, 32], sizes = [1, 32], strides = [1, 1]} : vector<1x96xf32> to vector<1x32xf32>
    %38 = vector.extract_strided_slice %27 {offsets = [0, 32], sizes = [1, 32], strides = [1, 1]} : vector<1x96xf32> to vector<1x32xf32>
    %39 = arith.addf %37, %38 : vector<1x32xf32>
    %40 = arith.negf %39 : vector<1x32xf32>
    %41 = math.exp %40 : vector<1x32xf32>
    %cst_24 = arith.constant 1.000000e+00 : f32
    %42 = vector.broadcast %cst_24 : f32 to vector<1x32xf32>
    %43 = arith.addf %42, %41 : vector<1x32xf32>
    %44 = arith.divf %42, %43 : vector<1x32xf32>
    %45 = vector.extract_strided_slice %28 {offsets = [0, 64], sizes = [1, 32], strides = [1, 1]} : vector<1x96xf32> to vector<1x32xf32>
    %46 = vector.extract_strided_slice %27 {offsets = [0, 64], sizes = [1, 32], strides = [1, 1]} : vector<1x96xf32> to vector<1x32xf32>
    %47 = arith.mulf %36, %46 : vector<1x32xf32>
    %48 = arith.addf %45, %47 : vector<1x32xf32>
    %49 = math.tanh %48 : vector<1x32xf32>
    %cst_25 = arith.constant 1.000000e+00 : f32
    %50 = vector.broadcast %cst_25 : f32 to vector<1x32xf32>
    %51 = arith.subf %50, %44 : vector<1x32xf32>
    %52 = arith.mulf %51, %49 : vector<1x32xf32>
    %53 = arith.mulf %44, %24 : vector<1x32xf32>
    %54 = arith.addf %52, %53 : vector<1x32xf32>
    %c0_i32 = arith.constant 0 : i32
    %55 = vector.broadcast %c0_i32 : i32 to vector<8x32xi32>
    %56 = arith.cmpi eq, %22, %55 : vector<8x32xi32>
    %57 = vector.shape_cast %54 : vector<1x32xf32> to vector<1x32xf32>
    %58 = vector.broadcast %57 : vector<1x32xf32> to vector<8x32xf32>
    %59 = arith.select %56, %58, %25 : vector<8x32xi1>, vector<8x32xf32>
    %cst_26 = arith.constant dense<0.000000e+00> : vector<1x96xf32>
    %60 = tpu.matmul %54, %0, %cst_26 {dimension_numbers = #tpu.dot_dimension_numbers<[1], [0], [0], [1], [0, 0, 1, 1], [], []>} : vector<1x32xf32>, vector<32x96xf32>, vector<1x96xf32> -> vector<1x96xf32>
    %61 = arith.addf %60, %1 : vector<1x96xf32>
    %62 = vector.extract_strided_slice %21 {offsets = [1, 0], sizes = [1, 96], strides = [1, 1]} : vector<8x96xf32> to vector<1x96xf32>
    %63 = vector.extract_strided_slice %62 {offsets = [0, 0], sizes = [1, 32], strides = [1, 1]} : vector<1x96xf32> to vector<1x32xf32>
    %64 = vector.extract_strided_slice %61 {offsets = [0, 0], sizes = [1, 32], strides = [1, 1]} : vector<1x96xf32> to vector<1x32xf32>
    %65 = arith.addf %63, %64 : vector<1x32xf32>
    %66 = arith.negf %65 : vector<1x32xf32>
    %67 = math.exp %66 : vector<1x32xf32>
    %cst_27 = arith.constant 1.000000e+00 : f32
    %68 = vector.broadcast %cst_27 : f32 to vector<1x32xf32>
    %69 = arith.addf %68, %67 : vector<1x32xf32>
    %70 = arith.divf %68, %69 : vector<1x32xf32>
    %71 = vector.extract_strided_slice %62 {offsets = [0, 32], sizes = [1, 32], strides = [1, 1]} : vector<1x96xf32> to vector<1x32xf32>
    %72 = vector.extract_strided_slice %61 {offsets = [0, 32], sizes = [1, 32], strides = [1, 1]} : vector<1x96xf32> to vector<1x32xf32>
    %73 = arith.addf %71, %72 : vector<1x32xf32>
    %74 = arith.negf %73 : vector<1x32xf32>
    %75 = math.exp %74 : vector<1x32xf32>
    %cst_28 = arith.constant 1.000000e+00 : f32
    %76 = vector.broadcast %cst_28 : f32 to vector<1x32xf32>
    %77 = arith.addf %76, %75 : vector<1x32xf32>
    %78 = arith.divf %76, %77 : vector<1x32xf32>
    %79 = vector.extract_strided_slice %62 {offsets = [0, 64], sizes = [1, 32], strides = [1, 1]} : vector<1x96xf32> to vector<1x32xf32>
    %80 = vector.extract_strided_slice %61 {offsets = [0, 64], sizes = [1, 32], strides = [1, 1]} : vector<1x96xf32> to vector<1x32xf32>
    %81 = arith.mulf %70, %80 : vector<1x32xf32>
    %82 = arith.addf %79, %81 : vector<1x32xf32>
    %83 = math.tanh %82 : vector<1x32xf32>
    %cst_29 = arith.constant 1.000000e+00 : f32
    %84 = vector.broadcast %cst_29 : f32 to vector<1x32xf32>
    %85 = arith.subf %84, %78 : vector<1x32xf32>
    %86 = arith.mulf %85, %83 : vector<1x32xf32>
    %87 = arith.mulf %78, %54 : vector<1x32xf32>
    %88 = arith.addf %86, %87 : vector<1x32xf32>
    %c1_i32 = arith.constant 1 : i32
    %89 = vector.broadcast %c1_i32 : i32 to vector<8x32xi32>
    %90 = arith.cmpi eq, %22, %89 : vector<8x32xi32>
    %91 = vector.shape_cast %88 : vector<1x32xf32> to vector<1x32xf32>
    %92 = vector.broadcast %91 : vector<1x32xf32> to vector<8x32xf32>
    %93 = arith.select %90, %92, %59 : vector<8x32xi1>, vector<8x32xf32>
    %cst_30 = arith.constant dense<0.000000e+00> : vector<1x96xf32>
    %94 = tpu.matmul %88, %0, %cst_30 {dimension_numbers = #tpu.dot_dimension_numbers<[1], [0], [0], [1], [0, 0, 1, 1], [], []>} : vector<1x32xf32>, vector<32x96xf32>, vector<1x96xf32> -> vector<1x96xf32>
    %95 = arith.addf %94, %1 : vector<1x96xf32>
    %96 = vector.extract_strided_slice %21 {offsets = [2, 0], sizes = [1, 96], strides = [1, 1]} : vector<8x96xf32> to vector<1x96xf32>
    %97 = vector.extract_strided_slice %96 {offsets = [0, 0], sizes = [1, 32], strides = [1, 1]} : vector<1x96xf32> to vector<1x32xf32>
    %98 = vector.extract_strided_slice %95 {offsets = [0, 0], sizes = [1, 32], strides = [1, 1]} : vector<1x96xf32> to vector<1x32xf32>
    %99 = arith.addf %97, %98 : vector<1x32xf32>
    %100 = arith.negf %99 : vector<1x32xf32>
    %101 = math.exp %100 : vector<1x32xf32>
    %cst_31 = arith.constant 1.000000e+00 : f32
    %102 = vector.broadcast %cst_31 : f32 to vector<1x32xf32>
    %103 = arith.addf %102, %101 : vector<1x32xf32>
    %104 = arith.divf %102, %103 : vector<1x32xf32>
    %105 = vector.extract_strided_slice %96 {offsets = [0, 32], sizes = [1, 32], strides = [1, 1]} : vector<1x96xf32> to vector<1x32xf32>
    %106 = vector.extract_strided_slice %95 {offsets = [0, 32], sizes = [1, 32], strides = [1, 1]} : vector<1x96xf32> to vector<1x32xf32>
    %107 = arith.addf %105, %106 : vector<1x32xf32>
    %108 = arith.negf %107 : vector<1x32xf32>
    %109 = math.exp %108 : vector<1x32xf32>
    %cst_32 = arith.constant 1.000000e+00 : f32
    %110 = vector.broadcast %cst_32 : f32 to vector<1x32xf32>
    %111 = arith.addf %110, %109 : vector<1x32xf32>
    %112 = arith.divf %110, %111 : vector<1x32xf32>
    %113 = vector.extract_strided_slice %96 {offsets = [0, 64], sizes = [1, 32], strides = [1, 1]} : vector<1x96xf32> to vector<1x32xf32>
    %114 = vector.extract_strided_slice %95 {offsets = [0, 64], sizes = [1, 32], strides = [1, 1]} : vector<1x96xf32> to vector<1x32xf32>
    %115 = arith.mulf %104, %114 : vector<1x32xf32>
    %116 = arith.addf %113, %115 : vector<1x32xf32>
    %117 = math.tanh %116 : vector<1x32xf32>
    %cst_33 = arith.constant 1.000000e+00 : f32
    %118 = vector.broadcast %cst_33 : f32 to vector<1x32xf32>
    %119 = arith.subf %118, %112 : vector<1x32xf32>
    %120 = arith.mulf %119, %117 : vector<1x32xf32>
    %121 = arith.mulf %112, %88 : vector<1x32xf32>
    %122 = arith.addf %120, %121 : vector<1x32xf32>
    %c2_i32 = arith.constant 2 : i32
    %123 = vector.broadcast %c2_i32 : i32 to vector<8x32xi32>
    %124 = arith.cmpi eq, %22, %123 : vector<8x32xi32>
    %125 = vector.shape_cast %122 : vector<1x32xf32> to vector<1x32xf32>
    %126 = vector.broadcast %125 : vector<1x32xf32> to vector<8x32xf32>
    %127 = arith.select %124, %126, %93 : vector<8x32xi1>, vector<8x32xf32>
    %cst_34 = arith.constant dense<0.000000e+00> : vector<1x96xf32>
    %128 = tpu.matmul %122, %0, %cst_34 {dimension_numbers = #tpu.dot_dimension_numbers<[1], [0], [0], [1], [0, 0, 1, 1], [], []>} : vector<1x32xf32>, vector<32x96xf32>, vector<1x96xf32> -> vector<1x96xf32>
    %129 = arith.addf %128, %1 : vector<1x96xf32>
    %130 = vector.extract_strided_slice %21 {offsets = [3, 0], sizes = [1, 96], strides = [1, 1]} : vector<8x96xf32> to vector<1x96xf32>
    %131 = vector.extract_strided_slice %130 {offsets = [0, 0], sizes = [1, 32], strides = [1, 1]} : vector<1x96xf32> to vector<1x32xf32>
    %132 = vector.extract_strided_slice %129 {offsets = [0, 0], sizes = [1, 32], strides = [1, 1]} : vector<1x96xf32> to vector<1x32xf32>
    %133 = arith.addf %131, %132 : vector<1x32xf32>
    %134 = arith.negf %133 : vector<1x32xf32>
    %135 = math.exp %134 : vector<1x32xf32>
    %cst_35 = arith.constant 1.000000e+00 : f32
    %136 = vector.broadcast %cst_35 : f32 to vector<1x32xf32>
    %137 = arith.addf %136, %135 : vector<1x32xf32>
    %138 = arith.divf %136, %137 : vector<1x32xf32>
    %139 = vector.extract_strided_slice %130 {offsets = [0, 32], sizes = [1, 32], strides = [1, 1]} : vector<1x96xf32> to vector<1x32xf32>
    %140 = vector.extract_strided_slice %129 {offsets = [0, 32], sizes = [1, 32], strides = [1, 1]} : vector<1x96xf32> to vector<1x32xf32>
    %141 = arith.addf %139, %140 : vector<1x32xf32>
    %142 = arith.negf %141 : vector<1x32xf32>
    %143 = math.exp %142 : vector<1x32xf32>
    %cst_36 = arith.constant 1.000000e+00 : f32
    %144 = vector.broadcast %cst_36 : f32 to vector<1x32xf32>
    %145 = arith.addf %144, %143 : vector<1x32xf32>
    %146 = arith.divf %144, %145 : vector<1x32xf32>
    %147 = vector.extract_strided_slice %130 {offsets = [0, 64], sizes = [1, 32], strides = [1, 1]} : vector<1x96xf32> to vector<1x32xf32>
    %148 = vector.extract_strided_slice %129 {offsets = [0, 64], sizes = [1, 32], strides = [1, 1]} : vector<1x96xf32> to vector<1x32xf32>
    %149 = arith.mulf %138, %148 : vector<1x32xf32>
    %150 = arith.addf %147, %149 : vector<1x32xf32>
    %151 = math.tanh %150 : vector<1x32xf32>
    %cst_37 = arith.constant 1.000000e+00 : f32
    %152 = vector.broadcast %cst_37 : f32 to vector<1x32xf32>
    %153 = arith.subf %152, %146 : vector<1x32xf32>
    %154 = arith.mulf %153, %151 : vector<1x32xf32>
    %155 = arith.mulf %146, %122 : vector<1x32xf32>
    %156 = arith.addf %154, %155 : vector<1x32xf32>
    %c3_i32 = arith.constant 3 : i32
    %157 = vector.broadcast %c3_i32 : i32 to vector<8x32xi32>
    %158 = arith.cmpi eq, %22, %157 : vector<8x32xi32>
    %159 = vector.shape_cast %156 : vector<1x32xf32> to vector<1x32xf32>
    %160 = vector.broadcast %159 : vector<1x32xf32> to vector<8x32xf32>
    %161 = arith.select %158, %160, %127 : vector<8x32xi1>, vector<8x32xf32>
    %cst_38 = arith.constant dense<0.000000e+00> : vector<1x96xf32>
    %162 = tpu.matmul %156, %0, %cst_38 {dimension_numbers = #tpu.dot_dimension_numbers<[1], [0], [0], [1], [0, 0, 1, 1], [], []>} : vector<1x32xf32>, vector<32x96xf32>, vector<1x96xf32> -> vector<1x96xf32>
    %163 = arith.addf %162, %1 : vector<1x96xf32>
    %164 = vector.extract_strided_slice %21 {offsets = [4, 0], sizes = [1, 96], strides = [1, 1]} : vector<8x96xf32> to vector<1x96xf32>
    %165 = vector.extract_strided_slice %164 {offsets = [0, 0], sizes = [1, 32], strides = [1, 1]} : vector<1x96xf32> to vector<1x32xf32>
    %166 = vector.extract_strided_slice %163 {offsets = [0, 0], sizes = [1, 32], strides = [1, 1]} : vector<1x96xf32> to vector<1x32xf32>
    %167 = arith.addf %165, %166 : vector<1x32xf32>
    %168 = arith.negf %167 : vector<1x32xf32>
    %169 = math.exp %168 : vector<1x32xf32>
    %cst_39 = arith.constant 1.000000e+00 : f32
    %170 = vector.broadcast %cst_39 : f32 to vector<1x32xf32>
    %171 = arith.addf %170, %169 : vector<1x32xf32>
    %172 = arith.divf %170, %171 : vector<1x32xf32>
    %173 = vector.extract_strided_slice %164 {offsets = [0, 32], sizes = [1, 32], strides = [1, 1]} : vector<1x96xf32> to vector<1x32xf32>
    %174 = vector.extract_strided_slice %163 {offsets = [0, 32], sizes = [1, 32], strides = [1, 1]} : vector<1x96xf32> to vector<1x32xf32>
    %175 = arith.addf %173, %174 : vector<1x32xf32>
    %176 = arith.negf %175 : vector<1x32xf32>
    %177 = math.exp %176 : vector<1x32xf32>
    %cst_40 = arith.constant 1.000000e+00 : f32
    %178 = vector.broadcast %cst_40 : f32 to vector<1x32xf32>
    %179 = arith.addf %178, %177 : vector<1x32xf32>
    %180 = arith.divf %178, %179 : vector<1x32xf32>
    %181 = vector.extract_strided_slice %164 {offsets = [0, 64], sizes = [1, 32], strides = [1, 1]} : vector<1x96xf32> to vector<1x32xf32>
    %182 = vector.extract_strided_slice %163 {offsets = [0, 64], sizes = [1, 32], strides = [1, 1]} : vector<1x96xf32> to vector<1x32xf32>
    %183 = arith.mulf %172, %182 : vector<1x32xf32>
    %184 = arith.addf %181, %183 : vector<1x32xf32>
    %185 = math.tanh %184 : vector<1x32xf32>
    %cst_41 = arith.constant 1.000000e+00 : f32
    %186 = vector.broadcast %cst_41 : f32 to vector<1x32xf32>
    %187 = arith.subf %186, %180 : vector<1x32xf32>
    %188 = arith.mulf %187, %185 : vector<1x32xf32>
    %189 = arith.mulf %180, %156 : vector<1x32xf32>
    %190 = arith.addf %188, %189 : vector<1x32xf32>
    %c4_i32 = arith.constant 4 : i32
    %191 = vector.broadcast %c4_i32 : i32 to vector<8x32xi32>
    %192 = arith.cmpi eq, %22, %191 : vector<8x32xi32>
    %193 = vector.shape_cast %190 : vector<1x32xf32> to vector<1x32xf32>
    %194 = vector.broadcast %193 : vector<1x32xf32> to vector<8x32xf32>
    %195 = arith.select %192, %194, %161 : vector<8x32xi1>, vector<8x32xf32>
    %cst_42 = arith.constant dense<0.000000e+00> : vector<1x96xf32>
    %196 = tpu.matmul %190, %0, %cst_42 {dimension_numbers = #tpu.dot_dimension_numbers<[1], [0], [0], [1], [0, 0, 1, 1], [], []>} : vector<1x32xf32>, vector<32x96xf32>, vector<1x96xf32> -> vector<1x96xf32>
    %197 = arith.addf %196, %1 : vector<1x96xf32>
    %198 = vector.extract_strided_slice %21 {offsets = [5, 0], sizes = [1, 96], strides = [1, 1]} : vector<8x96xf32> to vector<1x96xf32>
    %199 = vector.extract_strided_slice %198 {offsets = [0, 0], sizes = [1, 32], strides = [1, 1]} : vector<1x96xf32> to vector<1x32xf32>
    %200 = vector.extract_strided_slice %197 {offsets = [0, 0], sizes = [1, 32], strides = [1, 1]} : vector<1x96xf32> to vector<1x32xf32>
    %201 = arith.addf %199, %200 : vector<1x32xf32>
    %202 = arith.negf %201 : vector<1x32xf32>
    %203 = math.exp %202 : vector<1x32xf32>
    %cst_43 = arith.constant 1.000000e+00 : f32
    %204 = vector.broadcast %cst_43 : f32 to vector<1x32xf32>
    %205 = arith.addf %204, %203 : vector<1x32xf32>
    %206 = arith.divf %204, %205 : vector<1x32xf32>
    %207 = vector.extract_strided_slice %198 {offsets = [0, 32], sizes = [1, 32], strides = [1, 1]} : vector<1x96xf32> to vector<1x32xf32>
    %208 = vector.extract_strided_slice %197 {offsets = [0, 32], sizes = [1, 32], strides = [1, 1]} : vector<1x96xf32> to vector<1x32xf32>
    %209 = arith.addf %207, %208 : vector<1x32xf32>
    %210 = arith.negf %209 : vector<1x32xf32>
    %211 = math.exp %210 : vector<1x32xf32>
    %cst_44 = arith.constant 1.000000e+00 : f32
    %212 = vector.broadcast %cst_44 : f32 to vector<1x32xf32>
    %213 = arith.addf %212, %211 : vector<1x32xf32>
    %214 = arith.divf %212, %213 : vector<1x32xf32>
    %215 = vector.extract_strided_slice %198 {offsets = [0, 64], sizes = [1, 32], strides = [1, 1]} : vector<1x96xf32> to vector<1x32xf32>
    %216 = vector.extract_strided_slice %197 {offsets = [0, 64], sizes = [1, 32], strides = [1, 1]} : vector<1x96xf32> to vector<1x32xf32>
    %217 = arith.mulf %206, %216 : vector<1x32xf32>
    %218 = arith.addf %215, %217 : vector<1x32xf32>
    %219 = math.tanh %218 : vector<1x32xf32>
    %cst_45 = arith.constant 1.000000e+00 : f32
    %220 = vector.broadcast %cst_45 : f32 to vector<1x32xf32>
    %221 = arith.subf %220, %214 : vector<1x32xf32>
    %222 = arith.mulf %221, %219 : vector<1x32xf32>
    %223 = arith.mulf %214, %190 : vector<1x32xf32>
    %224 = arith.addf %222, %223 : vector<1x32xf32>
    %c5_i32 = arith.constant 5 : i32
    %225 = vector.broadcast %c5_i32 : i32 to vector<8x32xi32>
    %226 = arith.cmpi eq, %22, %225 : vector<8x32xi32>
    %227 = vector.shape_cast %224 : vector<1x32xf32> to vector<1x32xf32>
    %228 = vector.broadcast %227 : vector<1x32xf32> to vector<8x32xf32>
    %229 = arith.select %226, %228, %195 : vector<8x32xi1>, vector<8x32xf32>
    %cst_46 = arith.constant dense<0.000000e+00> : vector<1x96xf32>
    %230 = tpu.matmul %224, %0, %cst_46 {dimension_numbers = #tpu.dot_dimension_numbers<[1], [0], [0], [1], [0, 0, 1, 1], [], []>} : vector<1x32xf32>, vector<32x96xf32>, vector<1x96xf32> -> vector<1x96xf32>
    %231 = arith.addf %230, %1 : vector<1x96xf32>
    %232 = vector.extract_strided_slice %21 {offsets = [6, 0], sizes = [1, 96], strides = [1, 1]} : vector<8x96xf32> to vector<1x96xf32>
    %233 = vector.extract_strided_slice %232 {offsets = [0, 0], sizes = [1, 32], strides = [1, 1]} : vector<1x96xf32> to vector<1x32xf32>
    %234 = vector.extract_strided_slice %231 {offsets = [0, 0], sizes = [1, 32], strides = [1, 1]} : vector<1x96xf32> to vector<1x32xf32>
    %235 = arith.addf %233, %234 : vector<1x32xf32>
    %236 = arith.negf %235 : vector<1x32xf32>
    %237 = math.exp %236 : vector<1x32xf32>
    %cst_47 = arith.constant 1.000000e+00 : f32
    %238 = vector.broadcast %cst_47 : f32 to vector<1x32xf32>
    %239 = arith.addf %238, %237 : vector<1x32xf32>
    %240 = arith.divf %238, %239 : vector<1x32xf32>
    %241 = vector.extract_strided_slice %232 {offsets = [0, 32], sizes = [1, 32], strides = [1, 1]} : vector<1x96xf32> to vector<1x32xf32>
    %242 = vector.extract_strided_slice %231 {offsets = [0, 32], sizes = [1, 32], strides = [1, 1]} : vector<1x96xf32> to vector<1x32xf32>
    %243 = arith.addf %241, %242 : vector<1x32xf32>
    %244 = arith.negf %243 : vector<1x32xf32>
    %245 = math.exp %244 : vector<1x32xf32>
    %cst_48 = arith.constant 1.000000e+00 : f32
    %246 = vector.broadcast %cst_48 : f32 to vector<1x32xf32>
    %247 = arith.addf %246, %245 : vector<1x32xf32>
    %248 = arith.divf %246, %247 : vector<1x32xf32>
    %249 = vector.extract_strided_slice %232 {offsets = [0, 64], sizes = [1, 32], strides = [1, 1]} : vector<1x96xf32> to vector<1x32xf32>
    %250 = vector.extract_strided_slice %231 {offsets = [0, 64], sizes = [1, 32], strides = [1, 1]} : vector<1x96xf32> to vector<1x32xf32>
    %251 = arith.mulf %240, %250 : vector<1x32xf32>
    %252 = arith.addf %249, %251 : vector<1x32xf32>
    %253 = math.tanh %252 : vector<1x32xf32>
    %cst_49 = arith.constant 1.000000e+00 : f32
    %254 = vector.broadcast %cst_49 : f32 to vector<1x32xf32>
    %255 = arith.subf %254, %248 : vector<1x32xf32>
    %256 = arith.mulf %255, %253 : vector<1x32xf32>
    %257 = arith.mulf %248, %224 : vector<1x32xf32>
    %258 = arith.addf %256, %257 : vector<1x32xf32>
    %c6_i32 = arith.constant 6 : i32
    %259 = vector.broadcast %c6_i32 : i32 to vector<8x32xi32>
    %260 = arith.cmpi eq, %22, %259 : vector<8x32xi32>
    %261 = vector.shape_cast %258 : vector<1x32xf32> to vector<1x32xf32>
    %262 = vector.broadcast %261 : vector<1x32xf32> to vector<8x32xf32>
    %263 = arith.select %260, %262, %229 : vector<8x32xi1>, vector<8x32xf32>
    %cst_50 = arith.constant dense<0.000000e+00> : vector<1x96xf32>
    %264 = tpu.matmul %258, %0, %cst_50 {dimension_numbers = #tpu.dot_dimension_numbers<[1], [0], [0], [1], [0, 0, 1, 1], [], []>} : vector<1x32xf32>, vector<32x96xf32>, vector<1x96xf32> -> vector<1x96xf32>
    %265 = arith.addf %264, %1 : vector<1x96xf32>
    %266 = vector.extract_strided_slice %21 {offsets = [7, 0], sizes = [1, 96], strides = [1, 1]} : vector<8x96xf32> to vector<1x96xf32>
    %267 = vector.extract_strided_slice %266 {offsets = [0, 0], sizes = [1, 32], strides = [1, 1]} : vector<1x96xf32> to vector<1x32xf32>
    %268 = vector.extract_strided_slice %265 {offsets = [0, 0], sizes = [1, 32], strides = [1, 1]} : vector<1x96xf32> to vector<1x32xf32>
    %269 = arith.addf %267, %268 : vector<1x32xf32>
    %270 = arith.negf %269 : vector<1x32xf32>
    %271 = math.exp %270 : vector<1x32xf32>
    %cst_51 = arith.constant 1.000000e+00 : f32
    %272 = vector.broadcast %cst_51 : f32 to vector<1x32xf32>
    %273 = arith.addf %272, %271 : vector<1x32xf32>
    %274 = arith.divf %272, %273 : vector<1x32xf32>
    %275 = vector.extract_strided_slice %266 {offsets = [0, 32], sizes = [1, 32], strides = [1, 1]} : vector<1x96xf32> to vector<1x32xf32>
    %276 = vector.extract_strided_slice %265 {offsets = [0, 32], sizes = [1, 32], strides = [1, 1]} : vector<1x96xf32> to vector<1x32xf32>
    %277 = arith.addf %275, %276 : vector<1x32xf32>
    %278 = arith.negf %277 : vector<1x32xf32>
    %279 = math.exp %278 : vector<1x32xf32>
    %cst_52 = arith.constant 1.000000e+00 : f32
    %280 = vector.broadcast %cst_52 : f32 to vector<1x32xf32>
    %281 = arith.addf %280, %279 : vector<1x32xf32>
    %282 = arith.divf %280, %281 : vector<1x32xf32>
    %283 = vector.extract_strided_slice %266 {offsets = [0, 64], sizes = [1, 32], strides = [1, 1]} : vector<1x96xf32> to vector<1x32xf32>
    %284 = vector.extract_strided_slice %265 {offsets = [0, 64], sizes = [1, 32], strides = [1, 1]} : vector<1x96xf32> to vector<1x32xf32>
    %285 = arith.mulf %274, %284 : vector<1x32xf32>
    %286 = arith.addf %283, %285 : vector<1x32xf32>
    %287 = math.tanh %286 : vector<1x32xf32>
    %cst_53 = arith.constant 1.000000e+00 : f32
    %288 = vector.broadcast %cst_53 : f32 to vector<1x32xf32>
    %289 = arith.subf %288, %282 : vector<1x32xf32>
    %290 = arith.mulf %289, %287 : vector<1x32xf32>
    %291 = arith.mulf %282, %258 : vector<1x32xf32>
    %292 = arith.addf %290, %291 : vector<1x32xf32>
    %c7_i32 = arith.constant 7 : i32
    %293 = vector.broadcast %c7_i32 : i32 to vector<8x32xi32>
    %294 = arith.cmpi eq, %22, %293 : vector<8x32xi32>
    %295 = vector.shape_cast %292 : vector<1x32xf32> to vector<1x32xf32>
    %296 = vector.broadcast %295 : vector<1x32xf32> to vector<8x32xf32>
    %297 = arith.select %294, %296, %263 : vector<8x32xi1>, vector<8x32xf32>
    %cst_54 = arith.constant 0.000000e+00 : f32
    %298 = vector.broadcast %cst_54 : f32 to vector<8x8xf32>
    %cst_55 = arith.constant dense<0.000000e+00> : vector<1x8xf32>
    %299 = tpu.matmul %292, %6, %cst_55 {dimension_numbers = #tpu.dot_dimension_numbers<[1], [0], [0], [1], [0, 0, 1, 1], [], []>} : vector<1x32xf32>, vector<32x8xf32>, vector<1x8xf32> -> vector<1x8xf32>
    %300 = arith.addf %299, %8 : vector<1x8xf32>
    %cst_56 = arith.constant dense<0xFF800000> : vector<1xf32>
    %301 = vector.multi_reduction <maximumf>, %300, %cst_56 [1] : vector<1x8xf32> to vector<1xf32>
    %302 = vector.shape_cast %301 : vector<1xf32> to vector<1x1xf32>
    %303 = vector.broadcast %302 : vector<1x1xf32> to vector<1x8xf32>
    %304 = arith.subf %300, %303 : vector<1x8xf32>
    %305 = math.exp %304 : vector<1x8xf32>
    %cst_57 = arith.constant dense<0.000000e+00> : vector<1xf32>
    %306 = vector.multi_reduction <add>, %305, %cst_57 [1] : vector<1x8xf32> to vector<1xf32>
    %307 = vector.shape_cast %306 : vector<1xf32> to vector<1x1xf32>
    %308 = tpu.reciprocal %307 {approx = true} : vector<1x1xf32> -> vector<1x1xf32>
    %309 = vector.broadcast %308 : vector<1x1xf32> to vector<1x8xf32>
    %310 = arith.mulf %305, %309 : vector<1x8xf32>
    %cst_58 = arith.constant dense<0.000000e+00> : vector<1x32xf32>
    %311 = tpu.matmul %310, %297, %cst_58 {dimension_numbers = #tpu.dot_dimension_numbers<[1], [0], [0], [1], [0, 0, 1, 1], [], []>} : vector<1x8xf32>, vector<8x32xf32>, vector<1x32xf32> -> vector<1x32xf32>
    %cst_59 = arith.constant dense<0.000000e+00> : vector<1x32xf32>
    %312 = tpu.matmul %311, %10, %cst_59 {dimension_numbers = #tpu.dot_dimension_numbers<[1], [0], [0], [1], [0, 0, 1, 1], [], []>} : vector<1x32xf32>, vector<32x32xf32>, vector<1x32xf32> -> vector<1x32xf32>
    %313 = arith.addf %312, %12 : vector<1x32xf32>
    %cst_60 = arith.constant 0.000000e+00 : f32
    %314 = vector.broadcast %cst_60 : f32 to vector<1x32xf32>
    %315 = arith.maximumf %313, %314 : vector<1x32xf32>
    %cst_61 = arith.constant dense<0.000000e+00> : vector<1x96xf32>
    %316 = tpu.matmul %315, %2, %cst_61 {dimension_numbers = #tpu.dot_dimension_numbers<[1], [0], [0], [1], [0, 0, 1, 1], [], []>} : vector<1x32xf32>, vector<32x96xf32>, vector<1x96xf32> -> vector<1x96xf32>
    %317 = arith.addf %316, %4 : vector<1x96xf32>
    %cst_62 = arith.constant dense<0.000000e+00> : vector<1x96xf32>
    %318 = tpu.matmul %292, %3, %cst_62 {dimension_numbers = #tpu.dot_dimension_numbers<[1], [0], [0], [1], [0, 0, 1, 1], [], []>} : vector<1x32xf32>, vector<32x96xf32>, vector<1x96xf32> -> vector<1x96xf32>
    %319 = arith.addf %318, %5 : vector<1x96xf32>
    %320 = vector.extract_strided_slice %317 {offsets = [0, 0], sizes = [1, 32], strides = [1, 1]} : vector<1x96xf32> to vector<1x32xf32>
    %321 = vector.extract_strided_slice %319 {offsets = [0, 0], sizes = [1, 32], strides = [1, 1]} : vector<1x96xf32> to vector<1x32xf32>
    %322 = arith.addf %320, %321 : vector<1x32xf32>
    %323 = arith.negf %322 : vector<1x32xf32>
    %324 = math.exp %323 : vector<1x32xf32>
    %cst_63 = arith.constant 1.000000e+00 : f32
    %325 = vector.broadcast %cst_63 : f32 to vector<1x32xf32>
    %326 = arith.addf %325, %324 : vector<1x32xf32>
    %327 = arith.divf %325, %326 : vector<1x32xf32>
    %328 = vector.extract_strided_slice %317 {offsets = [0, 32], sizes = [1, 32], strides = [1, 1]} : vector<1x96xf32> to vector<1x32xf32>
    %329 = vector.extract_strided_slice %319 {offsets = [0, 32], sizes = [1, 32], strides = [1, 1]} : vector<1x96xf32> to vector<1x32xf32>
    %330 = arith.addf %328, %329 : vector<1x32xf32>
    %331 = arith.negf %330 : vector<1x32xf32>
    %332 = math.exp %331 : vector<1x32xf32>
    %cst_64 = arith.constant 1.000000e+00 : f32
    %333 = vector.broadcast %cst_64 : f32 to vector<1x32xf32>
    %334 = arith.addf %333, %332 : vector<1x32xf32>
    %335 = arith.divf %333, %334 : vector<1x32xf32>
    %336 = vector.extract_strided_slice %317 {offsets = [0, 64], sizes = [1, 32], strides = [1, 1]} : vector<1x96xf32> to vector<1x32xf32>
    %337 = vector.extract_strided_slice %319 {offsets = [0, 64], sizes = [1, 32], strides = [1, 1]} : vector<1x96xf32> to vector<1x32xf32>
    %338 = arith.mulf %327, %337 : vector<1x32xf32>
    %339 = arith.addf %336, %338 : vector<1x32xf32>
    %340 = math.tanh %339 : vector<1x32xf32>
    %cst_65 = arith.constant 1.000000e+00 : f32
    %341 = vector.broadcast %cst_65 : f32 to vector<1x32xf32>
    %342 = arith.subf %341, %335 : vector<1x32xf32>
    %343 = arith.mulf %342, %340 : vector<1x32xf32>
    %344 = arith.mulf %335, %292 : vector<1x32xf32>
    %345 = arith.addf %343, %344 : vector<1x32xf32>
    %cst_66 = arith.constant dense<0.000000e+00> : vector<1x8xf32>
    %346 = tpu.matmul %345, %14, %cst_66 {dimension_numbers = #tpu.dot_dimension_numbers<[1], [0], [0], [1], [0, 0, 1, 1], [], []>} : vector<1x32xf32>, vector<32x8xf32>, vector<1x8xf32> -> vector<1x8xf32>
    %347 = arith.addf %346, %15 : vector<1x8xf32>
    %c0_i32_67 = arith.constant 0 : i32
    %348 = vector.broadcast %c0_i32_67 : i32 to vector<8x8xi32>
    %349 = arith.cmpi eq, %23, %348 : vector<8x8xi32>
    %350 = vector.shape_cast %347 : vector<1x8xf32> to vector<1x8xf32>
    %351 = vector.broadcast %350 : vector<1x8xf32> to vector<8x8xf32>
    %352 = arith.select %349, %351, %298 : vector<8x8xi1>, vector<8x8xf32>
    %cst_68 = arith.constant dense<0.000000e+00> : vector<1x8xf32>
    %353 = tpu.matmul %345, %7, %cst_68 {dimension_numbers = #tpu.dot_dimension_numbers<[1], [0], [0], [1], [0, 0, 1, 1], [], []>} : vector<1x32xf32>, vector<32x8xf32>, vector<1x8xf32> -> vector<1x8xf32>
    %354 = arith.addf %353, %9 : vector<1x8xf32>
    %cst_69 = arith.constant dense<0xFF800000> : vector<1xf32>
    %355 = vector.multi_reduction <maximumf>, %354, %cst_69 [1] : vector<1x8xf32> to vector<1xf32>
    %356 = vector.shape_cast %355 : vector<1xf32> to vector<1x1xf32>
    %357 = vector.broadcast %356 : vector<1x1xf32> to vector<1x8xf32>
    %358 = arith.subf %354, %357 : vector<1x8xf32>
    %359 = math.exp %358 : vector<1x8xf32>
    %cst_70 = arith.constant dense<0.000000e+00> : vector<1xf32>
    %360 = vector.multi_reduction <add>, %359, %cst_70 [1] : vector<1x8xf32> to vector<1xf32>
    %361 = vector.shape_cast %360 : vector<1xf32> to vector<1x1xf32>
    %362 = tpu.reciprocal %361 {approx = true} : vector<1x1xf32> -> vector<1x1xf32>
    %363 = vector.broadcast %362 : vector<1x1xf32> to vector<1x8xf32>
    %364 = arith.mulf %359, %363 : vector<1x8xf32>
    %cst_71 = arith.constant dense<0.000000e+00> : vector<1x32xf32>
    %365 = tpu.matmul %364, %297, %cst_71 {dimension_numbers = #tpu.dot_dimension_numbers<[1], [0], [0], [1], [0, 0, 1, 1], [], []>} : vector<1x8xf32>, vector<8x32xf32>, vector<1x32xf32> -> vector<1x32xf32>
    %cst_72 = arith.constant dense<0.000000e+00> : vector<1x32xf32>
    %366 = tpu.matmul %345, %11, %cst_72 {dimension_numbers = #tpu.dot_dimension_numbers<[1], [0], [0], [1], [0, 0, 1, 1], [], []>} : vector<1x32xf32>, vector<32x32xf32>, vector<1x32xf32> -> vector<1x32xf32>
    %cst_73 = arith.constant dense<0.000000e+00> : vector<1x32xf32>
    %367 = tpu.matmul %365, %10, %cst_73 {dimension_numbers = #tpu.dot_dimension_numbers<[1], [0], [0], [1], [0, 0, 1, 1], [], []>} : vector<1x32xf32>, vector<32x32xf32>, vector<1x32xf32> -> vector<1x32xf32>
    %368 = arith.addf %366, %367 : vector<1x32xf32>
    %369 = arith.addf %368, %13 : vector<1x32xf32>
    %cst_74 = arith.constant 0.000000e+00 : f32
    %370 = vector.broadcast %cst_74 : f32 to vector<1x32xf32>
    %371 = arith.maximumf %369, %370 : vector<1x32xf32>
    %cst_75 = arith.constant dense<0.000000e+00> : vector<1x96xf32>
    %372 = tpu.matmul %371, %2, %cst_75 {dimension_numbers = #tpu.dot_dimension_numbers<[1], [0], [0], [1], [0, 0, 1, 1], [], []>} : vector<1x32xf32>, vector<32x96xf32>, vector<1x96xf32> -> vector<1x96xf32>
    %373 = arith.addf %372, %4 : vector<1x96xf32>
    %cst_76 = arith.constant dense<0.000000e+00> : vector<1x96xf32>
    %374 = tpu.matmul %345, %3, %cst_76 {dimension_numbers = #tpu.dot_dimension_numbers<[1], [0], [0], [1], [0, 0, 1, 1], [], []>} : vector<1x32xf32>, vector<32x96xf32>, vector<1x96xf32> -> vector<1x96xf32>
    %375 = arith.addf %374, %5 : vector<1x96xf32>
    %376 = vector.extract_strided_slice %373 {offsets = [0, 0], sizes = [1, 32], strides = [1, 1]} : vector<1x96xf32> to vector<1x32xf32>
    %377 = vector.extract_strided_slice %375 {offsets = [0, 0], sizes = [1, 32], strides = [1, 1]} : vector<1x96xf32> to vector<1x32xf32>
    %378 = arith.addf %376, %377 : vector<1x32xf32>
    %379 = arith.negf %378 : vector<1x32xf32>
    %380 = math.exp %379 : vector<1x32xf32>
    %cst_77 = arith.constant 1.000000e+00 : f32
    %381 = vector.broadcast %cst_77 : f32 to vector<1x32xf32>
    %382 = arith.addf %381, %380 : vector<1x32xf32>
    %383 = arith.divf %381, %382 : vector<1x32xf32>
    %384 = vector.extract_strided_slice %373 {offsets = [0, 32], sizes = [1, 32], strides = [1, 1]} : vector<1x96xf32> to vector<1x32xf32>
    %385 = vector.extract_strided_slice %375 {offsets = [0, 32], sizes = [1, 32], strides = [1, 1]} : vector<1x96xf32> to vector<1x32xf32>
    %386 = arith.addf %384, %385 : vector<1x32xf32>
    %387 = arith.negf %386 : vector<1x32xf32>
    %388 = math.exp %387 : vector<1x32xf32>
    %cst_78 = arith.constant 1.000000e+00 : f32
    %389 = vector.broadcast %cst_78 : f32 to vector<1x32xf32>
    %390 = arith.addf %389, %388 : vector<1x32xf32>
    %391 = arith.divf %389, %390 : vector<1x32xf32>
    %392 = vector.extract_strided_slice %373 {offsets = [0, 64], sizes = [1, 32], strides = [1, 1]} : vector<1x96xf32> to vector<1x32xf32>
    %393 = vector.extract_strided_slice %375 {offsets = [0, 64], sizes = [1, 32], strides = [1, 1]} : vector<1x96xf32> to vector<1x32xf32>
    %394 = arith.mulf %383, %393 : vector<1x32xf32>
    %395 = arith.addf %392, %394 : vector<1x32xf32>
    %396 = math.tanh %395 : vector<1x32xf32>
    %cst_79 = arith.constant 1.000000e+00 : f32
    %397 = vector.broadcast %cst_79 : f32 to vector<1x32xf32>
    %398 = arith.subf %397, %391 : vector<1x32xf32>
    %399 = arith.mulf %398, %396 : vector<1x32xf32>
    %400 = arith.mulf %391, %345 : vector<1x32xf32>
    %401 = arith.addf %399, %400 : vector<1x32xf32>
    %cst_80 = arith.constant dense<0.000000e+00> : vector<1x8xf32>
    %402 = tpu.matmul %401, %14, %cst_80 {dimension_numbers = #tpu.dot_dimension_numbers<[1], [0], [0], [1], [0, 0, 1, 1], [], []>} : vector<1x32xf32>, vector<32x8xf32>, vector<1x8xf32> -> vector<1x8xf32>
    %403 = arith.addf %402, %15 : vector<1x8xf32>
    %c1_i32_81 = arith.constant 1 : i32
    %404 = vector.broadcast %c1_i32_81 : i32 to vector<8x8xi32>
    %405 = arith.cmpi eq, %23, %404 : vector<8x8xi32>
    %406 = vector.shape_cast %403 : vector<1x8xf32> to vector<1x8xf32>
    %407 = vector.broadcast %406 : vector<1x8xf32> to vector<8x8xf32>
    %408 = arith.select %405, %407, %352 : vector<8x8xi1>, vector<8x8xf32>
    %cst_82 = arith.constant dense<0.000000e+00> : vector<1x8xf32>
    %409 = tpu.matmul %401, %7, %cst_82 {dimension_numbers = #tpu.dot_dimension_numbers<[1], [0], [0], [1], [0, 0, 1, 1], [], []>} : vector<1x32xf32>, vector<32x8xf32>, vector<1x8xf32> -> vector<1x8xf32>
    %410 = arith.addf %409, %9 : vector<1x8xf32>
    %cst_83 = arith.constant dense<0xFF800000> : vector<1xf32>
    %411 = vector.multi_reduction <maximumf>, %410, %cst_83 [1] : vector<1x8xf32> to vector<1xf32>
    %412 = vector.shape_cast %411 : vector<1xf32> to vector<1x1xf32>
    %413 = vector.broadcast %412 : vector<1x1xf32> to vector<1x8xf32>
    %414 = arith.subf %410, %413 : vector<1x8xf32>
    %415 = math.exp %414 : vector<1x8xf32>
    %cst_84 = arith.constant dense<0.000000e+00> : vector<1xf32>
    %416 = vector.multi_reduction <add>, %415, %cst_84 [1] : vector<1x8xf32> to vector<1xf32>
    %417 = vector.shape_cast %416 : vector<1xf32> to vector<1x1xf32>
    %418 = tpu.reciprocal %417 {approx = true} : vector<1x1xf32> -> vector<1x1xf32>
    %419 = vector.broadcast %418 : vector<1x1xf32> to vector<1x8xf32>
    %420 = arith.mulf %415, %419 : vector<1x8xf32>
    %cst_85 = arith.constant dense<0.000000e+00> : vector<1x32xf32>
    %421 = tpu.matmul %420, %297, %cst_85 {dimension_numbers = #tpu.dot_dimension_numbers<[1], [0], [0], [1], [0, 0, 1, 1], [], []>} : vector<1x8xf32>, vector<8x32xf32>, vector<1x32xf32> -> vector<1x32xf32>
    %cst_86 = arith.constant dense<0.000000e+00> : vector<1x32xf32>
    %422 = tpu.matmul %401, %11, %cst_86 {dimension_numbers = #tpu.dot_dimension_numbers<[1], [0], [0], [1], [0, 0, 1, 1], [], []>} : vector<1x32xf32>, vector<32x32xf32>, vector<1x32xf32> -> vector<1x32xf32>
    %cst_87 = arith.constant dense<0.000000e+00> : vector<1x32xf32>
    %423 = tpu.matmul %421, %10, %cst_87 {dimension_numbers = #tpu.dot_dimension_numbers<[1], [0], [0], [1], [0, 0, 1, 1], [], []>} : vector<1x32xf32>, vector<32x32xf32>, vector<1x32xf32> -> vector<1x32xf32>
    %424 = arith.addf %422, %423 : vector<1x32xf32>
    %425 = arith.addf %424, %13 : vector<1x32xf32>
    %cst_88 = arith.constant 0.000000e+00 : f32
    %426 = vector.broadcast %cst_88 : f32 to vector<1x32xf32>
    %427 = arith.maximumf %425, %426 : vector<1x32xf32>
    %cst_89 = arith.constant dense<0.000000e+00> : vector<1x96xf32>
    %428 = tpu.matmul %427, %2, %cst_89 {dimension_numbers = #tpu.dot_dimension_numbers<[1], [0], [0], [1], [0, 0, 1, 1], [], []>} : vector<1x32xf32>, vector<32x96xf32>, vector<1x96xf32> -> vector<1x96xf32>
    %429 = arith.addf %428, %4 : vector<1x96xf32>
    %cst_90 = arith.constant dense<0.000000e+00> : vector<1x96xf32>
    %430 = tpu.matmul %401, %3, %cst_90 {dimension_numbers = #tpu.dot_dimension_numbers<[1], [0], [0], [1], [0, 0, 1, 1], [], []>} : vector<1x32xf32>, vector<32x96xf32>, vector<1x96xf32> -> vector<1x96xf32>
    %431 = arith.addf %430, %5 : vector<1x96xf32>
    %432 = vector.extract_strided_slice %429 {offsets = [0, 0], sizes = [1, 32], strides = [1, 1]} : vector<1x96xf32> to vector<1x32xf32>
    %433 = vector.extract_strided_slice %431 {offsets = [0, 0], sizes = [1, 32], strides = [1, 1]} : vector<1x96xf32> to vector<1x32xf32>
    %434 = arith.addf %432, %433 : vector<1x32xf32>
    %435 = arith.negf %434 : vector<1x32xf32>
    %436 = math.exp %435 : vector<1x32xf32>
    %cst_91 = arith.constant 1.000000e+00 : f32
    %437 = vector.broadcast %cst_91 : f32 to vector<1x32xf32>
    %438 = arith.addf %437, %436 : vector<1x32xf32>
    %439 = arith.divf %437, %438 : vector<1x32xf32>
    %440 = vector.extract_strided_slice %429 {offsets = [0, 32], sizes = [1, 32], strides = [1, 1]} : vector<1x96xf32> to vector<1x32xf32>
    %441 = vector.extract_strided_slice %431 {offsets = [0, 32], sizes = [1, 32], strides = [1, 1]} : vector<1x96xf32> to vector<1x32xf32>
    %442 = arith.addf %440, %441 : vector<1x32xf32>
    %443 = arith.negf %442 : vector<1x32xf32>
    %444 = math.exp %443 : vector<1x32xf32>
    %cst_92 = arith.constant 1.000000e+00 : f32
    %445 = vector.broadcast %cst_92 : f32 to vector<1x32xf32>
    %446 = arith.addf %445, %444 : vector<1x32xf32>
    %447 = arith.divf %445, %446 : vector<1x32xf32>
    %448 = vector.extract_strided_slice %429 {offsets = [0, 64], sizes = [1, 32], strides = [1, 1]} : vector<1x96xf32> to vector<1x32xf32>
    %449 = vector.extract_strided_slice %431 {offsets = [0, 64], sizes = [1, 32], strides = [1, 1]} : vector<1x96xf32> to vector<1x32xf32>
    %450 = arith.mulf %439, %449 : vector<1x32xf32>
    %451 = arith.addf %448, %450 : vector<1x32xf32>
    %452 = math.tanh %451 : vector<1x32xf32>
    %cst_93 = arith.constant 1.000000e+00 : f32
    %453 = vector.broadcast %cst_93 : f32 to vector<1x32xf32>
    %454 = arith.subf %453, %447 : vector<1x32xf32>
    %455 = arith.mulf %454, %452 : vector<1x32xf32>
    %456 = arith.mulf %447, %401 : vector<1x32xf32>
    %457 = arith.addf %455, %456 : vector<1x32xf32>
    %cst_94 = arith.constant dense<0.000000e+00> : vector<1x8xf32>
    %458 = tpu.matmul %457, %14, %cst_94 {dimension_numbers = #tpu.dot_dimension_numbers<[1], [0], [0], [1], [0, 0, 1, 1], [], []>} : vector<1x32xf32>, vector<32x8xf32>, vector<1x8xf32> -> vector<1x8xf32>
    %459 = arith.addf %458, %15 : vector<1x8xf32>
    %c2_i32_95 = arith.constant 2 : i32
    %460 = vector.broadcast %c2_i32_95 : i32 to vector<8x8xi32>
    %461 = arith.cmpi eq, %23, %460 : vector<8x8xi32>
    %462 = vector.shape_cast %459 : vector<1x8xf32> to vector<1x8xf32>
    %463 = vector.broadcast %462 : vector<1x8xf32> to vector<8x8xf32>
    %464 = arith.select %461, %463, %408 : vector<8x8xi1>, vector<8x8xf32>
    %cst_96 = arith.constant dense<0.000000e+00> : vector<1x8xf32>
    %465 = tpu.matmul %457, %7, %cst_96 {dimension_numbers = #tpu.dot_dimension_numbers<[1], [0], [0], [1], [0, 0, 1, 1], [], []>} : vector<1x32xf32>, vector<32x8xf32>, vector<1x8xf32> -> vector<1x8xf32>
    %466 = arith.addf %465, %9 : vector<1x8xf32>
    %cst_97 = arith.constant dense<0xFF800000> : vector<1xf32>
    %467 = vector.multi_reduction <maximumf>, %466, %cst_97 [1] : vector<1x8xf32> to vector<1xf32>
    %468 = vector.shape_cast %467 : vector<1xf32> to vector<1x1xf32>
    %469 = vector.broadcast %468 : vector<1x1xf32> to vector<1x8xf32>
    %470 = arith.subf %466, %469 : vector<1x8xf32>
    %471 = math.exp %470 : vector<1x8xf32>
    %cst_98 = arith.constant dense<0.000000e+00> : vector<1xf32>
    %472 = vector.multi_reduction <add>, %471, %cst_98 [1] : vector<1x8xf32> to vector<1xf32>
    %473 = vector.shape_cast %472 : vector<1xf32> to vector<1x1xf32>
    %474 = tpu.reciprocal %473 {approx = true} : vector<1x1xf32> -> vector<1x1xf32>
    %475 = vector.broadcast %474 : vector<1x1xf32> to vector<1x8xf32>
    %476 = arith.mulf %471, %475 : vector<1x8xf32>
    %cst_99 = arith.constant dense<0.000000e+00> : vector<1x32xf32>
    %477 = tpu.matmul %476, %297, %cst_99 {dimension_numbers = #tpu.dot_dimension_numbers<[1], [0], [0], [1], [0, 0, 1, 1], [], []>} : vector<1x8xf32>, vector<8x32xf32>, vector<1x32xf32> -> vector<1x32xf32>
    %cst_100 = arith.constant dense<0.000000e+00> : vector<1x32xf32>
    %478 = tpu.matmul %457, %11, %cst_100 {dimension_numbers = #tpu.dot_dimension_numbers<[1], [0], [0], [1], [0, 0, 1, 1], [], []>} : vector<1x32xf32>, vector<32x32xf32>, vector<1x32xf32> -> vector<1x32xf32>
    %cst_101 = arith.constant dense<0.000000e+00> : vector<1x32xf32>
    %479 = tpu.matmul %477, %10, %cst_101 {dimension_numbers = #tpu.dot_dimension_numbers<[1], [0], [0], [1], [0, 0, 1, 1], [], []>} : vector<1x32xf32>, vector<32x32xf32>, vector<1x32xf32> -> vector<1x32xf32>
    %480 = arith.addf %478, %479 : vector<1x32xf32>
    %481 = arith.addf %480, %13 : vector<1x32xf32>
    %cst_102 = arith.constant 0.000000e+00 : f32
    %482 = vector.broadcast %cst_102 : f32 to vector<1x32xf32>
    %483 = arith.maximumf %481, %482 : vector<1x32xf32>
    %cst_103 = arith.constant dense<0.000000e+00> : vector<1x96xf32>
    %484 = tpu.matmul %483, %2, %cst_103 {dimension_numbers = #tpu.dot_dimension_numbers<[1], [0], [0], [1], [0, 0, 1, 1], [], []>} : vector<1x32xf32>, vector<32x96xf32>, vector<1x96xf32> -> vector<1x96xf32>
    %485 = arith.addf %484, %4 : vector<1x96xf32>
    %cst_104 = arith.constant dense<0.000000e+00> : vector<1x96xf32>
    %486 = tpu.matmul %457, %3, %cst_104 {dimension_numbers = #tpu.dot_dimension_numbers<[1], [0], [0], [1], [0, 0, 1, 1], [], []>} : vector<1x32xf32>, vector<32x96xf32>, vector<1x96xf32> -> vector<1x96xf32>
    %487 = arith.addf %486, %5 : vector<1x96xf32>
    %488 = vector.extract_strided_slice %485 {offsets = [0, 0], sizes = [1, 32], strides = [1, 1]} : vector<1x96xf32> to vector<1x32xf32>
    %489 = vector.extract_strided_slice %487 {offsets = [0, 0], sizes = [1, 32], strides = [1, 1]} : vector<1x96xf32> to vector<1x32xf32>
    %490 = arith.addf %488, %489 : vector<1x32xf32>
    %491 = arith.negf %490 : vector<1x32xf32>
    %492 = math.exp %491 : vector<1x32xf32>
    %cst_105 = arith.constant 1.000000e+00 : f32
    %493 = vector.broadcast %cst_105 : f32 to vector<1x32xf32>
    %494 = arith.addf %493, %492 : vector<1x32xf32>
    %495 = arith.divf %493, %494 : vector<1x32xf32>
    %496 = vector.extract_strided_slice %485 {offsets = [0, 32], sizes = [1, 32], strides = [1, 1]} : vector<1x96xf32> to vector<1x32xf32>
    %497 = vector.extract_strided_slice %487 {offsets = [0, 32], sizes = [1, 32], strides = [1, 1]} : vector<1x96xf32> to vector<1x32xf32>
    %498 = arith.addf %496, %497 : vector<1x32xf32>
    %499 = arith.negf %498 : vector<1x32xf32>
    %500 = math.exp %499 : vector<1x32xf32>
    %cst_106 = arith.constant 1.000000e+00 : f32
    %501 = vector.broadcast %cst_106 : f32 to vector<1x32xf32>
    %502 = arith.addf %501, %500 : vector<1x32xf32>
    %503 = arith.divf %501, %502 : vector<1x32xf32>
    %504 = vector.extract_strided_slice %485 {offsets = [0, 64], sizes = [1, 32], strides = [1, 1]} : vector<1x96xf32> to vector<1x32xf32>
    %505 = vector.extract_strided_slice %487 {offsets = [0, 64], sizes = [1, 32], strides = [1, 1]} : vector<1x96xf32> to vector<1x32xf32>
    %506 = arith.mulf %495, %505 : vector<1x32xf32>
    %507 = arith.addf %504, %506 : vector<1x32xf32>
    %508 = math.tanh %507 : vector<1x32xf32>
    %cst_107 = arith.constant 1.000000e+00 : f32
    %509 = vector.broadcast %cst_107 : f32 to vector<1x32xf32>
    %510 = arith.subf %509, %503 : vector<1x32xf32>
    %511 = arith.mulf %510, %508 : vector<1x32xf32>
    %512 = arith.mulf %503, %457 : vector<1x32xf32>
    %513 = arith.addf %511, %512 : vector<1x32xf32>
    %cst_108 = arith.constant dense<0.000000e+00> : vector<1x8xf32>
    %514 = tpu.matmul %513, %14, %cst_108 {dimension_numbers = #tpu.dot_dimension_numbers<[1], [0], [0], [1], [0, 0, 1, 1], [], []>} : vector<1x32xf32>, vector<32x8xf32>, vector<1x8xf32> -> vector<1x8xf32>
    %515 = arith.addf %514, %15 : vector<1x8xf32>
    %c3_i32_109 = arith.constant 3 : i32
    %516 = vector.broadcast %c3_i32_109 : i32 to vector<8x8xi32>
    %517 = arith.cmpi eq, %23, %516 : vector<8x8xi32>
    %518 = vector.shape_cast %515 : vector<1x8xf32> to vector<1x8xf32>
    %519 = vector.broadcast %518 : vector<1x8xf32> to vector<8x8xf32>
    %520 = arith.select %517, %519, %464 : vector<8x8xi1>, vector<8x8xf32>
    %cst_110 = arith.constant dense<0.000000e+00> : vector<1x8xf32>
    %521 = tpu.matmul %513, %7, %cst_110 {dimension_numbers = #tpu.dot_dimension_numbers<[1], [0], [0], [1], [0, 0, 1, 1], [], []>} : vector<1x32xf32>, vector<32x8xf32>, vector<1x8xf32> -> vector<1x8xf32>
    %522 = arith.addf %521, %9 : vector<1x8xf32>
    %cst_111 = arith.constant dense<0xFF800000> : vector<1xf32>
    %523 = vector.multi_reduction <maximumf>, %522, %cst_111 [1] : vector<1x8xf32> to vector<1xf32>
    %524 = vector.shape_cast %523 : vector<1xf32> to vector<1x1xf32>
    %525 = vector.broadcast %524 : vector<1x1xf32> to vector<1x8xf32>
    %526 = arith.subf %522, %525 : vector<1x8xf32>
    %527 = math.exp %526 : vector<1x8xf32>
    %cst_112 = arith.constant dense<0.000000e+00> : vector<1xf32>
    %528 = vector.multi_reduction <add>, %527, %cst_112 [1] : vector<1x8xf32> to vector<1xf32>
    %529 = vector.shape_cast %528 : vector<1xf32> to vector<1x1xf32>
    %530 = tpu.reciprocal %529 {approx = true} : vector<1x1xf32> -> vector<1x1xf32>
    %531 = vector.broadcast %530 : vector<1x1xf32> to vector<1x8xf32>
    %532 = arith.mulf %527, %531 : vector<1x8xf32>
    %cst_113 = arith.constant dense<0.000000e+00> : vector<1x32xf32>
    %533 = tpu.matmul %532, %297, %cst_113 {dimension_numbers = #tpu.dot_dimension_numbers<[1], [0], [0], [1], [0, 0, 1, 1], [], []>} : vector<1x8xf32>, vector<8x32xf32>, vector<1x32xf32> -> vector<1x32xf32>
    %cst_114 = arith.constant dense<0.000000e+00> : vector<1x32xf32>
    %534 = tpu.matmul %513, %11, %cst_114 {dimension_numbers = #tpu.dot_dimension_numbers<[1], [0], [0], [1], [0, 0, 1, 1], [], []>} : vector<1x32xf32>, vector<32x32xf32>, vector<1x32xf32> -> vector<1x32xf32>
    %cst_115 = arith.constant dense<0.000000e+00> : vector<1x32xf32>
    %535 = tpu.matmul %533, %10, %cst_115 {dimension_numbers = #tpu.dot_dimension_numbers<[1], [0], [0], [1], [0, 0, 1, 1], [], []>} : vector<1x32xf32>, vector<32x32xf32>, vector<1x32xf32> -> vector<1x32xf32>
    %536 = arith.addf %534, %535 : vector<1x32xf32>
    %537 = arith.addf %536, %13 : vector<1x32xf32>
    %cst_116 = arith.constant 0.000000e+00 : f32
    %538 = vector.broadcast %cst_116 : f32 to vector<1x32xf32>
    %539 = arith.maximumf %537, %538 : vector<1x32xf32>
    %cst_117 = arith.constant dense<0.000000e+00> : vector<1x96xf32>
    %540 = tpu.matmul %539, %2, %cst_117 {dimension_numbers = #tpu.dot_dimension_numbers<[1], [0], [0], [1], [0, 0, 1, 1], [], []>} : vector<1x32xf32>, vector<32x96xf32>, vector<1x96xf32> -> vector<1x96xf32>
    %541 = arith.addf %540, %4 : vector<1x96xf32>
    %cst_118 = arith.constant dense<0.000000e+00> : vector<1x96xf32>
    %542 = tpu.matmul %513, %3, %cst_118 {dimension_numbers = #tpu.dot_dimension_numbers<[1], [0], [0], [1], [0, 0, 1, 1], [], []>} : vector<1x32xf32>, vector<32x96xf32>, vector<1x96xf32> -> vector<1x96xf32>
    %543 = arith.addf %542, %5 : vector<1x96xf32>
    %544 = vector.extract_strided_slice %541 {offsets = [0, 0], sizes = [1, 32], strides = [1, 1]} : vector<1x96xf32> to vector<1x32xf32>
    %545 = vector.extract_strided_slice %543 {offsets = [0, 0], sizes = [1, 32], strides = [1, 1]} : vector<1x96xf32> to vector<1x32xf32>
    %546 = arith.addf %544, %545 : vector<1x32xf32>
    %547 = arith.negf %546 : vector<1x32xf32>
    %548 = math.exp %547 : vector<1x32xf32>
    %cst_119 = arith.constant 1.000000e+00 : f32
    %549 = vector.broadcast %cst_119 : f32 to vector<1x32xf32>
    %550 = arith.addf %549, %548 : vector<1x32xf32>
    %551 = arith.divf %549, %550 : vector<1x32xf32>
    %552 = vector.extract_strided_slice %541 {offsets = [0, 32], sizes = [1, 32], strides = [1, 1]} : vector<1x96xf32> to vector<1x32xf32>
    %553 = vector.extract_strided_slice %543 {offsets = [0, 32], sizes = [1, 32], strides = [1, 1]} : vector<1x96xf32> to vector<1x32xf32>
    %554 = arith.addf %552, %553 : vector<1x32xf32>
    %555 = arith.negf %554 : vector<1x32xf32>
    %556 = math.exp %555 : vector<1x32xf32>
    %cst_120 = arith.constant 1.000000e+00 : f32
    %557 = vector.broadcast %cst_120 : f32 to vector<1x32xf32>
    %558 = arith.addf %557, %556 : vector<1x32xf32>
    %559 = arith.divf %557, %558 : vector<1x32xf32>
    %560 = vector.extract_strided_slice %541 {offsets = [0, 64], sizes = [1, 32], strides = [1, 1]} : vector<1x96xf32> to vector<1x32xf32>
    %561 = vector.extract_strided_slice %543 {offsets = [0, 64], sizes = [1, 32], strides = [1, 1]} : vector<1x96xf32> to vector<1x32xf32>
    %562 = arith.mulf %551, %561 : vector<1x32xf32>
    %563 = arith.addf %560, %562 : vector<1x32xf32>
    %564 = math.tanh %563 : vector<1x32xf32>
    %cst_121 = arith.constant 1.000000e+00 : f32
    %565 = vector.broadcast %cst_121 : f32 to vector<1x32xf32>
    %566 = arith.subf %565, %559 : vector<1x32xf32>
    %567 = arith.mulf %566, %564 : vector<1x32xf32>
    %568 = arith.mulf %559, %513 : vector<1x32xf32>
    %569 = arith.addf %567, %568 : vector<1x32xf32>
    %cst_122 = arith.constant dense<0.000000e+00> : vector<1x8xf32>
    %570 = tpu.matmul %569, %14, %cst_122 {dimension_numbers = #tpu.dot_dimension_numbers<[1], [0], [0], [1], [0, 0, 1, 1], [], []>} : vector<1x32xf32>, vector<32x8xf32>, vector<1x8xf32> -> vector<1x8xf32>
    %571 = arith.addf %570, %15 : vector<1x8xf32>
    %c4_i32_123 = arith.constant 4 : i32
    %572 = vector.broadcast %c4_i32_123 : i32 to vector<8x8xi32>
    %573 = arith.cmpi eq, %23, %572 : vector<8x8xi32>
    %574 = vector.shape_cast %571 : vector<1x8xf32> to vector<1x8xf32>
    %575 = vector.broadcast %574 : vector<1x8xf32> to vector<8x8xf32>
    %576 = arith.select %573, %575, %520 : vector<8x8xi1>, vector<8x8xf32>
    %cst_124 = arith.constant dense<0.000000e+00> : vector<1x8xf32>
    %577 = tpu.matmul %569, %7, %cst_124 {dimension_numbers = #tpu.dot_dimension_numbers<[1], [0], [0], [1], [0, 0, 1, 1], [], []>} : vector<1x32xf32>, vector<32x8xf32>, vector<1x8xf32> -> vector<1x8xf32>
    %578 = arith.addf %577, %9 : vector<1x8xf32>
    %cst_125 = arith.constant dense<0xFF800000> : vector<1xf32>
    %579 = vector.multi_reduction <maximumf>, %578, %cst_125 [1] : vector<1x8xf32> to vector<1xf32>
    %580 = vector.shape_cast %579 : vector<1xf32> to vector<1x1xf32>
    %581 = vector.broadcast %580 : vector<1x1xf32> to vector<1x8xf32>
    %582 = arith.subf %578, %581 : vector<1x8xf32>
    %583 = math.exp %582 : vector<1x8xf32>
    %cst_126 = arith.constant dense<0.000000e+00> : vector<1xf32>
    %584 = vector.multi_reduction <add>, %583, %cst_126 [1] : vector<1x8xf32> to vector<1xf32>
    %585 = vector.shape_cast %584 : vector<1xf32> to vector<1x1xf32>
    %586 = tpu.reciprocal %585 {approx = true} : vector<1x1xf32> -> vector<1x1xf32>
    %587 = vector.broadcast %586 : vector<1x1xf32> to vector<1x8xf32>
    %588 = arith.mulf %583, %587 : vector<1x8xf32>
    %cst_127 = arith.constant dense<0.000000e+00> : vector<1x32xf32>
    %589 = tpu.matmul %588, %297, %cst_127 {dimension_numbers = #tpu.dot_dimension_numbers<[1], [0], [0], [1], [0, 0, 1, 1], [], []>} : vector<1x8xf32>, vector<8x32xf32>, vector<1x32xf32> -> vector<1x32xf32>
    %cst_128 = arith.constant dense<0.000000e+00> : vector<1x32xf32>
    %590 = tpu.matmul %569, %11, %cst_128 {dimension_numbers = #tpu.dot_dimension_numbers<[1], [0], [0], [1], [0, 0, 1, 1], [], []>} : vector<1x32xf32>, vector<32x32xf32>, vector<1x32xf32> -> vector<1x32xf32>
    %cst_129 = arith.constant dense<0.000000e+00> : vector<1x32xf32>
    %591 = tpu.matmul %589, %10, %cst_129 {dimension_numbers = #tpu.dot_dimension_numbers<[1], [0], [0], [1], [0, 0, 1, 1], [], []>} : vector<1x32xf32>, vector<32x32xf32>, vector<1x32xf32> -> vector<1x32xf32>
    %592 = arith.addf %590, %591 : vector<1x32xf32>
    %593 = arith.addf %592, %13 : vector<1x32xf32>
    %cst_130 = arith.constant 0.000000e+00 : f32
    %594 = vector.broadcast %cst_130 : f32 to vector<1x32xf32>
    %595 = arith.maximumf %593, %594 : vector<1x32xf32>
    %cst_131 = arith.constant dense<0.000000e+00> : vector<1x96xf32>
    %596 = tpu.matmul %595, %2, %cst_131 {dimension_numbers = #tpu.dot_dimension_numbers<[1], [0], [0], [1], [0, 0, 1, 1], [], []>} : vector<1x32xf32>, vector<32x96xf32>, vector<1x96xf32> -> vector<1x96xf32>
    %597 = arith.addf %596, %4 : vector<1x96xf32>
    %cst_132 = arith.constant dense<0.000000e+00> : vector<1x96xf32>
    %598 = tpu.matmul %569, %3, %cst_132 {dimension_numbers = #tpu.dot_dimension_numbers<[1], [0], [0], [1], [0, 0, 1, 1], [], []>} : vector<1x32xf32>, vector<32x96xf32>, vector<1x96xf32> -> vector<1x96xf32>
    %599 = arith.addf %598, %5 : vector<1x96xf32>
    %600 = vector.extract_strided_slice %597 {offsets = [0, 0], sizes = [1, 32], strides = [1, 1]} : vector<1x96xf32> to vector<1x32xf32>
    %601 = vector.extract_strided_slice %599 {offsets = [0, 0], sizes = [1, 32], strides = [1, 1]} : vector<1x96xf32> to vector<1x32xf32>
    %602 = arith.addf %600, %601 : vector<1x32xf32>
    %603 = arith.negf %602 : vector<1x32xf32>
    %604 = math.exp %603 : vector<1x32xf32>
    %cst_133 = arith.constant 1.000000e+00 : f32
    %605 = vector.broadcast %cst_133 : f32 to vector<1x32xf32>
    %606 = arith.addf %605, %604 : vector<1x32xf32>
    %607 = arith.divf %605, %606 : vector<1x32xf32>
    %608 = vector.extract_strided_slice %597 {offsets = [0, 32], sizes = [1, 32], strides = [1, 1]} : vector<1x96xf32> to vector<1x32xf32>
    %609 = vector.extract_strided_slice %599 {offsets = [0, 32], sizes = [1, 32], strides = [1, 1]} : vector<1x96xf32> to vector<1x32xf32>
    %610 = arith.addf %608, %609 : vector<1x32xf32>
    %611 = arith.negf %610 : vector<1x32xf32>
    %612 = math.exp %611 : vector<1x32xf32>
    %cst_134 = arith.constant 1.000000e+00 : f32
    %613 = vector.broadcast %cst_134 : f32 to vector<1x32xf32>
    %614 = arith.addf %613, %612 : vector<1x32xf32>
    %615 = arith.divf %613, %614 : vector<1x32xf32>
    %616 = vector.extract_strided_slice %597 {offsets = [0, 64], sizes = [1, 32], strides = [1, 1]} : vector<1x96xf32> to vector<1x32xf32>
    %617 = vector.extract_strided_slice %599 {offsets = [0, 64], sizes = [1, 32], strides = [1, 1]} : vector<1x96xf32> to vector<1x32xf32>
    %618 = arith.mulf %607, %617 : vector<1x32xf32>
    %619 = arith.addf %616, %618 : vector<1x32xf32>
    %620 = math.tanh %619 : vector<1x32xf32>
    %cst_135 = arith.constant 1.000000e+00 : f32
    %621 = vector.broadcast %cst_135 : f32 to vector<1x32xf32>
    %622 = arith.subf %621, %615 : vector<1x32xf32>
    %623 = arith.mulf %622, %620 : vector<1x32xf32>
    %624 = arith.mulf %615, %569 : vector<1x32xf32>
    %625 = arith.addf %623, %624 : vector<1x32xf32>
    %cst_136 = arith.constant dense<0.000000e+00> : vector<1x8xf32>
    %626 = tpu.matmul %625, %14, %cst_136 {dimension_numbers = #tpu.dot_dimension_numbers<[1], [0], [0], [1], [0, 0, 1, 1], [], []>} : vector<1x32xf32>, vector<32x8xf32>, vector<1x8xf32> -> vector<1x8xf32>
    %627 = arith.addf %626, %15 : vector<1x8xf32>
    %c5_i32_137 = arith.constant 5 : i32
    %628 = vector.broadcast %c5_i32_137 : i32 to vector<8x8xi32>
    %629 = arith.cmpi eq, %23, %628 : vector<8x8xi32>
    %630 = vector.shape_cast %627 : vector<1x8xf32> to vector<1x8xf32>
    %631 = vector.broadcast %630 : vector<1x8xf32> to vector<8x8xf32>
    %632 = arith.select %629, %631, %576 : vector<8x8xi1>, vector<8x8xf32>
    %cst_138 = arith.constant dense<0.000000e+00> : vector<1x8xf32>
    %633 = tpu.matmul %625, %7, %cst_138 {dimension_numbers = #tpu.dot_dimension_numbers<[1], [0], [0], [1], [0, 0, 1, 1], [], []>} : vector<1x32xf32>, vector<32x8xf32>, vector<1x8xf32> -> vector<1x8xf32>
    %634 = arith.addf %633, %9 : vector<1x8xf32>
    %cst_139 = arith.constant dense<0xFF800000> : vector<1xf32>
    %635 = vector.multi_reduction <maximumf>, %634, %cst_139 [1] : vector<1x8xf32> to vector<1xf32>
    %636 = vector.shape_cast %635 : vector<1xf32> to vector<1x1xf32>
    %637 = vector.broadcast %636 : vector<1x1xf32> to vector<1x8xf32>
    %638 = arith.subf %634, %637 : vector<1x8xf32>
    %639 = math.exp %638 : vector<1x8xf32>
    %cst_140 = arith.constant dense<0.000000e+00> : vector<1xf32>
    %640 = vector.multi_reduction <add>, %639, %cst_140 [1] : vector<1x8xf32> to vector<1xf32>
    %641 = vector.shape_cast %640 : vector<1xf32> to vector<1x1xf32>
    %642 = tpu.reciprocal %641 {approx = true} : vector<1x1xf32> -> vector<1x1xf32>
    %643 = vector.broadcast %642 : vector<1x1xf32> to vector<1x8xf32>
    %644 = arith.mulf %639, %643 : vector<1x8xf32>
    %cst_141 = arith.constant dense<0.000000e+00> : vector<1x32xf32>
    %645 = tpu.matmul %644, %297, %cst_141 {dimension_numbers = #tpu.dot_dimension_numbers<[1], [0], [0], [1], [0, 0, 1, 1], [], []>} : vector<1x8xf32>, vector<8x32xf32>, vector<1x32xf32> -> vector<1x32xf32>
    %cst_142 = arith.constant dense<0.000000e+00> : vector<1x32xf32>
    %646 = tpu.matmul %625, %11, %cst_142 {dimension_numbers = #tpu.dot_dimension_numbers<[1], [0], [0], [1], [0, 0, 1, 1], [], []>} : vector<1x32xf32>, vector<32x32xf32>, vector<1x32xf32> -> vector<1x32xf32>
    %cst_143 = arith.constant dense<0.000000e+00> : vector<1x32xf32>
    %647 = tpu.matmul %645, %10, %cst_143 {dimension_numbers = #tpu.dot_dimension_numbers<[1], [0], [0], [1], [0, 0, 1, 1], [], []>} : vector<1x32xf32>, vector<32x32xf32>, vector<1x32xf32> -> vector<1x32xf32>
    %648 = arith.addf %646, %647 : vector<1x32xf32>
    %649 = arith.addf %648, %13 : vector<1x32xf32>
    %cst_144 = arith.constant 0.000000e+00 : f32
    %650 = vector.broadcast %cst_144 : f32 to vector<1x32xf32>
    %651 = arith.maximumf %649, %650 : vector<1x32xf32>
    %cst_145 = arith.constant dense<0.000000e+00> : vector<1x96xf32>
    %652 = tpu.matmul %651, %2, %cst_145 {dimension_numbers = #tpu.dot_dimension_numbers<[1], [0], [0], [1], [0, 0, 1, 1], [], []>} : vector<1x32xf32>, vector<32x96xf32>, vector<1x96xf32> -> vector<1x96xf32>
    %653 = arith.addf %652, %4 : vector<1x96xf32>
    %cst_146 = arith.constant dense<0.000000e+00> : vector<1x96xf32>
    %654 = tpu.matmul %625, %3, %cst_146 {dimension_numbers = #tpu.dot_dimension_numbers<[1], [0], [0], [1], [0, 0, 1, 1], [], []>} : vector<1x32xf32>, vector<32x96xf32>, vector<1x96xf32> -> vector<1x96xf32>
    %655 = arith.addf %654, %5 : vector<1x96xf32>
    %656 = vector.extract_strided_slice %653 {offsets = [0, 0], sizes = [1, 32], strides = [1, 1]} : vector<1x96xf32> to vector<1x32xf32>
    %657 = vector.extract_strided_slice %655 {offsets = [0, 0], sizes = [1, 32], strides = [1, 1]} : vector<1x96xf32> to vector<1x32xf32>
    %658 = arith.addf %656, %657 : vector<1x32xf32>
    %659 = arith.negf %658 : vector<1x32xf32>
    %660 = math.exp %659 : vector<1x32xf32>
    %cst_147 = arith.constant 1.000000e+00 : f32
    %661 = vector.broadcast %cst_147 : f32 to vector<1x32xf32>
    %662 = arith.addf %661, %660 : vector<1x32xf32>
    %663 = arith.divf %661, %662 : vector<1x32xf32>
    %664 = vector.extract_strided_slice %653 {offsets = [0, 32], sizes = [1, 32], strides = [1, 1]} : vector<1x96xf32> to vector<1x32xf32>
    %665 = vector.extract_strided_slice %655 {offsets = [0, 32], sizes = [1, 32], strides = [1, 1]} : vector<1x96xf32> to vector<1x32xf32>
    %666 = arith.addf %664, %665 : vector<1x32xf32>
    %667 = arith.negf %666 : vector<1x32xf32>
    %668 = math.exp %667 : vector<1x32xf32>
    %cst_148 = arith.constant 1.000000e+00 : f32
    %669 = vector.broadcast %cst_148 : f32 to vector<1x32xf32>
    %670 = arith.addf %669, %668 : vector<1x32xf32>
    %671 = arith.divf %669, %670 : vector<1x32xf32>
    %672 = vector.extract_strided_slice %653 {offsets = [0, 64], sizes = [1, 32], strides = [1, 1]} : vector<1x96xf32> to vector<1x32xf32>
    %673 = vector.extract_strided_slice %655 {offsets = [0, 64], sizes = [1, 32], strides = [1, 1]} : vector<1x96xf32> to vector<1x32xf32>
    %674 = arith.mulf %663, %673 : vector<1x32xf32>
    %675 = arith.addf %672, %674 : vector<1x32xf32>
    %676 = math.tanh %675 : vector<1x32xf32>
    %cst_149 = arith.constant 1.000000e+00 : f32
    %677 = vector.broadcast %cst_149 : f32 to vector<1x32xf32>
    %678 = arith.subf %677, %671 : vector<1x32xf32>
    %679 = arith.mulf %678, %676 : vector<1x32xf32>
    %680 = arith.mulf %671, %625 : vector<1x32xf32>
    %681 = arith.addf %679, %680 : vector<1x32xf32>
    %cst_150 = arith.constant dense<0.000000e+00> : vector<1x8xf32>
    %682 = tpu.matmul %681, %14, %cst_150 {dimension_numbers = #tpu.dot_dimension_numbers<[1], [0], [0], [1], [0, 0, 1, 1], [], []>} : vector<1x32xf32>, vector<32x8xf32>, vector<1x8xf32> -> vector<1x8xf32>
    %683 = arith.addf %682, %15 : vector<1x8xf32>
    %c6_i32_151 = arith.constant 6 : i32
    %684 = vector.broadcast %c6_i32_151 : i32 to vector<8x8xi32>
    %685 = arith.cmpi eq, %23, %684 : vector<8x8xi32>
    %686 = vector.shape_cast %683 : vector<1x8xf32> to vector<1x8xf32>
    %687 = vector.broadcast %686 : vector<1x8xf32> to vector<8x8xf32>
    %688 = arith.select %685, %687, %632 : vector<8x8xi1>, vector<8x8xf32>
    %cst_152 = arith.constant dense<0.000000e+00> : vector<1x8xf32>
    %689 = tpu.matmul %681, %7, %cst_152 {dimension_numbers = #tpu.dot_dimension_numbers<[1], [0], [0], [1], [0, 0, 1, 1], [], []>} : vector<1x32xf32>, vector<32x8xf32>, vector<1x8xf32> -> vector<1x8xf32>
    %690 = arith.addf %689, %9 : vector<1x8xf32>
    %cst_153 = arith.constant dense<0xFF800000> : vector<1xf32>
    %691 = vector.multi_reduction <maximumf>, %690, %cst_153 [1] : vector<1x8xf32> to vector<1xf32>
    %692 = vector.shape_cast %691 : vector<1xf32> to vector<1x1xf32>
    %693 = vector.broadcast %692 : vector<1x1xf32> to vector<1x8xf32>
    %694 = arith.subf %690, %693 : vector<1x8xf32>
    %695 = math.exp %694 : vector<1x8xf32>
    %cst_154 = arith.constant dense<0.000000e+00> : vector<1xf32>
    %696 = vector.multi_reduction <add>, %695, %cst_154 [1] : vector<1x8xf32> to vector<1xf32>
    %697 = vector.shape_cast %696 : vector<1xf32> to vector<1x1xf32>
    %698 = tpu.reciprocal %697 {approx = true} : vector<1x1xf32> -> vector<1x1xf32>
    %699 = vector.broadcast %698 : vector<1x1xf32> to vector<1x8xf32>
    %700 = arith.mulf %695, %699 : vector<1x8xf32>
    %cst_155 = arith.constant dense<0.000000e+00> : vector<1x32xf32>
    %701 = tpu.matmul %700, %297, %cst_155 {dimension_numbers = #tpu.dot_dimension_numbers<[1], [0], [0], [1], [0, 0, 1, 1], [], []>} : vector<1x8xf32>, vector<8x32xf32>, vector<1x32xf32> -> vector<1x32xf32>
    %cst_156 = arith.constant dense<0.000000e+00> : vector<1x32xf32>
    %702 = tpu.matmul %681, %11, %cst_156 {dimension_numbers = #tpu.dot_dimension_numbers<[1], [0], [0], [1], [0, 0, 1, 1], [], []>} : vector<1x32xf32>, vector<32x32xf32>, vector<1x32xf32> -> vector<1x32xf32>
    %cst_157 = arith.constant dense<0.000000e+00> : vector<1x32xf32>
    %703 = tpu.matmul %701, %10, %cst_157 {dimension_numbers = #tpu.dot_dimension_numbers<[1], [0], [0], [1], [0, 0, 1, 1], [], []>} : vector<1x32xf32>, vector<32x32xf32>, vector<1x32xf32> -> vector<1x32xf32>
    %704 = arith.addf %702, %703 : vector<1x32xf32>
    %705 = arith.addf %704, %13 : vector<1x32xf32>
    %cst_158 = arith.constant 0.000000e+00 : f32
    %706 = vector.broadcast %cst_158 : f32 to vector<1x32xf32>
    %707 = arith.maximumf %705, %706 : vector<1x32xf32>
    %cst_159 = arith.constant dense<0.000000e+00> : vector<1x96xf32>
    %708 = tpu.matmul %707, %2, %cst_159 {dimension_numbers = #tpu.dot_dimension_numbers<[1], [0], [0], [1], [0, 0, 1, 1], [], []>} : vector<1x32xf32>, vector<32x96xf32>, vector<1x96xf32> -> vector<1x96xf32>
    %709 = arith.addf %708, %4 : vector<1x96xf32>
    %cst_160 = arith.constant dense<0.000000e+00> : vector<1x96xf32>
    %710 = tpu.matmul %681, %3, %cst_160 {dimension_numbers = #tpu.dot_dimension_numbers<[1], [0], [0], [1], [0, 0, 1, 1], [], []>} : vector<1x32xf32>, vector<32x96xf32>, vector<1x96xf32> -> vector<1x96xf32>
    %711 = arith.addf %710, %5 : vector<1x96xf32>
    %712 = vector.extract_strided_slice %709 {offsets = [0, 0], sizes = [1, 32], strides = [1, 1]} : vector<1x96xf32> to vector<1x32xf32>
    %713 = vector.extract_strided_slice %711 {offsets = [0, 0], sizes = [1, 32], strides = [1, 1]} : vector<1x96xf32> to vector<1x32xf32>
    %714 = arith.addf %712, %713 : vector<1x32xf32>
    %715 = arith.negf %714 : vector<1x32xf32>
    %716 = math.exp %715 : vector<1x32xf32>
    %cst_161 = arith.constant 1.000000e+00 : f32
    %717 = vector.broadcast %cst_161 : f32 to vector<1x32xf32>
    %718 = arith.addf %717, %716 : vector<1x32xf32>
    %719 = arith.divf %717, %718 : vector<1x32xf32>
    %720 = vector.extract_strided_slice %709 {offsets = [0, 32], sizes = [1, 32], strides = [1, 1]} : vector<1x96xf32> to vector<1x32xf32>
    %721 = vector.extract_strided_slice %711 {offsets = [0, 32], sizes = [1, 32], strides = [1, 1]} : vector<1x96xf32> to vector<1x32xf32>
    %722 = arith.addf %720, %721 : vector<1x32xf32>
    %723 = arith.negf %722 : vector<1x32xf32>
    %724 = math.exp %723 : vector<1x32xf32>
    %cst_162 = arith.constant 1.000000e+00 : f32
    %725 = vector.broadcast %cst_162 : f32 to vector<1x32xf32>
    %726 = arith.addf %725, %724 : vector<1x32xf32>
    %727 = arith.divf %725, %726 : vector<1x32xf32>
    %728 = vector.extract_strided_slice %709 {offsets = [0, 64], sizes = [1, 32], strides = [1, 1]} : vector<1x96xf32> to vector<1x32xf32>
    %729 = vector.extract_strided_slice %711 {offsets = [0, 64], sizes = [1, 32], strides = [1, 1]} : vector<1x96xf32> to vector<1x32xf32>
    %730 = arith.mulf %719, %729 : vector<1x32xf32>
    %731 = arith.addf %728, %730 : vector<1x32xf32>
    %732 = math.tanh %731 : vector<1x32xf32>
    %cst_163 = arith.constant 1.000000e+00 : f32
    %733 = vector.broadcast %cst_163 : f32 to vector<1x32xf32>
    %734 = arith.subf %733, %727 : vector<1x32xf32>
    %735 = arith.mulf %734, %732 : vector<1x32xf32>
    %736 = arith.mulf %727, %681 : vector<1x32xf32>
    %737 = arith.addf %735, %736 : vector<1x32xf32>
    %cst_164 = arith.constant dense<0.000000e+00> : vector<1x8xf32>
    %738 = tpu.matmul %737, %14, %cst_164 {dimension_numbers = #tpu.dot_dimension_numbers<[1], [0], [0], [1], [0, 0, 1, 1], [], []>} : vector<1x32xf32>, vector<32x8xf32>, vector<1x8xf32> -> vector<1x8xf32>
    %739 = arith.addf %738, %15 : vector<1x8xf32>
    %c7_i32_165 = arith.constant 7 : i32
    %740 = vector.broadcast %c7_i32_165 : i32 to vector<8x8xi32>
    %741 = arith.cmpi eq, %23, %740 : vector<8x8xi32>
    %742 = vector.shape_cast %739 : vector<1x8xf32> to vector<1x8xf32>
    %743 = vector.broadcast %742 : vector<1x8xf32> to vector<8x8xf32>
    %744 = arith.select %741, %743, %688 : vector<8x8xi1>, vector<8x8xf32>
    %c0_166 = arith.constant 0 : index
    %c0_167 = arith.constant 0 : index
    %745 = vector.load %arg2[%c0_166, %c0_167] : memref<8x8xf32, #tpu.memory_space<vmem>>, vector<8x8xf32>
    tpu.vector_store %arg2[%c0_166, %c0_167], %744 {strides = array<i32>} : memref<8x8xf32, #tpu.memory_space<vmem>>, vector<8x8xf32>,
    return
  }
}

</mosaic_0001>

<bundles_post_ra>
// kernel: tpu_custom_call.1
= control target key start
LH: loop header
LB: loop body
LE: loop exit
PB: predicated region body
PF: predicated region fallthrough
CT: control target
= control target key end

     0   :  { %v6880_v3 = vmov 0.0|0.0   ;;  %v6881_v6 = vmov 0.0   ;;  %vm59_vm0 = vcmask 64512   ;;  %vm6882_vm1 = vmmov 0   ;;  %s7791_s0 = inlined_call_operand.vmem [shape: f32[8,8], index: 0, kind: input, shape index: {}]   ;;  %s7792_s1 = inlined_call_operand.vmem [shape: f32[336,96], index: 1, kind: input, shape index: {}]   ;;  %s7793_s2 = inlined_call_operand.hbm [shape: f32[8,8], index: 2, kind: output, shape index: {}]  }
   0x1   :  { %v12_v0 = vld [vmem:[%s7792_s1 + $0x8] sm:$0xff]  ;;  %v13_v1 = vld [vmem:[%s7792_s1 + $0x10] sm:$0xff]  ;;  %v14_v2 = vld [vmem:[%s7792_s1 + $0x18] sm:$0xff]  ;;  %6387 = vmatprep.subr.bf16.mxu1 %v6880_v3  ;;  %5737 = vmatprep.subr.mxu0 %v6881_v6 }
   0x2   :  { %v6911_v4 = vpack.c.bf16 %v13_v1, %v12_v0  ;;  %v15_v5 = vld [vmem:[%s7792_s1 + $0x20] sm:$0xff]  ;;  %5739 = vmatprep.mubr.msk.f32.mxu0 %vm6882_vm1, %v6881_v6 }
   0x3   :  { %v53_v7 = vld [vmem:[%s7792_s1] sm:$0xff] }
   0x4   :  { %v52_v8 = vld [vmem:[%s7791_s0] sm:$0xff]  ;;  %5738 = vmatpush3.msra.mxu0 %v53_v7 }
   0x5   :  { %7 = vsyncpa [#allocation3], 0  ;;  %6389 = vmatpush3.bf16.msra.mxu1 %v6911_v4  ;;  %v6926_v9 = vpack.c.bf16 %v15_v5, %v14_v2  ;;  %5750 = vmatprep.mubr.msk.f32.mxu1 %vm6882_vm1, %v6881_v6  ;;  %v6951_v12 = vld [vmem:[%s7792_s1 + $0x70] sm:$0x1]  ;;  %s6883_s22 = smov 64   ;;  %s6884_s25 = smov 96   ;;  %v133_v48 = vlaneseq }
   0x6   :  { %6390 = vmatprep.subr.bf16.mxu1 %v6880_v3  ;;  %5740 = vmatmul.mubr.msk.f32.vlgmr.msra.gmra.mrb[0].mxu0 %vm59_vm0, %v52_v8  ;;  %v5364_v16 = vld [vmem:[%s7792_s1 + $0x68] ss:$0 sm:$0xff]  ;;  %vm135_vm2 = vcmask 261120   ;;  %vm1100_vm11 = vcmask 57344   ;;  %s6885_s23 = smov [#allocation2]  }
   0x7   :  { %6393 = vmatprep.subr.bf16.mxu0 %v6880_v3  ;;  %5761 = vmatprep.mubr.msk.f32.mxu0 %vm6882_vm1, %v6881_v6  ;;  %v6978_v49 = vshrl.u32 %v133_v48, 7  ;;  %s5356_s24 = sshll.u32 %s6885_s23, 4  ;;  %s5357_s24 = int_to_ptr.vmem [resolvable:$true] %s5356_s24 }
   0x8   :  { %6395 = vmatpush3.bf16.msra.mxu0 %v6911_v4  ;;  %p6861_p1 = scmp.lt.s32.totalorder %s5357_s24, %s5357_s24 }
   0x9   :  { %6392 = vmatpush3.bf16.msra.mxu1 %v6926_v9  ;;  %6396 = vmatprep.subr.bf16.mxu0 %v6880_v3  ;;  %v6981_v50 = vsub.s32 0, %v6978_v49  ;;  %v349_v54 = vsub.s32 1, %v6978_v49  ;;  %vm235_vm3 = vcmp.eq.s32.totalorder %v6978_v49, 0  ;;  %vm346_vm4 = vcmp.eq.s32.totalorder %v6978_v49, 1 }
   0xa   :  { %6399 = vmatprep.subr.bf16.mxu1 %v6880_v3  ;;  %vm458_vm5 = vcmp.eq.s32.totalorder %v6978_v49, 2  ;;  %vm570_vm6 = vcmp.eq.s32.totalorder %v6978_v49, 3  ;;  %vm682_vm7 = vcmp.eq.s32.totalorder %v6978_v49, 4  ;;  %vm794_vm8 = vcmp.eq.s32.totalorder %v6978_v49, 5 }
   0xb   :  { %vm906_vm9 = vcmp.eq.s32.totalorder %v6978_v49, 6  ;;  %vm1018_vm10 = vcmp.eq.s32.totalorder %v6978_v49, 7 }
   0xc   :  { %5751 = vmatmul.mubr.f32.vlgmr.msra.gmra.mrb[0].mxu1 %v6881_v6  ;;  %6398 = vmatpush3.bf16.msra.mxu0 %v6926_v9 }
   0xd   :  { %6401 = vmatpush3.bf16.msra.mxu1 %v6911_v4  ;;  %5772 = vmatprep.mubr.msk.f32.mxu1 %vm6882_vm1, %v6881_v6 }
   0xe   :  { %6402 = vmatprep.subr.bf16.mxu1 %v6880_v3  ;;  %6405 = vmatprep.subr.bf16.mxu0 %v6880_v3 }
  0x11   :  { %6404 = vmatpush3.bf16.msra.mxu1 %v6926_v9 }
  0x12   :  { %6411 = vmatprep.subr.bf16.mxu1 %v6880_v3 }
  0xd9   :  { %v129_v10 = vpop.f32.mrb[0].mxu0 }
  0xda   :  { %v5741_v11 = vpop.f32.mrb[1].mxu0  ;;  %v6958_v17 = vadd.f32 %v5364_v16, %v129_v10 }
  0xdf   :  { %v205_v13 = vpop.f32.mrb[0].mxu1 }
  0xe0   :  { %v206_v14 = vadd.f32 %v205_v13, %v6951_v12  ;;  %v5752_v15 = vpop.f32.mrb[1].mxu1 }
  0xe2   :  { %217 = vrot.lane.b32.xlu0 %v206_v14, %s6883_s22  ;;  %v209_v18 = vadd.f32 %v206_v14, %v6958_v17 }
  0xe4   :  { %v5366_v19 = vmul.f32 -1.442695, %v209_v18 }
  0xe6   :  { %6723 = vpow2.f32 %v5366_v19 }
  0xf0   :  { %v6724_v20 = vpop.eup %6723 }
  0xf1   :  { %v213_v21 = vadd.f32 1.0, %v6724_v20 }
  0xf3   :  { %6725 = vrcp.f32 %v213_v21 }
  0xfd   :  { %v6726_v22 = vpop.eup %6725 }
  0xfe   :  { %v227_v28 = vsub.f32 1.0, %v6726_v22  ;;  %v233_v30 = vmul.f32 0.0, %v6726_v22 }
 0x154   :  { %v218_v23 = vpop.permute.xlu0 %217 }
 0x155   :  { %v220_v24 = vmul.f32 %v6726_v22, %v218_v23 }
 0x157   :  { %222 = vrot.lane.b32.xlu0 %v220_v24, %s6883_s22  ;;  %v461_v24 = vsub.s32 2, %v6978_v49 }
 0x1c9   :  { %v223_v25 = vpop.permute.xlu0 %222 }
 0x1ca   :  { %v225_v26 = vadd.f32 %v223_v25, %v6958_v17 }
 0x1cc   :  { %6727 = vtanh.f32 %v225_v26 }
 0x1d6   :  { %v6728_v27 = vpop.eup %6727 }
 0x1d7   :  { %229 = vrot.lane.b32.xlu1 %v6728_v27, %s6884_s25 }
 0x249   :  { %v230_v29 = vpop.permute.xlu1 %229 }
 0x24a   :  { %v232_v31 = vmul.f32 %v230_v29, %v227_v28 }
 0x24c   :  { %v234_v32 = vadd.f32 %v233_v30, %v232_v31 }
 0x24e   :  { %242 = vrot.lane.b32.xlu1 %v234_v32, %s6884_s25  ;;  %v342_v52 = vrot.slane %v234_v32, 7  ;;  %v239_v57 = vrot.slane %v234_v32, %v6981_v50 }
 0x250   :  { %v240_v61 = vsel %vm235_vm3, %v239_v57, 0.0 }
 0x2c0   :  { %v243_v33 = vpop.permute.xlu1 %242 }
 0x2c1   :  { %5762 = vmatmul.mubr.msk.f32.vlgmr.msra.gmra.mrb[2].mxu0 %vm135_vm2, %v243_v33 }
 0x2c2   :  { %6407 = vmatpush3.bf16.msra.mxu0 %v6911_v4  ;;  %5783 = vmatprep.mubr.msk.f32.mxu0 %vm6882_vm1, %v6881_v6 }
 0x2c3   :  { %6408 = vmatprep.subr.bf16.mxu0 %v6880_v3 }
 0x2c6   :  { %6410 = vmatpush3.bf16.msra.mxu0 %v6926_v9 }
 0x2c7   :  { %6417 = vmatprep.subr.bf16.mxu0 %v6880_v3 }
 0x394   :  { %v312_v34 = vpop.f32.mrb[2].mxu0 }
 0x395   :  { %v313_v35 = vadd.f32 %v312_v34, %v6951_v12  ;;  %v5763_v36 = vpop.f32.mrb[3].mxu0 }
 0x397   :  { %v317_v37 = vrot.slane %v313_v35, 7 }
 0x399   :  { %326 = vrot.lane.b32.xlu0 %v317_v37, %s6883_s22  ;;  %v319_v38 = vadd.f32 %v317_v37, %v6958_v17 }
 0x39b   :  { %v5368_v39 = vmul.f32 -1.442695, %v319_v38 }
 0x39d   :  { %6729 = vpow2.f32 %v5368_v39 }
 0x3a7   :  { %v6730_v40 = vpop.eup %6729 }
 0x3a8   :  { %v323_v41 = vadd.f32 1.0, %v6730_v40 }
 0x3aa   :  { %6731 = vrcp.f32 %v323_v41 }
 0x3b4   :  { %v6732_v42 = vpop.eup %6731 }
 0x3b5   :  { %v336_v51 = vsub.f32 1.0, %v6732_v42  ;;  %v344_v56 = vmul.f32 %v6732_v42, %v342_v52 }
 0x40b   :  { %v327_v43 = vpop.permute.xlu0 %326 }
 0x40c   :  { %v329_v44 = vmul.f32 %v6732_v42, %v327_v43 }
 0x40e   :  { %331 = vrot.lane.b32.xlu1 %v329_v44, %s6883_s22 }
 0x480   :  { %v332_v45 = vpop.permute.xlu1 %331 }
 0x481   :  { %v334_v46 = vadd.f32 %v332_v45, %v6958_v17 }
 0x483   :  { %6733 = vtanh.f32 %v334_v46 }
 0x48d   :  { %v6734_v47 = vpop.eup %6733 }
 0x48e   :  { %338 = vrot.lane.b32.xlu0 %v6734_v47, %s6884_s25 }
 0x500   :  { %v339_v53 = vpop.permute.xlu0 %338 }
 0x501   :  { %v341_v55 = vmul.f32 %v339_v53, %v336_v51  ;;  %v573_v51 = vsub.s32 3, %v6978_v49 }
 0x503   :  { %v345_v58 = vadd.f32 %v344_v56, %v341_v55 }
 0x505   :  { %v350_v59 = vrot.slane %v345_v58, %v349_v54  ;;  %v353_v60 = vrot.slane %v345_v58, 1  ;;  %v454_v21 = vrot.slane %v345_v58, 7 }
 0x507   :  { %v351_v62 = vsel %vm346_vm4, %v350_v59, %v240_v61  ;;  %354 = vrot.lane.b32.xlu1 %v353_v60, %s6884_s25 }
 0x579   :  { %v355_v63 = vpop.permute.xlu1 %354 }
 0x57a   :  { %5773 = vmatmul.mubr.msk.f32.vlgmr.msra.gmra.mrb[2].mxu1 %vm135_vm2, %v355_v63 }
 0x57b   :  { %6413 = vmatpush3.bf16.msra.mxu1 %v6911_v4  ;;  %5794 = vmatprep.mubr.msk.f32.mxu1 %vm6882_vm1, %v6881_v6 }
 0x57c   :  { %6414 = vmatprep.subr.bf16.mxu1 %v6880_v3 }
 0x57f   :  { %6416 = vmatpush3.bf16.msra.mxu1 %v6926_v9 }
 0x580   :  { %6423 = vmatprep.subr.bf16.mxu1 %v6880_v3 }
 0x64d   :  { %v424_v0 = vpop.f32.mrb[2].mxu1 }
 0x64e   :  { %v425_v1 = vadd.f32 %v424_v0, %v6951_v12  ;;  %v5774_v2 = vpop.f32.mrb[3].mxu1 }
 0x650   :  { %v429_v5 = vrot.slane %v425_v1, 6 }
 0x652   :  { %438 = vrot.lane.b32.xlu0 %v429_v5, %s6883_s22  ;;  %v431_v7 = vadd.f32 %v429_v5, %v6958_v17 }
 0x654   :  { %v5370_v8 = vmul.f32 -1.442695, %v431_v7 }
 0x656   :  { %6735 = vpow2.f32 %v5370_v8 }
 0x660   :  { %v6736_v10 = vpop.eup %6735 }
 0x661   :  { %v435_v11 = vadd.f32 1.0, %v6736_v10 }
 0x663   :  { %6737 = vrcp.f32 %v435_v11 }
 0x66d   :  { %v6738_v13 = vpop.eup %6737 }
 0x66e   :  { %v448_v20 = vsub.f32 1.0, %v6738_v13  ;;  %v456_v23 = vmul.f32 %v6738_v13, %v454_v21 }
 0x6c4   :  { %v439_v14 = vpop.permute.xlu0 %438 }
 0x6c5   :  { %v441_v15 = vmul.f32 %v6738_v13, %v439_v14 }
 0x6c7   :  { %443 = vrot.lane.b32.xlu1 %v441_v15, %s6883_s22 }
 0x739   :  { %v444_v16 = vpop.permute.xlu1 %443 }
 0x73a   :  { %v446_v18 = vadd.f32 %v444_v16, %v6958_v17 }
 0x73c   :  { %6739 = vtanh.f32 %v446_v18  ;;  %v685_v18 = vsub.s32 4, %v6978_v49 }
 0x746   :  { %v6740_v19 = vpop.eup %6739 }
 0x747   :  { %450 = vrot.lane.b32.xlu0 %v6740_v19, %s6884_s25 }
 0x7b9   :  { %v451_v22 = vpop.permute.xlu0 %450 }
 0x7ba   :  { %v453_v25 = vmul.f32 %v451_v22, %v448_v20 }
 0x7bc   :  { %v457_v26 = vadd.f32 %v456_v23, %v453_v25 }
 0x7be   :  { %v462_v27 = vrot.slane %v457_v26, %v461_v24  ;;  %v465_v28 = vrot.slane %v457_v26, 2  ;;  %v566_v46 = vrot.slane %v457_v26, 7 }
 0x7c0   :  { %v463_v29 = vsel %vm458_vm5, %v462_v27, %v351_v62  ;;  %466 = vrot.lane.b32.xlu1 %v465_v28, %s6884_s25 }
 0x832   :  { %v467_v30 = vpop.permute.xlu1 %466 }
 0x833   :  { %5784 = vmatmul.mubr.msk.f32.vlgmr.msra.gmra.mrb[4].mxu0 %vm135_vm2, %v467_v30 }
 0x834   :  { %6419 = vmatpush3.bf16.msra.mxu0 %v6911_v4  ;;  %5805 = vmatprep.mubr.msk.f32.mxu0 %vm6882_vm1, %v6881_v6 }
 0x835   :  { %6420 = vmatprep.subr.bf16.mxu0 %v6880_v3 }
 0x838   :  { %6422 = vmatpush3.bf16.msra.mxu0 %v6926_v9 }
 0x839   :  { %6429 = vmatprep.subr.bf16.mxu0 %v6880_v3 }
 0x906   :  { %v536_v31 = vpop.f32.mrb[4].mxu0 }
 0x907   :  { %v537_v32 = vadd.f32 %v536_v31, %v6951_v12  ;;  %v5785_v33 = vpop.f32.mrb[5].mxu0 }
 0x909   :  { %v541_v34 = vrot.slane %v537_v32, 5 }
 0x90b   :  { %550 = vrot.lane.b32.xlu0 %v541_v34, %s6883_s22  ;;  %v543_v35 = vadd.f32 %v541_v34, %v6958_v17 }
 0x90d   :  { %v5372_v36 = vmul.f32 -1.442695, %v543_v35 }
 0x90f   :  { %6741 = vpow2.f32 %v5372_v36 }
 0x919   :  { %v6742_v37 = vpop.eup %6741 }
 0x91a   :  { %v547_v38 = vadd.f32 1.0, %v6742_v37 }
 0x91c   :  { %6743 = vrcp.f32 %v547_v38 }
 0x926   :  { %v6744_v39 = vpop.eup %6743 }
 0x927   :  { %v560_v45 = vsub.f32 1.0, %v6744_v39  ;;  %v568_v48 = vmul.f32 %v6744_v39, %v566_v46 }
 0x97d   :  { %v551_v40 = vpop.permute.xlu0 %550 }
 0x97e   :  { %v553_v41 = vmul.f32 %v6744_v39, %v551_v40 }
 0x980   :  { %555 = vrot.lane.b32.xlu1 %v553_v41, %s6883_s22  ;;  %v797_v41 = vsub.s32 5, %v6978_v49 }
 0x9f2   :  { %v556_v42 = vpop.permute.xlu1 %555 }
 0x9f3   :  { %v558_v43 = vadd.f32 %v556_v42, %v6958_v17 }
 0x9f5   :  { %6745 = vtanh.f32 %v558_v43 }
 0x9ff   :  { %v6746_v44 = vpop.eup %6745 }
 0xa00   :  { %562 = vrot.lane.b32.xlu0 %v6746_v44, %s6884_s25 }
 0xa72   :  { %v563_v47 = vpop.permute.xlu0 %562 }
 0xa73   :  { %v565_v52 = vmul.f32 %v563_v47, %v560_v45 }
 0xa75   :  { %v569_v53 = vadd.f32 %v568_v48, %v565_v52 }
 0xa77   :  { %v574_v54 = vrot.slane %v569_v53, %v573_v51  ;;  %v577_v55 = vrot.slane %v569_v53, 3  ;;  %v678_v14 = vrot.slane %v569_v53, 7 }
 0xa79   :  { %578 = vrot.lane.b32.xlu1 %v577_v55, %s6884_s25  ;;  %v575_v56 = vsel %vm570_vm6, %v574_v54, %v463_v29 }
 0xaeb   :  { %v579_v57 = vpop.permute.xlu1 %578 }
 0xaec   :  { %5795 = vmatmul.mubr.msk.f32.vlgmr.msra.gmra.mrb[4].mxu1 %vm135_vm2, %v579_v57 }
 0xaed   :  { %6425 = vmatpush3.bf16.msra.mxu1 %v6911_v4  ;;  %5816 = vmatprep.mubr.msk.f32.mxu1 %vm6882_vm1, %v6881_v6 }
 0xaee   :  { %6426 = vmatprep.subr.bf16.mxu1 %v6880_v3 }
 0xaf1   :  { %6428 = vmatpush3.bf16.msra.mxu1 %v6926_v9 }
 0xaf2   :  { %6435 = vmatprep.subr.bf16.mxu1 %v6880_v3 }
 0xbbf   :  { %v648_v58 = vpop.f32.mrb[4].mxu1 }
 0xbc0   :  { %v649_v59 = vadd.f32 %v648_v58, %v6951_v12  ;;  %v5796_v60 = vpop.f32.mrb[5].mxu1 }
 0xbc2   :  { %v653_v61 = vrot.slane %v649_v59, 4 }
 0xbc4   :  { %662 = vrot.lane.b32.xlu0 %v653_v61, %s6883_s22  ;;  %v655_v62 = vadd.f32 %v653_v61, %v6958_v17 }
 0xbc6   :  { %v5374_v63 = vmul.f32 -1.442695, %v655_v62 }
 0xbc8   :  { %6747 = vpow2.f32 %v5374_v63 }
 0xbd2   :  { %v6748_v0 = vpop.eup %6747 }
 0xbd3   :  { %v659_v1 = vadd.f32 1.0, %v6748_v0 }
 0xbd5   :  { %6749 = vrcp.f32 %v659_v1 }
 0xbdf   :  { %v6750_v2 = vpop.eup %6749 }
 0xbe0   :  { %v672_v13 = vsub.f32 1.0, %v6750_v2  ;;  %v680_v16 = vmul.f32 %v6750_v2, %v678_v14 }
 0xc36   :  { %v663_v5 = vpop.permute.xlu0 %662 }
 0xc37   :  { %v665_v7 = vmul.f32 %v6750_v2, %v663_v5 }
 0xc39   :  { %667 = vrot.lane.b32.xlu1 %v665_v7, %s6883_s22  ;;  %v909_v7 = vsub.s32 6, %v6978_v49 }
 0xcab   :  { %v668_v8 = vpop.permute.xlu1 %667 }
 0xcac   :  { %v670_v10 = vadd.f32 %v668_v8, %v6958_v17 }
 0xcae   :  { %6751 = vtanh.f32 %v670_v10 }
 0xcb8   :  { %v6752_v11 = vpop.eup %6751 }
 0xcb9   :  { %674 = vrot.lane.b32.xlu0 %v6752_v11, %s6884_s25 }
 0xd2b   :  { %v675_v15 = vpop.permute.xlu0 %674 }
 0xd2c   :  { %v677_v19 = vmul.f32 %v675_v15, %v672_v13 }
 0xd2e   :  { %v681_v20 = vadd.f32 %v680_v16, %v677_v19 }
 0xd30   :  { %v686_v21 = vrot.slane %v681_v20, %v685_v18  ;;  %v689_v22 = vrot.slane %v681_v20, 4  ;;  %v790_v38 = vrot.slane %v681_v20, 7 }
 0xd32   :  { %690 = vrot.lane.b32.xlu1 %v689_v22, %s6884_s25  ;;  %v687_v23 = vsel %vm682_vm7, %v686_v21, %v575_v56 }
 0xda4   :  { %v691_v24 = vpop.permute.xlu1 %690 }
 0xda5   :  { %5806 = vmatmul.mubr.msk.f32.vlgmr.msra.gmra.mrb[6].mxu0 %vm135_vm2, %v691_v24 }
 0xda6   :  { %6431 = vmatpush3.bf16.msra.mxu0 %v6911_v4  ;;  %5827 = vmatprep.mubr.msk.f32.mxu0 %vm6882_vm1, %v6881_v6 }
 0xda7   :  { %6432 = vmatprep.subr.bf16.mxu0 %v6880_v3 }
 0xdaa   :  { %6434 = vmatpush3.bf16.msra.mxu0 %v6926_v9 }
 0xdab   :  { %5841 = vmatprep.subr.mxu0 %v6881_v6 }
 0xe78   :  { %v760_v25 = vpop.f32.mrb[6].mxu0 }
 0xe79   :  { %v761_v26 = vadd.f32 %v760_v25, %v6951_v12  ;;  %v5807_v27 = vpop.f32.mrb[7].mxu0 }
 0xe7b   :  { %v765_v28 = vrot.slane %v761_v26, 3 }
 0xe7d   :  { %774 = vrot.lane.b32.xlu0 %v765_v28, %s6883_s22  ;;  %v767_v29 = vadd.f32 %v765_v28, %v6958_v17 }
 0xe7f   :  { %v5376_v30 = vmul.f32 -1.442695, %v767_v29 }
 0xe81   :  { %6753 = vpow2.f32 %v5376_v30  ;;  %v28_v30 = vld [vmem:[%s7792_s1 + $0x90] sm:$0xff] }
 0xe8b   :  { %v6754_v4 = vpop.eup %6753 }
 0xe8c   :  { %v771_v31 = vadd.f32 1.0, %v6754_v4  ;;  %v29_v4 = vld [vmem:[%s7792_s1 + $0x98] sm:$0xff] }
 0xe8e   :  { %6755 = vrcp.f32 %v771_v31 }
 0xe98   :  { %v6756_v32 = vpop.eup %6755 }
 0xe99   :  { %v784_v37 = vsub.f32 1.0, %v6756_v32  ;;  %v792_v40 = vmul.f32 %v6756_v32, %v790_v38 }
 0xeef   :  { %v775_v33 = vpop.permute.xlu0 %774 }
 0xef0   :  { %v777_v34 = vmul.f32 %v6756_v32, %v775_v33  ;;  %v30_v32 = vld [vmem:[%s7792_s1 + $0xa0] sm:$0xff] }
 0xef2   :  { %779 = vrot.lane.b32.xlu1 %v777_v34, %s6883_s22 }
 0xf64   :  { %v780_v9 = vpop.permute.xlu1 %779 }
 0xf65   :  { %v782_v35 = vadd.f32 %v780_v9, %v6958_v17 }
 0xf67   :  { %6757 = vtanh.f32 %v782_v35 }
 0xf71   :  { %v6758_v36 = vpop.eup %6757 }
 0xf72   :  { %786 = vrot.lane.b32.xlu0 %v6758_v36, %s6884_s25 }
 0xfe4   :  { %v787_v39 = vpop.permute.xlu0 %786 }
 0xfe5   :  { %v789_v42 = vmul.f32 %v787_v39, %v784_v37  ;;  %v1021_v37 = vsub.s32 7, %v6978_v49 }
 0xfe7   :  { %v793_v43 = vadd.f32 %v792_v40, %v789_v42 }
 0xfe9   :  { %v798_v44 = vrot.slane %v793_v43, %v797_v41  ;;  %v801_v45 = vrot.slane %v793_v43, 5  ;;  %v902_v1 = vrot.slane %v793_v43, 7 }
 0xfeb   :  { %802 = vrot.lane.b32.xlu1 %v801_v45, %s6884_s25  ;;  %v799_v46 = vsel %vm794_vm8, %v798_v44, %v687_v23  ;;  %v35_v44 = vld [vmem:[%s7792_s1 + $0x128] sm:$0x1] }
0x105d   :  { %v803_v47 = vpop.permute.xlu1 %802 }
0x105e   :  { %5817 = vmatmul.mubr.msk.f32.vlgmr.msra.gmra.mrb[6].mxu1 %vm135_vm2, %v803_v47 }
0x105f   :  { %5838 = vmatprep.mubr.msk.f32.mxu1 %vm6882_vm1, %v6881_v6 }
0x1131   :  { %v872_v48 = vpop.f32.mrb[6].mxu1 }
0x1132   :  { %v873_v51 = vadd.f32 %v872_v48, %v6951_v12  ;;  %v5818_v52 = vpop.f32.mrb[7].mxu1 }
0x1134   :  { %v877_v53 = vrot.slane %v873_v51, 2 }
0x1136   :  { %886 = vrot.lane.b32.xlu0 %v877_v53, %s6883_s22  ;;  %v879_v54 = vadd.f32 %v877_v53, %v6958_v17 }
0x1138   :  { %v5378_v55 = vmul.f32 -1.442695, %v879_v54 }
0x113a   :  { %6759 = vpow2.f32 %v5378_v55 }
0x1144   :  { %v6760_v56 = vpop.eup %6759 }
0x1145   :  { %v883_v57 = vadd.f32 1.0, %v6760_v56 }
0x1147   :  { %6761 = vrcp.f32 %v883_v57 }
0x1151   :  { %v6762_v58 = vpop.eup %6761 }
0x1152   :  { %v896_v0 = vsub.f32 1.0, %v6762_v58  ;;  %v904_v5 = vmul.f32 %v6762_v58, %v902_v1 }
0x11a8   :  { %v887_v59 = vpop.permute.xlu0 %886 }
0x11a9   :  { %v889_v60 = vmul.f32 %v6762_v58, %v887_v59  ;;  %v37_v58 = vld [vmem:[%s7792_s1 + $0xc8] sm:$0xff]  ;;  %v38_v59 = vld [vmem:[%s7792_s1 + $0xd0] sm:$0xff] }
0x11ab   :  { %891 = vrot.lane.b32.xlu1 %v889_v60, %s6883_s22 }
0x121d   :  { %v892_v61 = vpop.permute.xlu1 %891 }
0x121e   :  { %v894_v62 = vadd.f32 %v892_v61, %v6958_v17  ;;  %v7131_v61 = vpack.c.bf16 %v38_v59, %v37_v58 }
0x1220   :  { %6763 = vtanh.f32 %v894_v62 }
0x122a   :  { %v6764_v63 = vpop.eup %6763 }
0x122b   :  { %898 = vrot.lane.b32.xlu0 %v6764_v63, %s6884_s25  ;;  %v39_v63 = vld [vmem:[%s7792_s1 + $0xd8] sm:$0xff] }
0x129d   :  { %v899_v2 = vpop.permute.xlu0 %898 }
0x129e   :  { %v901_v8 = vmul.f32 %v899_v2, %v896_v0  ;;  %v40_v0 = vld [vmem:[%s7792_s1 + $0xe0] sm:$0xff]  ;;  %v17_v2 = vld [vmem:[%s7792_s1 + $0x28] sm:$0xff] }
0x129f   :  { %v7141_v1 = vpack.c.bf16 %v40_v0, %v39_v63 }
0x12a0   :  { %v905_v10 = vadd.f32 %v904_v5, %v901_v8  ;;  %v18_v5 = vld [vmem:[%s7792_s1 + $0x30] sm:$0xff]  ;;  %v21_v8 = vld [vmem:[%s7792_s1 + $0x48] sm:$0xff] }
0x12a2   :  { %v910_v11 = vrot.slane %v905_v10, %v909_v7  ;;  %v913_v13 = vrot.slane %v905_v10, 6  ;;  %v1014_v9 = vrot.slane %v905_v10, 7  ;;  %v7154_v7 = vpack.c.bf16 %v18_v5, %v17_v2  ;;  %v22_v10 = vld [vmem:[%s7792_s1 + $0x50] sm:$0xff] }
0x12a4   :  { %914 = vrot.lane.b32.xlu1 %v913_v13, %s6884_s25  ;;  %v911_v14 = vsel %vm906_vm9, %v910_v11, %v799_v46  ;;  %v7164_v11 = vpack.c.bf16 %v22_v10, %v21_v8  ;;  %v23_v13 = vld [vmem:[%s7792_s1 + $0x58] sm:$0xff] }
0x1316   :  { %v915_v15 = vpop.permute.xlu1 %914 }
0x1317   :  { %5828 = vmatmul.mubr.msk.f32.vlgmr.msra.gmra.mrb[8].mxu0 %vm135_vm2, %v915_v15 }
0x1318   :  { %5843 = vmatprep.mubr.msk.f32.mxu0 %vm6882_vm1, %v6881_v6 }
0x13ea   :  { %v984_v16 = vpop.f32.mrb[8].mxu0 }
0x13eb   :  { %v985_v18 = vadd.f32 %v984_v16, %v6951_v12  ;;  %v5829_v19 = vpop.f32.mrb[9].mxu0  ;;  %v27_v12 = vld [vmem:[%s7792_s1 + $0x88] sm:$0xff] }
0x13ec   :  { %v6436_v31 = vpack.c.bf16 %v28_v30, %v27_v12  ;;  %v19_v19 = vld [vmem:[%s7792_s1 + $0x38] sm:$0xff] }
0x13ed   :  { %v989_v20 = vrot.slane %v985_v18, 1  ;;  %v7210_v30 = vld [vmem:[%s7792_s1 + $0x78] sm:$0x1] }
0x13ee   :  { %6437 = vmatpush3.bf16.msra.mxu1 %v6436_v31 }
0x13ef   :  { %998 = vrot.lane.b32.xlu0 %v989_v20, %s6883_s22  ;;  %v991_v21 = vadd.f32 %v989_v20, %v6958_v17  ;;  %6438 = vmatprep.subr.bf16.mxu1 %v6880_v3  ;;  %v20_v20 = vld [vmem:[%s7792_s1 + $0x40] sm:$0xff] }
0x13f1   :  { %v5380_v22 = vmul.f32 -1.442695, %v991_v21  ;;  %v7190_v21 = vpack.c.bf16 %v20_v20, %v19_v19 }
0x13f3   :  { %6765 = vpow2.f32 %v5380_v22  ;;  %v45_v22 = vld [vmem:[%s7792_s1 + $0x138] sm:$0x1] }
0x13fd   :  { %v6766_v23 = vpop.eup %6765 }
0x13fe   :  { %v995_v24 = vadd.f32 1.0, %v6766_v23 }
0x1400   :  { %6767 = vrcp.f32 %v995_v24 }
0x140a   :  { %v6768_v25 = vpop.eup %6767 }
0x140b   :  { %v1008_v34 = vsub.f32 1.0, %v6768_v25  ;;  %v1016_v36 = vmul.f32 %v6768_v25, %v1014_v9 }
0x1461   :  { %v999_v26 = vpop.permute.xlu0 %998 }
0x1462   :  { %v1001_v27 = vmul.f32 %v6768_v25, %v999_v26 }
0x1464   :  { %1003 = vrot.lane.b32.xlu1 %v1001_v27, %s6883_s22  ;;  %v7201_v27 = vld [vmem:[%s7792_s1 + $0x80] sm:$0x1] }
0x14d6   :  { %v1004_v28 = vpop.permute.xlu1 %1003 }
0x14d7   :  { %v1006_v29 = vadd.f32 %v1004_v28, %v6958_v17  ;;  %v6439_v17 = vpack.c.bf16 %v30_v32, %v29_v4 }
0x14d9   :  { %6769 = vtanh.f32 %v1006_v29  ;;  %6440 = vmatpush3.bf16.msra.mxu1 %v6439_v17 }
0x14da   :  { %6447 = vmatprep.subr.bf16.mxu1 %v6880_v3 }
0x14e3   :  { %v6770_v33 = vpop.eup %6769 }
0x14e4   :  { %1010 = vrot.lane.b32.xlu0 %v6770_v33, %s6884_s25 }
0x1556   :  { %v1011_v35 = vpop.permute.xlu0 %1010 }
0x1557   :  { %v1013_v38 = vmul.f32 %v1011_v35, %v1008_v34 }
0x1559   :  { %v7102_v39 = vadd.f32 %v1016_v36, %v1013_v38 }
0x155b   :  { %v1022_v40 = vrot.slane %v7102_v39, %v1021_v37  ;;  %v1025_v41 = vrot.slane %v7102_v39, 7  ;;  %v7276_v39 = vld [vmem:[%s7792_s1 + $0x130] sm:$0x1] }
0x155d   :  { %1026 = vrot.lane.b32.xlu1 %v1025_v41, %s6884_s25  ;;  %v1023_v42 = vsel %vm1018_vm10, %v1022_v40, %v911_v14  ;;  %v24_v14 = vld [vmem:[%s7792_s1 + $0x60] sm:$0xff] }
0x155e   :  { %v7174_v18 = vpack.c.bf16 %v24_v14, %v23_v13 }
0x15cf   :  { %v1027_v43 = vpop.permute.xlu1 %1026 }
0x15d0   :  { %5839 = vmatmul.mubr.msk.f32.vlgmr.msra.gmra.mrb[8].mxu1 %vm135_vm2, %v1027_v43 }
0x15d1   :  { %5865 = vmatprep.mubr.msk.f32.mxu1 %vm6882_vm1, %v6881_v6  ;;  %6449 = vmatpush3.bf16.msra.mxu1 %v7154_v7 }
0x15d2   :  { %6450 = vmatprep.subr.bf16.mxu1 %v6880_v3 }
0x15d5   :  { %6452 = vmatpush3.bf16.msra.mxu1 %v7190_v21 }
0x15d6   :  { %6459 = vmatprep.subr.bf16.mxu1 %v6880_v3 }
0x16a3   :  { %v1096_v45 = vpop.f32.mrb[8].mxu1 }
0x16a4   :  { %v1097_v46 = vadd.f32 %v1096_v45, %v35_v44  ;;  %v5840_v47 = vpop.f32.mrb[9].mxu1  ;;  %v47_v44 = vld [vmem:[%s7792_s1 + $0x108] sm:$0xff] }
0x16a5   :  { %v33_v47 = vld [vmem:[%s7792_s1 + $0xb8] sm:$0xff] }
0x16a6   :  { %v1101_v48 = vsel %vm1100_vm11, %v1097_v46, -inf }
0x16a7   :  { %1102 = vmax.xlane.f32.xlu0 %v1101_v48  ;;  %v34_v48 = vld [vmem:[%s7792_s1 + $0xc0] sm:$0xff] }
0x16bd   :  { %1113 = vrot.lane.b32.xlu0 %v1023_v42, %s6884_s25  ;;  %v31_v42 = vld [vmem:[%s7792_s1 + $0xa8] sm:$0xff] }
0x1734   :  { %v1103_v51 = vpop.xlane.xlu0 %1102 }
0x1735   :  { %v1104_v52 = vsub.f32 %v1097_v46, %v1103_v51  ;;  %v48_v46 = vld [vmem:[%s7792_s1 + $0x110] sm:$0xff] }
0x1736   :  { %v7234_v51 = vpack.c.bf16 %v48_v46, %v47_v44 }
0x1737   :  { %v1105_v53 = vmul.f32 1.442695, %v1104_v52  ;;  %v49_v52 = vld [vmem:[%s7792_s1 + $0x118] sm:$0xff] }
0x1738   :  { %v7120_v54 = vpop.permute.xlu0 %1113 }
0x1739   :  { %6771 = vpow2.f32 %v1105_v53  ;;  %5842 = vmatpush3.msra.mxu0 %v7120_v54  ;;  %v50_v53 = vld [vmem:[%s7792_s1 + $0x120] sm:$0xff] }
0x173a   :  { %6441 = vmatprep.subr.bf16.mxu0 %v6880_v3 }
0x1743   :  { %v6772_v55 = vpop.eup %6771 }
0x1744   :  { %v1107_v56 = vsel %vm1100_vm11, %v6772_v55, 0.0 }
0x1745   :  { %1108 = vadd.xlane.f32.xlu1 %v1107_v56  ;;  %v7247_v56 = vpack.c.bf16 %v50_v53, %v49_v52 }
0x17d2   :  { %v1109_v57 = vpop.xlane.xlu1 %1108 }
0x17d3   :  { %6773 = vrcp.f32 %v1109_v57 }
0x17dd   :  { %v6774_v60 = vpop.eup %6773 }
0x17de   :  { %v1111_v62 = vmul.f32 %v6774_v60, %v6772_v55  ;;  %v7243_v55 = vpack.c.bf16 %v34_v48, %v33_v47 }
0x17e0   :  { %5844 = vmatmul.mubr.msk.f32.vlgmr.msra.gmra.mrb[10].mxu0 %vm59_vm0, %v1111_v62 }
0x17e1   :  { %6443 = vmatpush3.bf16.msra.mxu0 %v7131_v61  ;;  %5854 = vmatprep.mubr.msk.f32.mxu0 %vm6882_vm1, %v6881_v6 }
0x17e2   :  { %6444 = vmatprep.subr.bf16.mxu0 %v6880_v3 }
0x17e5   :  { %6446 = vmatpush3.bf16.msra.mxu0 %v7141_v1 }
0x17e6   :  { %6453 = vmatprep.subr.bf16.mxu0 %v6880_v3 }
0x18b3   :  { %v1185_v15 = vpop.f32.mrb[10].mxu0 }
0x18b4   :  { %v5845_v16 = vpop.f32.mrb[11].mxu0  ;;  %5855 = vmatmul.mubr.msk.f32.vlgmr.msra.gmra.mrb[12].mxu0 %vm135_vm2, %v1185_v15 }
0x18b5   :  { %6455 = vmatpush3.bf16.msra.mxu0 %v7164_v11  ;;  %5876 = vmatprep.mubr.msk.f32.mxu0 %vm6882_vm1, %v6881_v6 }
0x18b6   :  { %6456 = vmatprep.subr.bf16.mxu0 %v6880_v3 }
0x18b9   :  { %6458 = vmatpush3.bf16.msra.mxu0 %v7174_v18 }
0x18ba   :  { %6465 = vmatprep.subr.bf16.mxu0 %v6880_v3 }
0x18bc   :  { %5877 = vmatmul.mubr.msk.f32.vlgmr.msra.gmra.mrb[14].mxu0 %vm135_vm2, %v1027_v43  ;;  %v32_v43 = vld [vmem:[%s7792_s1 + $0xb0] sm:$0xff] }
0x18bd   :  { %5898 = vmatprep.mubr.msk.f32.mxu0 %vm6882_vm1, %v6881_v6  ;;  %v7223_v45 = vpack.c.bf16 %v32_v43, %v31_v42 }
0x18bf   :  { %6467 = vmatpush3.bf16.msra.mxu0 %v7223_v45 }
0x18c0   :  { %6468 = vmatprep.subr.bf16.mxu0 %v6880_v3 }
0x18c3   :  { %6470 = vmatpush3.bf16.msra.mxu0 %v7243_v55 }
0x18c4   :  { %5901 = vmatprep.subr.mxu0 %v6881_v6 }
0x1987   :  { %v1258_v23 = vpop.f32.mrb[12].mxu0 }
0x1988   :  { %v1259_v24 = vadd.f32 %v1258_v23, %v45_v22  ;;  %v5856_v25 = vpop.f32.mrb[13].mxu0  ;;  %v41_v23 = vld [vmem:[%s7792_s1 + $0xe8] sm:$0xff] }
0x198a   :  { %v1262_v26 = vmax.f32 %v1259_v24, 0.0  ;;  %v42_v24 = vld [vmem:[%s7792_s1 + $0xf0] sm:$0xff] }
0x198c   :  { %5866 = vmatmul.mubr.msk.f32.vlgmr.msra.gmra.mrb[10].mxu1 %vm135_vm2, %v1262_v26  ;;  %v7289_v26 = vpack.c.bf16 %v42_v24, %v41_v23 }
0x198d   :  { %5887 = vmatprep.mubr.msk.f32.mxu1 %vm6882_vm1, %v6881_v6  ;;  %6461 = vmatpush3.bf16.msra.mxu1 %v7234_v51 }
0x198e   :  { %6462 = vmatprep.subr.bf16.mxu1 %v6880_v3 }
0x198f   :  { %v1402_v28 = vpop.f32.mrb[14].mxu0 }
0x1990   :  { %v1403_v29 = vadd.f32 %v1402_v28, %v7201_v27  ;;  %v5878_v12 = vpop.f32.mrb[15].mxu0 }
0x1991   :  { %6464 = vmatpush3.bf16.msra.mxu1 %v7247_v56  ;;  %v44_v12 = vld [vmem:[%s7792_s1 + $0x100] sm:$0xff] }
0x1992   :  { %1414 = vrot.lane.b32.xlu1 %v1403_v29, %s6883_s22  ;;  %6471 = vmatprep.subr.bf16.mxu1 %v6880_v3 }
0x1a04   :  { %v1415_v36 = vpop.permute.xlu1 %1414 }
0x1a5f   :  { %v1332_v4 = vpop.f32.mrb[10].mxu1 }
0x1a60   :  { %v1333_v31 = vadd.f32 %v1332_v4, %v7210_v30  ;;  %v5867_v32 = vpop.f32.mrb[11].mxu1 }
0x1a62   :  { %v1406_v17 = vadd.f32 %v1403_v29, %v1333_v31  ;;  %v43_v29 = vld [vmem:[%s7792_s1 + $0xf8] sm:$0xff] }
0x1a63   :  { %v7299_v4 = vpack.c.bf16 %v44_v12, %v43_v29 }
0x1a64   :  { %v5386_v33 = vmul.f32 -1.442695, %v1406_v17 }
0x1a66   :  { %6775 = vpow2.f32 %v5386_v33 }
0x1a70   :  { %v6776_v34 = vpop.eup %6775 }
0x1a71   :  { %v1410_v9 = vadd.f32 1.0, %v6776_v34 }
0x1a73   :  { %6777 = vrcp.f32 %v1410_v9 }
0x1a7d   :  { %v6778_v35 = vpop.eup %6777 }
0x1a7e   :  { %v1417_v37 = vmul.f32 %v6778_v35, %v1415_v36  ;;  %v1424_v58 = vsub.f32 1.0, %v6778_v35  ;;  %v1431_v60 = vmul.f32 %v6778_v35, %v1025_v41  ;;  %v7332_v36 = vld [vmem:[%s7792_s1 + $0x140] sm:$0x1] }
0x1a80   :  { %1419 = vrot.lane.b32.xlu0 %v1417_v37, %s6883_s22 }
0x1af2   :  { %v1420_v38 = vpop.permute.xlu0 %1419 }
0x1af3   :  { %v1422_v40 = vadd.f32 %v1420_v38, %v1333_v31 }
0x1af5   :  { %6779 = vtanh.f32 %v1422_v40 }
0x1aff   :  { %v6780_v57 = vpop.eup %6779 }
0x1b00   :  { %1426 = vrot.lane.b32.xlu1 %v6780_v57, %s6884_s25 }
0x1b72   :  { %v1427_v59 = vpop.permute.xlu1 %1426 }
0x1b73   :  { %v1429_v62 = vmul.f32 %v1427_v59, %v1424_v58 }
0x1b75   :  { %v7257_v63 = vadd.f32 %v1431_v60, %v1429_v62 }
0x1b77   :  { %1434 = vrot.lane.b32.xlu0 %v7257_v63, %s6884_s25 }
0x1be9   :  { %v1435_v0 = vpop.permute.xlu0 %1434 }
0x1bea   :  { %5888 = vmatmul.mubr.msk.f32.vlgmr.msra.gmra.mrb[12].mxu1 %vm135_vm2, %v1435_v0  ;;  %5899 = vmatmul.mubr.msk.f32.vlgmr.msra.gmra.mrb[16].mxu0 %vm135_vm2, %v1435_v0 }
0x1beb   :  { %5902 = vmatpush3.msra.mxu0 %v7120_v54  ;;  %5903 = vmatprep.mubr.msk.f32.mxu0 %vm6882_vm1, %v6881_v6 }
0x1bec   :  { %6477 = vmatprep.subr.bf16.mxu0 %v6880_v3  ;;  %6473 = vmatpush3.bf16.msra.mxu1 %v7131_v61 }
0x1bed   :  { %6474 = vmatprep.subr.bf16.mxu1 %v6880_v3  ;;  %5914 = vmatprep.mubr.msk.f32.mxu1 %vm6882_vm1, %v6881_v6 }
0x1bf0   :  { %6476 = vmatpush3.bf16.msra.mxu1 %v7141_v1 }
0x1bf1   :  { %6483 = vmatprep.subr.bf16.mxu1 %v6880_v3 }
0x1cbd   :  { %v7278_v41 = vpop.f32.mrb[12].mxu1  ;;  %v1579_v2 = vpop.f32.mrb[16].mxu0 }
0x1cbe   :  { %v1580_v5 = vadd.f32 %v1579_v2, %v7276_v39  ;;  %v5889_v8 = vpop.f32.mrb[13].mxu1  ;;  %v5900_v10 = vpop.f32.mrb[17].mxu0 }
0x1cc0   :  { %v1583_v13 = vsel %vm1100_vm11, %v1580_v5, -inf }
0x1cc1   :  { %1584 = vmax.xlane.f32.xlu1 %v1583_v13 }
0x1d4e   :  { %v1585_v14 = vpop.xlane.xlu1 %1584 }
0x1d4f   :  { %v1586_v15 = vsub.f32 %v1580_v5, %v1585_v14 }
0x1d51   :  { %v1587_v16 = vmul.f32 1.442695, %v1586_v15 }
0x1d53   :  { %6781 = vpow2.f32 %v1587_v16 }
0x1d5d   :  { %v6782_v19 = vpop.eup %6781 }
0x1d5e   :  { %v1589_v20 = vsel %vm1100_vm11, %v6782_v19, 0.0 }
0x1d5f   :  { %1590 = vadd.xlane.f32.xlu0 %v1589_v20 }
0x1dec   :  { %v1591_v22 = vpop.xlane.xlu0 %1590 }
0x1ded   :  { %6783 = vrcp.f32 %v1591_v22 }
0x1df7   :  { %v6784_v25 = vpop.eup %6783 }
0x1df8   :  { %v1593_v28 = vmul.f32 %v6784_v25, %v6782_v19 }
0x1dfa   :  { %5904 = vmatmul.mubr.msk.f32.vlgmr.msra.gmra.mrb[18].mxu0 %vm59_vm0, %v1593_v28 }
0x1dfb   :  { %6479 = vmatpush3.bf16.msra.mxu0 %v7289_v26  ;;  %5925 = vmatprep.mubr.msk.f32.mxu0 %vm6882_vm1, %v6881_v6 }
0x1dfc   :  { %6480 = vmatprep.subr.bf16.mxu0 %v6880_v3 }
0x1dff   :  { %6482 = vmatpush3.bf16.msra.mxu0 %v7299_v4 }
0x1e00   :  { %6489 = vmatprep.subr.bf16.mxu0 %v6880_v3 }
0x1e02   :  { %5926 = vmatmul.mubr.msk.f32.vlgmr.msra.gmra.mrb[20].mxu0 %vm135_vm2, %v1435_v0 }
0x1e03   :  { %6491 = vmatpush3.bf16.msra.mxu0 %v7164_v11  ;;  %5947 = vmatprep.mubr.msk.f32.mxu0 %vm6882_vm1, %v6881_v6 }
0x1e04   :  { %6492 = vmatprep.subr.bf16.mxu0 %v6880_v3 }
0x1e07   :  { %6494 = vmatpush3.bf16.msra.mxu0 %v7174_v18 }
0x1e08   :  { %6501 = vmatprep.subr.bf16.mxu0 %v6880_v3 }
0x1e0a   :  { %5948 = vmatmul.mubr.msk.f32.vlgmr.msra.gmra.mrb[22].mxu0 %vm135_vm2, %v1435_v0 }
0x1e0b   :  { %6503 = vmatpush3.bf16.msra.mxu0 %v7223_v45  ;;  %5969 = vmatprep.mubr.msk.f32.mxu0 %vm6882_vm1, %v6881_v6 }
0x1e0c   :  { %6504 = vmatprep.subr.bf16.mxu0 %v6880_v3 }
0x1e0f   :  { %6506 = vmatpush3.bf16.msra.mxu0 %v7243_v55 }
0x1e10   :  { %6507 = vmatprep.subr.bf16.mxu0 %v6880_v3 }
0x1ecd   :  { %v1663_v31 = vpop.f32.mrb[18].mxu0 }
0x1ece   :  { %v5905_v32 = vpop.f32.mrb[19].mxu0  ;;  %5915 = vmatmul.mubr.msk.f32.vlgmr.msra.gmra.mrb[14].mxu1 %vm135_vm2, %v1663_v31 }
0x1ecf   :  { %6485 = vmatpush3.bf16.msra.mxu1 %v7154_v7  ;;  %5936 = vmatprep.mubr.msk.f32.mxu1 %vm6882_vm1, %v6881_v6 }
0x1ed0   :  { %6486 = vmatprep.subr.bf16.mxu1 %v6880_v3 }
0x1ed3   :  { %6488 = vmatpush3.bf16.msra.mxu1 %v7190_v21 }
0x1ed4   :  { %6495 = vmatprep.subr.bf16.mxu1 %v6880_v3 }
0x1ed5   :  { %v1806_v17 = vpop.f32.mrb[20].mxu0 }
0x1ed6   :  { %v5927_v33 = vpop.f32.mrb[21].mxu0 }
0x1edd   :  { %v1951_v34 = vpop.f32.mrb[22].mxu0 }
0x1ede   :  { %v1952_v9 = vadd.f32 %v1951_v34, %v7201_v27  ;;  %v5949_v35 = vpop.f32.mrb[23].mxu0 }
0x1ee0   :  { %1963 = vrot.lane.b32.xlu0 %v1952_v9, %s6883_s22 }
0x1f52   :  { %v1964_v59 = vpop.permute.xlu0 %1963 }
0x1fa1   :  { %v1736_v37 = vpop.f32.mrb[14].mxu1 }
0x1fa2   :  { %v1807_v38 = vadd.f32 %v1806_v17, %v1736_v37  ;;  %v5916_v40 = vpop.f32.mrb[15].mxu1 }
0x1fa4   :  { %v1810_v42 = vadd.f32 %v1807_v38, %v7332_v36 }
0x1fa6   :  { %v1811_v43 = vmax.f32 %v1810_v42, 0.0 }
0x1fa8   :  { %5937 = vmatmul.mubr.msk.f32.vlgmr.msra.gmra.mrb[16].mxu1 %vm135_vm2, %v1811_v43 }
0x1fa9   :  { %6497 = vmatpush3.bf16.msra.mxu1 %v7234_v51  ;;  %5958 = vmatprep.mubr.msk.f32.mxu1 %vm6882_vm1, %v6881_v6 }
0x1faa   :  { %6498 = vmatprep.subr.bf16.mxu1 %v6880_v3 }
0x1fad   :  { %6500 = vmatpush3.bf16.msra.mxu1 %v7247_v56 }
0x1fae   :  { %5972 = vmatprep.subr.mxu1 %v6881_v6 }
0x207b   :  { %v1881_v44 = vpop.f32.mrb[16].mxu1 }
0x207c   :  { %v1882_v46 = vadd.f32 %v1881_v44, %v7210_v30  ;;  %v5938_v47 = vpop.f32.mrb[17].mxu1 }
0x207e   :  { %v1955_v48 = vadd.f32 %v1952_v9, %v1882_v46 }
0x2080   :  { %v5394_v52 = vmul.f32 -1.442695, %v1955_v48 }
0x2082   :  { %6785 = vpow2.f32 %v5394_v52 }
0x208c   :  { %v6786_v53 = vpop.eup %6785 }
0x208d   :  { %v1959_v57 = vadd.f32 1.0, %v6786_v53 }
0x208f   :  { %6787 = vrcp.f32 %v1959_v57 }
0x2099   :  { %v6788_v58 = vpop.eup %6787 }
0x209a   :  { %v1966_v60 = vmul.f32 %v6788_v58, %v1964_v59  ;;  %v1973_v5 = vsub.f32 1.0, %v6788_v58  ;;  %v1979_v10 = vmul.f32 %v6788_v58, %v7257_v63  ;;  %v7365_v63 = vld [vmem:[%s7792_s1 + $0x148] sm:$0x1] }
0x209b   :  { %v1505_v16 = vadd.f32 %v7278_v41, %v7365_v63 }
0x209c   :  { %1968 = vrot.lane.b32.xlu1 %v1966_v60, %s6883_s22 }
0x209d   :  { %v1511_v19 = vrot.slane %v1505_v16, %v6981_v50 }
0x209f   :  { %v1512_v31 = vsel %vm235_vm3, %v1511_v19, 0.0 }
0x210e   :  { %v1969_v62 = vpop.permute.xlu1 %1968 }
0x210f   :  { %v1971_v0 = vadd.f32 %v1969_v62, %v1882_v46 }
0x2111   :  { %6789 = vtanh.f32 %v1971_v0 }
0x211b   :  { %v6790_v2 = vpop.eup %6789 }
0x211c   :  { %1975 = vrot.lane.b32.xlu1 %v6790_v2, %s6884_s25 }
0x218e   :  { %v1976_v8 = vpop.permute.xlu1 %1975 }
0x218f   :  { %v1978_v13 = vmul.f32 %v1976_v8, %v1973_v5 }
0x2191   :  { %v7346_v14 = vadd.f32 %v1979_v10, %v1978_v13 }
0x2193   :  { %1982 = vrot.lane.b32.xlu0 %v7346_v14, %s6884_s25 }
0x2205   :  { %v1983_v15 = vpop.permute.xlu0 %1982 }
0x2206   :  { %5959 = vmatmul.mubr.msk.f32.vlgmr.msra.gmra.mrb[18].mxu1 %vm135_vm2, %v1983_v15  ;;  %5970 = vmatmul.mubr.msk.f32.vlgmr.msra.gmra.mrb[24].mxu0 %vm135_vm2, %v1983_v15 }
0x2207   :  { %5973 = vmatpush3.msra.mxu1 %v7120_v54  ;;  %5974 = vmatprep.mubr.msk.f32.mxu1 %vm6882_vm1, %v6881_v6 }
0x2208   :  { %6513 = vmatprep.subr.bf16.mxu1 %v6880_v3  ;;  %6509 = vmatpush3.bf16.msra.mxu0 %v7131_v61 }
0x2209   :  { %6510 = vmatprep.subr.bf16.mxu0 %v6880_v3  ;;  %5985 = vmatprep.mubr.msk.f32.mxu0 %vm6882_vm1, %v6881_v6 }
0x220c   :  { %6512 = vmatpush3.bf16.msra.mxu0 %v7141_v1 }
0x220d   :  { %6519 = vmatprep.subr.bf16.mxu0 %v6880_v3 }
0x22d9   :  { %v2052_v20 = vpop.f32.mrb[18].mxu1  ;;  %v2127_v22 = vpop.f32.mrb[24].mxu0 }
0x22da   :  { %v2053_v23 = vadd.f32 %v2052_v20, %v7365_v63  ;;  %v2128_v24 = vadd.f32 %v2127_v22, %v7276_v39  ;;  %v5960_v25 = vpop.f32.mrb[19].mxu1  ;;  %v5971_v28 = vpop.f32.mrb[25].mxu0 }
0x22dc   :  { %v2059_v29 = vrot.slane %v2053_v23, %v6981_v50  ;;  %v2131_v12 = vsel %vm1100_vm11, %v2128_v24, -inf }
0x22dd   :  { %2132 = vmax.xlane.f32.xlu1 %v2131_v12 }
0x22de   :  { %v7378_v41 = vsel %vm346_vm4, %v2059_v29, %v1512_v31 }
0x236a   :  { %v2133_v32 = vpop.xlane.xlu1 %2132 }
0x236b   :  { %v2134_v17 = vsub.f32 %v2128_v24, %v2133_v32 }
0x236d   :  { %v2135_v33 = vmul.f32 1.442695, %v2134_v17 }
0x236f   :  { %6791 = vpow2.f32 %v2135_v33 }
0x2379   :  { %v6792_v34 = vpop.eup %6791 }
0x237a   :  { %v2137_v9 = vsel %vm1100_vm11, %v6792_v34, 0.0 }
0x237b   :  { %2138 = vadd.xlane.f32.xlu0 %v2137_v9 }
0x2408   :  { %v2139_v35 = vpop.xlane.xlu0 %2138 }
0x2409   :  { %6793 = vrcp.f32 %v2139_v35 }
0x2413   :  { %v6794_v37 = vpop.eup %6793 }
0x2414   :  { %v2141_v38 = vmul.f32 %v6794_v37, %v6792_v34 }
0x2416   :  { %5975 = vmatmul.mubr.msk.f32.vlgmr.msra.gmra.mrb[20].mxu1 %vm59_vm0, %v2141_v38 }
0x2417   :  { %6515 = vmatpush3.bf16.msra.mxu1 %v7289_v26  ;;  %5996 = vmatprep.mubr.msk.f32.mxu1 %vm6882_vm1, %v6881_v6 }
0x2418   :  { %6516 = vmatprep.subr.bf16.mxu1 %v6880_v3 }
0x241b   :  { %6518 = vmatpush3.bf16.msra.mxu1 %v7299_v4 }
0x241c   :  { %6525 = vmatprep.subr.bf16.mxu1 %v6880_v3 }
0x241e   :  { %5997 = vmatmul.mubr.msk.f32.vlgmr.msra.gmra.mrb[22].mxu1 %vm135_vm2, %v1983_v15 }
0x241f   :  { %6527 = vmatpush3.bf16.msra.mxu1 %v7164_v11  ;;  %6018 = vmatprep.mubr.msk.f32.mxu1 %vm6882_vm1, %v6881_v6 }
0x2420   :  { %6528 = vmatprep.subr.bf16.mxu1 %v6880_v3 }
0x2423   :  { %6530 = vmatpush3.bf16.msra.mxu1 %v7174_v18 }
0x2424   :  { %6537 = vmatprep.subr.bf16.mxu1 %v6880_v3 }
0x2426   :  { %6019 = vmatmul.mubr.msk.f32.vlgmr.msra.gmra.mrb[24].mxu1 %vm135_vm2, %v1983_v15 }
0x2427   :  { %6539 = vmatpush3.bf16.msra.mxu1 %v7223_v45  ;;  %6040 = vmatprep.mubr.msk.f32.mxu1 %vm6882_vm1, %v6881_v6 }
0x2428   :  { %6540 = vmatprep.subr.bf16.mxu1 %v6880_v3 }
0x242b   :  { %6542 = vmatpush3.bf16.msra.mxu1 %v7243_v55 }
0x242c   :  { %6543 = vmatprep.subr.bf16.mxu1 %v6880_v3 }
0x24e9   :  { %v2211_v40 = vpop.f32.mrb[20].mxu1 }
0x24ea   :  { %v5976_v42 = vpop.f32.mrb[21].mxu1  ;;  %5986 = vmatmul.mubr.msk.f32.vlgmr.msra.gmra.mrb[26].mxu0 %vm135_vm2, %v2211_v40 }
0x24eb   :  { %6521 = vmatpush3.bf16.msra.mxu0 %v7154_v7  ;;  %6007 = vmatprep.mubr.msk.f32.mxu0 %vm6882_vm1, %v6881_v6 }
0x24ec   :  { %6522 = vmatprep.subr.bf16.mxu0 %v6880_v3 }
0x24ef   :  { %6524 = vmatpush3.bf16.msra.mxu0 %v7190_v21 }
0x24f0   :  { %6531 = vmatprep.subr.bf16.mxu0 %v6880_v3 }
0x24f1   :  { %v2354_v43 = vpop.f32.mrb[22].mxu1 }
0x24f2   :  { %v5998_v44 = vpop.f32.mrb[23].mxu1 }
0x24f9   :  { %v2499_v46 = vpop.f32.mrb[24].mxu1 }
0x24fa   :  { %v2500_v47 = vadd.f32 %v2499_v46, %v7201_v27  ;;  %v6020_v48 = vpop.f32.mrb[25].mxu1 }
0x24fc   :  { %2511 = vrot.lane.b32.xlu0 %v2500_v47, %s6883_s22 }
0x256e   :  { %v2512_v15 = vpop.permute.xlu0 %2511 }
0x25bd   :  { %v2284_v52 = vpop.f32.mrb[26].mxu0 }
0x25be   :  { %v2355_v53 = vadd.f32 %v2354_v43, %v2284_v52  ;;  %v5987_v57 = vpop.f32.mrb[27].mxu0 }
0x25c0   :  { %v2358_v58 = vadd.f32 %v2355_v53, %v7332_v36 }
0x25c2   :  { %v2359_v59 = vmax.f32 %v2358_v58, 0.0 }
0x25c4   :  { %6008 = vmatmul.mubr.msk.f32.vlgmr.msra.gmra.mrb[28].mxu0 %vm135_vm2, %v2359_v59 }
0x25c5   :  { %6533 = vmatpush3.bf16.msra.mxu0 %v7234_v51  ;;  %6029 = vmatprep.mubr.msk.f32.mxu0 %vm6882_vm1, %v6881_v6 }
0x25c6   :  { %6534 = vmatprep.subr.bf16.mxu0 %v6880_v3 }
0x25c9   :  { %6536 = vmatpush3.bf16.msra.mxu0 %v7247_v56 }
0x25ca   :  { %6043 = vmatprep.subr.mxu0 %v6881_v6 }
0x2697   :  { %v2429_v60 = vpop.f32.mrb[28].mxu0 }
0x2698   :  { %v2430_v62 = vadd.f32 %v2429_v60, %v7210_v30  ;;  %v6009_v0 = vpop.f32.mrb[29].mxu0 }
0x269a   :  { %v2503_v2 = vadd.f32 %v2500_v47, %v2430_v62 }
0x269c   :  { %v5402_v5 = vmul.f32 -1.442695, %v2503_v2 }
0x269e   :  { %6795 = vpow2.f32 %v5402_v5 }
0x26a8   :  { %v6796_v8 = vpop.eup %6795 }
0x26a9   :  { %v2507_v10 = vadd.f32 1.0, %v6796_v8 }
0x26ab   :  { %6797 = vrcp.f32 %v2507_v10 }
0x26b5   :  { %v6798_v13 = vpop.eup %6797 }
0x26b6   :  { %v2514_v16 = vmul.f32 %v6798_v13, %v2512_v15  ;;  %v2521_v23 = vsub.f32 1.0, %v6798_v13  ;;  %v2527_v25 = vmul.f32 %v6798_v13, %v7346_v14 }
0x26b8   :  { %2516 = vrot.lane.b32.xlu1 %v2514_v16, %s6883_s22 }
0x272a   :  { %v2517_v19 = vpop.permute.xlu1 %2516 }
0x272b   :  { %v2519_v20 = vadd.f32 %v2517_v19, %v2430_v62 }
0x272d   :  { %6799 = vtanh.f32 %v2519_v20 }
0x2737   :  { %v6800_v22 = vpop.eup %6799 }
0x2738   :  { %2523 = vrot.lane.b32.xlu1 %v6800_v22, %s6884_s25 }
0x27aa   :  { %v2524_v24 = vpop.permute.xlu1 %2523 }
0x27ab   :  { %v2526_v28 = vmul.f32 %v2524_v24, %v2521_v23 }
0x27ad   :  { %v7423_v29 = vadd.f32 %v2527_v25, %v2526_v28 }
0x27af   :  { %2530 = vrot.lane.b32.xlu0 %v7423_v29, %s6884_s25 }
0x2821   :  { %v2531_v12 = vpop.permute.xlu0 %2530 }
0x2822   :  { %6030 = vmatmul.mubr.msk.f32.vlgmr.msra.gmra.mrb[30].mxu0 %vm135_vm2, %v2531_v12  ;;  %6041 = vmatmul.mubr.msk.f32.vlgmr.msra.gmra.mrb[26].mxu1 %vm135_vm2, %v2531_v12 }
0x2823   :  { %6044 = vmatpush3.msra.mxu0 %v7120_v54  ;;  %6045 = vmatprep.mubr.msk.f32.mxu0 %vm6882_vm1, %v6881_v6 }
0x2824   :  { %6549 = vmatprep.subr.bf16.mxu0 %v6880_v3  ;;  %6545 = vmatpush3.bf16.msra.mxu1 %v7131_v61 }
0x2825   :  { %6546 = vmatprep.subr.bf16.mxu1 %v6880_v3  ;;  %6056 = vmatprep.mubr.msk.f32.mxu1 %vm6882_vm1, %v6881_v6 }
0x2828   :  { %6548 = vmatpush3.bf16.msra.mxu1 %v7141_v1 }
0x2829   :  { %6555 = vmatprep.subr.bf16.mxu1 %v6880_v3 }
0x28f5   :  { %v2600_v14 = vpop.f32.mrb[30].mxu0  ;;  %v2675_v31 = vpop.f32.mrb[26].mxu1 }
0x28f6   :  { %v2601_v32 = vadd.f32 %v2600_v14, %v7365_v63  ;;  %v2676_v17 = vadd.f32 %v2675_v31, %v7276_v39  ;;  %v6031_v33 = vpop.f32.mrb[31].mxu0  ;;  %v6042_v34 = vpop.f32.mrb[27].mxu1 }
0x28f8   :  { %v2607_v9 = vrot.slane %v2601_v32, %v6981_v50  ;;  %v2679_v35 = vsel %vm1100_vm11, %v2676_v17, -inf }
0x28f9   :  { %2680 = vmax.xlane.f32.xlu1 %v2679_v35 }
0x28fa   :  { %v7446_v37 = vsel %vm458_vm5, %v2607_v9, %v7378_v41 }
0x2986   :  { %v2681_v38 = vpop.xlane.xlu1 %2680 }
0x2987   :  { %v2682_v40 = vsub.f32 %v2676_v17, %v2681_v38 }
0x2989   :  { %v2683_v42 = vmul.f32 1.442695, %v2682_v40 }
0x298b   :  { %6801 = vpow2.f32 %v2683_v42 }
0x2995   :  { %v6802_v43 = vpop.eup %6801 }
0x2996   :  { %v2685_v44 = vsel %vm1100_vm11, %v6802_v43, 0.0 }
0x2997   :  { %2686 = vadd.xlane.f32.xlu0 %v2685_v44 }
0x2a24   :  { %v2687_v46 = vpop.xlane.xlu0 %2686 }
0x2a25   :  { %6803 = vrcp.f32 %v2687_v46 }
0x2a2f   :  { %v6804_v47 = vpop.eup %6803 }
0x2a30   :  { %v2689_v48 = vmul.f32 %v6804_v47, %v6802_v43 }
0x2a32   :  { %6046 = vmatmul.mubr.msk.f32.vlgmr.msra.gmra.mrb[32].mxu0 %vm59_vm0, %v2689_v48 }
0x2a33   :  { %6551 = vmatpush3.bf16.msra.mxu0 %v7289_v26  ;;  %6067 = vmatprep.mubr.msk.f32.mxu0 %vm6882_vm1, %v6881_v6 }
0x2a34   :  { %6552 = vmatprep.subr.bf16.mxu0 %v6880_v3 }
0x2a37   :  { %6554 = vmatpush3.bf16.msra.mxu0 %v7299_v4 }
0x2a38   :  { %6561 = vmatprep.subr.bf16.mxu0 %v6880_v3 }
0x2a3a   :  { %6068 = vmatmul.mubr.msk.f32.vlgmr.msra.gmra.mrb[34].mxu0 %vm135_vm2, %v2531_v12 }
0x2a3b   :  { %6563 = vmatpush3.bf16.msra.mxu0 %v7164_v11  ;;  %6089 = vmatprep.mubr.msk.f32.mxu0 %vm6882_vm1, %v6881_v6 }
0x2a3c   :  { %6564 = vmatprep.subr.bf16.mxu0 %v6880_v3 }
0x2a3f   :  { %6566 = vmatpush3.bf16.msra.mxu0 %v7174_v18 }
0x2a40   :  { %6573 = vmatprep.subr.bf16.mxu0 %v6880_v3 }
0x2a42   :  { %6090 = vmatmul.mubr.msk.f32.vlgmr.msra.gmra.mrb[36].mxu0 %vm135_vm2, %v2531_v12 }
0x2a43   :  { %6575 = vmatpush3.bf16.msra.mxu0 %v7223_v45  ;;  %6111 = vmatprep.mubr.msk.f32.mxu0 %vm6882_vm1, %v6881_v6 }
0x2a44   :  { %6576 = vmatprep.subr.bf16.mxu0 %v6880_v3 }
0x2a47   :  { %6578 = vmatpush3.bf16.msra.mxu0 %v7243_v55 }
0x2a48   :  { %6579 = vmatprep.subr.bf16.mxu0 %v6880_v3 }
0x2b05   :  { %v2759_v41 = vpop.f32.mrb[32].mxu0 }
0x2b06   :  { %v6047_v52 = vpop.f32.mrb[33].mxu0  ;;  %6057 = vmatmul.mubr.msk.f32.vlgmr.msra.gmra.mrb[28].mxu1 %vm135_vm2, %v2759_v41 }
0x2b07   :  { %6557 = vmatpush3.bf16.msra.mxu1 %v7154_v7  ;;  %6078 = vmatprep.mubr.msk.f32.mxu1 %vm6882_vm1, %v6881_v6 }
0x2b08   :  { %6558 = vmatprep.subr.bf16.mxu1 %v6880_v3 }
0x2b0b   :  { %6560 = vmatpush3.bf16.msra.mxu1 %v7190_v21 }
0x2b0c   :  { %6567 = vmatprep.subr.bf16.mxu1 %v6880_v3 }
0x2b0d   :  { %v2902_v53 = vpop.f32.mrb[34].mxu0 }
0x2b0e   :  { %v6069_v57 = vpop.f32.mrb[35].mxu0 }
0x2b15   :  { %v3047_v58 = vpop.f32.mrb[36].mxu0 }
0x2b16   :  { %v3048_v59 = vadd.f32 %v3047_v58, %v7201_v27  ;;  %v6091_v60 = vpop.f32.mrb[37].mxu0 }
0x2b18   :  { %3059 = vrot.lane.b32.xlu0 %v3048_v59, %s6883_s22 }
0x2b8a   :  { %v3060_v24 = vpop.permute.xlu0 %3059 }
0x2bd9   :  { %v2832_v62 = vpop.f32.mrb[28].mxu1 }
0x2bda   :  { %v2903_v0 = vadd.f32 %v2902_v53, %v2832_v62  ;;  %v6058_v2 = vpop.f32.mrb[29].mxu1 }
0x2bdc   :  { %v2906_v5 = vadd.f32 %v2903_v0, %v7332_v36 }
0x2bde   :  { %v2907_v8 = vmax.f32 %v2906_v5, 0.0 }
0x2be0   :  { %6079 = vmatmul.mubr.msk.f32.vlgmr.msra.gmra.mrb[30].mxu1 %vm135_vm2, %v2907_v8 }
0x2be1   :  { %6569 = vmatpush3.bf16.msra.mxu1 %v7234_v51  ;;  %6100 = vmatprep.mubr.msk.f32.mxu1 %vm6882_vm1, %v6881_v6 }
0x2be2   :  { %6570 = vmatprep.subr.bf16.mxu1 %v6880_v3 }
0x2be5   :  { %6572 = vmatpush3.bf16.msra.mxu1 %v7247_v56 }
0x2be6   :  { %6114 = vmatprep.subr.mxu1 %v6881_v6 }
0x2cb3   :  { %v2977_v10 = vpop.f32.mrb[30].mxu1 }
0x2cb4   :  { %v2978_v13 = vadd.f32 %v2977_v10, %v7210_v30  ;;  %v6080_v15 = vpop.f32.mrb[31].mxu1 }
0x2cb6   :  { %v3051_v16 = vadd.f32 %v3048_v59, %v2978_v13 }
0x2cb8   :  { %v5410_v19 = vmul.f32 -1.442695, %v3051_v16 }
0x2cba   :  { %6805 = vpow2.f32 %v5410_v19 }
0x2cc4   :  { %v6806_v20 = vpop.eup %6805 }
0x2cc5   :  { %v3055_v22 = vadd.f32 1.0, %v6806_v20 }
0x2cc7   :  { %6807 = vrcp.f32 %v3055_v22 }
0x2cd1   :  { %v6808_v23 = vpop.eup %6807 }
0x2cd2   :  { %v3062_v25 = vmul.f32 %v6808_v23, %v3060_v24  ;;  %v3069_v31 = vsub.f32 1.0, %v6808_v23  ;;  %v3075_v17 = vmul.f32 %v6808_v23, %v7423_v29 }
0x2cd4   :  { %3064 = vrot.lane.b32.xlu1 %v3062_v25, %s6883_s22 }
0x2d46   :  { %v3065_v28 = vpop.permute.xlu1 %3064 }
0x2d47   :  { %v3067_v12 = vadd.f32 %v3065_v28, %v2978_v13 }
0x2d49   :  { %6809 = vtanh.f32 %v3067_v12 }
0x2d53   :  { %v6810_v14 = vpop.eup %6809 }
0x2d54   :  { %3071 = vrot.lane.b32.xlu1 %v6810_v14, %s6884_s25 }
0x2dc6   :  { %v3072_v32 = vpop.permute.xlu1 %3071 }
0x2dc7   :  { %v3074_v33 = vmul.f32 %v3072_v32, %v3069_v31 }
0x2dc9   :  { %v7491_v34 = vadd.f32 %v3075_v17, %v3074_v33 }
0x2dcb   :  { %3078 = vrot.lane.b32.xlu0 %v7491_v34, %s6884_s25 }
0x2e3d   :  { %v3079_v9 = vpop.permute.xlu0 %3078 }
0x2e3e   :  { %6101 = vmatmul.mubr.msk.f32.vlgmr.msra.gmra.mrb[32].mxu1 %vm135_vm2, %v3079_v9  ;;  %6112 = vmatmul.mubr.msk.f32.vlgmr.msra.gmra.mrb[38].mxu0 %vm135_vm2, %v3079_v9 }
0x2e3f   :  { %6115 = vmatpush3.msra.mxu1 %v7120_v54  ;;  %6116 = vmatprep.mubr.msk.f32.mxu1 %vm6882_vm1, %v6881_v6 }
0x2e40   :  { %6585 = vmatprep.subr.bf16.mxu1 %v6880_v3  ;;  %6581 = vmatpush3.bf16.msra.mxu0 %v7131_v61 }
0x2e41   :  { %6582 = vmatprep.subr.bf16.mxu0 %v6880_v3  ;;  %6127 = vmatprep.mubr.msk.f32.mxu0 %vm6882_vm1, %v6881_v6 }
0x2e44   :  { %6584 = vmatpush3.bf16.msra.mxu0 %v7141_v1 }
0x2e45   :  { %6591 = vmatprep.subr.bf16.mxu0 %v6880_v3 }
0x2f11   :  { %v3148_v29 = vpop.f32.mrb[32].mxu1  ;;  %v3223_v35 = vpop.f32.mrb[38].mxu0 }
0x2f12   :  { %v3149_v38 = vadd.f32 %v3148_v29, %v7365_v63  ;;  %v3224_v40 = vadd.f32 %v3223_v35, %v7276_v39  ;;  %v6102_v42 = vpop.f32.mrb[33].mxu1  ;;  %v6113_v43 = vpop.f32.mrb[39].mxu0 }
0x2f14   :  { %v3155_v44 = vrot.slane %v3149_v38, %v6981_v50  ;;  %v3227_v46 = vsel %vm1100_vm11, %v3224_v40, -inf }
0x2f15   :  { %3228 = vmax.xlane.f32.xlu1 %v3227_v46 }
0x2f16   :  { %v7514_v47 = vsel %vm570_vm6, %v3155_v44, %v7446_v37 }
0x2fa2   :  { %v3229_v48 = vpop.xlane.xlu1 %3228 }
0x2fa3   :  { %v3230_v41 = vsub.f32 %v3224_v40, %v3229_v48 }
0x2fa5   :  { %v3231_v52 = vmul.f32 1.442695, %v3230_v41 }
0x2fa7   :  { %6811 = vpow2.f32 %v3231_v52 }
0x2fb1   :  { %v6812_v53 = vpop.eup %6811 }
0x2fb2   :  { %v3233_v57 = vsel %vm1100_vm11, %v6812_v53, 0.0 }
0x2fb3   :  { %3234 = vadd.xlane.f32.xlu0 %v3233_v57 }
0x3040   :  { %v3235_v58 = vpop.xlane.xlu0 %3234 }
0x3041   :  { %6813 = vrcp.f32 %v3235_v58 }
0x304b   :  { %v6814_v59 = vpop.eup %6813 }
0x304c   :  { %v3237_v60 = vmul.f32 %v6814_v59, %v6812_v53 }
0x304e   :  { %6117 = vmatmul.mubr.msk.f32.vlgmr.msra.gmra.mrb[34].mxu1 %vm59_vm0, %v3237_v60 }
0x304f   :  { %6587 = vmatpush3.bf16.msra.mxu1 %v7289_v26  ;;  %6138 = vmatprep.mubr.msk.f32.mxu1 %vm6882_vm1, %v6881_v6 }
0x3050   :  { %6588 = vmatprep.subr.bf16.mxu1 %v6880_v3 }
0x3053   :  { %6590 = vmatpush3.bf16.msra.mxu1 %v7299_v4 }
0x3054   :  { %6597 = vmatprep.subr.bf16.mxu1 %v6880_v3 }
0x3056   :  { %6139 = vmatmul.mubr.msk.f32.vlgmr.msra.gmra.mrb[36].mxu1 %vm135_vm2, %v3079_v9 }
0x3057   :  { %6599 = vmatpush3.bf16.msra.mxu1 %v7164_v11  ;;  %6160 = vmatprep.mubr.msk.f32.mxu1 %vm6882_vm1, %v6881_v6 }
0x3058   :  { %6600 = vmatprep.subr.bf16.mxu1 %v6880_v3 }
0x305b   :  { %6602 = vmatpush3.bf16.msra.mxu1 %v7174_v18 }
0x305c   :  { %6609 = vmatprep.subr.bf16.mxu1 %v6880_v3 }
0x305e   :  { %6161 = vmatmul.mubr.msk.f32.vlgmr.msra.gmra.mrb[38].mxu1 %vm135_vm2, %v3079_v9 }
0x305f   :  { %6611 = vmatpush3.bf16.msra.mxu1 %v7223_v45  ;;  %6182 = vmatprep.mubr.msk.f32.mxu1 %vm6882_vm1, %v6881_v6 }
0x3060   :  { %6612 = vmatprep.subr.bf16.mxu1 %v6880_v3 }
0x3063   :  { %6614 = vmatpush3.bf16.msra.mxu1 %v7243_v55 }
0x3064   :  { %6615 = vmatprep.subr.bf16.mxu1 %v6880_v3 }
0x3121   :  { %v3307_v37 = vpop.f32.mrb[34].mxu1 }
0x3122   :  { %v6118_v62 = vpop.f32.mrb[35].mxu1  ;;  %6128 = vmatmul.mubr.msk.f32.vlgmr.msra.gmra.mrb[40].mxu0 %vm135_vm2, %v3307_v37 }
0x3123   :  { %6593 = vmatpush3.bf16.msra.mxu0 %v7154_v7  ;;  %6149 = vmatprep.mubr.msk.f32.mxu0 %vm6882_vm1, %v6881_v6 }
0x3124   :  { %6594 = vmatprep.subr.bf16.mxu0 %v6880_v3 }
0x3127   :  { %6596 = vmatpush3.bf16.msra.mxu0 %v7190_v21 }
0x3128   :  { %6603 = vmatprep.subr.bf16.mxu0 %v6880_v3 }
0x3129   :  { %v3450_v0 = vpop.f32.mrb[36].mxu1 }
0x312a   :  { %v6140_v2 = vpop.f32.mrb[37].mxu1 }
0x3131   :  { %v3595_v5 = vpop.f32.mrb[38].mxu1 }
0x3132   :  { %v3596_v8 = vadd.f32 %v3595_v5, %v7201_v27  ;;  %v6162_v10 = vpop.f32.mrb[39].mxu1 }
0x3134   :  { %3607 = vrot.lane.b32.xlu0 %v3596_v8, %s6883_s22 }
0x31a6   :  { %v3608_v31 = vpop.permute.xlu0 %3607 }
0x31f5   :  { %v3380_v13 = vpop.f32.mrb[40].mxu0 }
0x31f6   :  { %v3451_v15 = vadd.f32 %v3450_v0, %v3380_v13  ;;  %v6129_v16 = vpop.f32.mrb[41].mxu0 }
0x31f7   :  { %v7616_v16 = vld [vmem:[%s7792_s1 + $0x80] sm:$0x1] }
0x31f8   :  { %v3454_v19 = vadd.f32 %v3451_v15, %v7332_v36 }
0x31fa   :  { %v3455_v20 = vmax.f32 %v3454_v19, 0.0 }
0x31fc   :  { %6150 = vmatmul.mubr.msk.f32.vlgmr.msra.gmra.mrb[42].mxu0 %vm135_vm2, %v3455_v20 }
0x31fd   :  { %6605 = vmatpush3.bf16.msra.mxu0 %v7234_v51  ;;  %6171 = vmatprep.mubr.msk.f32.mxu0 %vm6882_vm1, %v6881_v6 }
0x31fe   :  { %6606 = vmatprep.subr.bf16.mxu0 %v6880_v3 }
0x3201   :  { %6608 = vmatpush3.bf16.msra.mxu0 %v7247_v56 }
0x3202   :  { %6185 = vmatprep.subr.mxu0 %v6881_v6 }
0x32cf   :  { %v3525_v27 = vpop.f32.mrb[42].mxu0 }
0x32d0   :  { %v3526_v22 = vadd.f32 %v3525_v27, %v7210_v30  ;;  %v6151_v23 = vpop.f32.mrb[43].mxu0 }
0x32d2   :  { %v3599_v24 = vadd.f32 %v3596_v8, %v3526_v22 }
0x32d4   :  { %v5418_v25 = vmul.f32 -1.442695, %v3599_v24 }
0x32d6   :  { %6815 = vpow2.f32 %v5418_v25 }
0x32e0   :  { %v6816_v28 = vpop.eup %6815 }
0x32e1   :  { %v3603_v12 = vadd.f32 1.0, %v6816_v28 }
0x32e3   :  { %6817 = vrcp.f32 %v3603_v12  ;;  %v7631_v12 = vld [vmem:[%s7792_s1 + $0x78] sm:$0x1] }
0x32ed   :  { %v6818_v14 = vpop.eup %6817 }
0x32ee   :  { %v3610_v32 = vmul.f32 %v6818_v14, %v3608_v31  ;;  %v3617_v29 = vsub.f32 1.0, %v6818_v14  ;;  %v3623_v35 = vmul.f32 %v6818_v14, %v7491_v34 }
0x32f0   :  { %3612 = vrot.lane.b32.xlu1 %v3610_v32, %s6883_s22 }
0x3362   :  { %v3613_v17 = vpop.permute.xlu1 %3612 }
0x3363   :  { %v3615_v33 = vadd.f32 %v3613_v17, %v3526_v22 }
0x3365   :  { %6819 = vtanh.f32 %v3615_v33 }
0x336f   :  { %v6820_v9 = vpop.eup %6819 }
0x3370   :  { %3619 = vrot.lane.b32.xlu1 %v6820_v9, %s6884_s25 }
0x33e2   :  { %v3620_v30 = vpop.permute.xlu1 %3619 }
0x33e3   :  { %v3622_v38 = vmul.f32 %v3620_v30, %v3617_v29 }
0x33e5   :  { %v7559_v40 = vadd.f32 %v3623_v35, %v3622_v38 }
0x33e7   :  { %3626 = vrot.lane.b32.xlu0 %v7559_v40, %s6884_s25 }
0x3459   :  { %v3627_v42 = vpop.permute.xlu0 %3626 }
0x345a   :  { %6172 = vmatmul.mubr.msk.f32.vlgmr.msra.gmra.mrb[44].mxu0 %vm135_vm2, %v3627_v42  ;;  %6183 = vmatmul.mubr.msk.f32.vlgmr.msra.gmra.mrb[40].mxu1 %vm135_vm2, %v3627_v42 }
0x345b   :  { %6186 = vmatpush3.msra.mxu0 %v7120_v54  ;;  %6187 = vmatprep.mubr.msk.f32.mxu0 %vm6882_vm1, %v6881_v6 }
0x345c   :  { %6621 = vmatprep.subr.bf16.mxu0 %v6880_v3  ;;  %6617 = vmatpush3.bf16.msra.mxu1 %v7131_v61 }
0x345d   :  { %6618 = vmatprep.subr.bf16.mxu1 %v6880_v3  ;;  %6198 = vmatprep.mubr.msk.f32.mxu1 %vm6882_vm1, %v6881_v6 }
0x3460   :  { %6620 = vmatpush3.bf16.msra.mxu1 %v7141_v1 }
0x3461   :  { %6627 = vmatprep.subr.bf16.mxu1 %v6880_v3 }
0x352d   :  { %v3696_v34 = vpop.f32.mrb[44].mxu0  ;;  %v3771_v43 = vpop.f32.mrb[40].mxu1 }
0x352e   :  { %v3697_v44 = vadd.f32 %v3696_v34, %v7365_v63  ;;  %v3772_v46 = vadd.f32 %v3771_v43, %v7276_v39  ;;  %v6173_v48 = vpop.f32.mrb[45].mxu0  ;;  %v6184_v41 = vpop.f32.mrb[41].mxu1 }
0x3530   :  { %v3703_v52 = vrot.slane %v3697_v44, %v6981_v50  ;;  %v3775_v53 = vsel %vm1100_vm11, %v3772_v46, -inf }
0x3531   :  { %3776 = vmax.xlane.f32.xlu1 %v3775_v53 }
0x3532   :  { %v7582_v57 = vsel %vm682_vm7, %v3703_v52, %v7514_v47 }
0x35be   :  { %v3777_v58 = vpop.xlane.xlu1 %3776 }
0x35bf   :  { %v3778_v59 = vsub.f32 %v3772_v46, %v3777_v58 }
0x35c1   :  { %v3779_v60 = vmul.f32 1.442695, %v3778_v59 }
0x35c3   :  { %6821 = vpow2.f32 %v3779_v60 }
0x35cd   :  { %v6822_v37 = vpop.eup %6821 }
0x35ce   :  { %v3781_v62 = vsel %vm1100_vm11, %v6822_v37, 0.0 }
0x35cf   :  { %3782 = vadd.xlane.f32.xlu0 %v3781_v62 }
0x365c   :  { %v3783_v0 = vpop.xlane.xlu0 %3782 }
0x365d   :  { %6823 = vrcp.f32 %v3783_v0 }
0x3667   :  { %v6824_v2 = vpop.eup %6823 }
0x3668   :  { %v3785_v5 = vmul.f32 %v6824_v2, %v6822_v37 }
0x366a   :  { %6188 = vmatmul.mubr.msk.f32.vlgmr.msra.gmra.mrb[46].mxu0 %vm59_vm0, %v3785_v5 }
0x366b   :  { %6623 = vmatpush3.bf16.msra.mxu0 %v7289_v26  ;;  %6209 = vmatprep.mubr.msk.f32.mxu0 %vm6882_vm1, %v6881_v6 }
0x366c   :  { %6624 = vmatprep.subr.bf16.mxu0 %v6880_v3 }
0x366f   :  { %6626 = vmatpush3.bf16.msra.mxu0 %v7299_v4 }
0x3670   :  { %6633 = vmatprep.subr.bf16.mxu0 %v6880_v3 }
0x3672   :  { %6210 = vmatmul.mubr.msk.f32.vlgmr.msra.gmra.mrb[48].mxu0 %vm135_vm2, %v3627_v42 }
0x3673   :  { %6635 = vmatpush3.bf16.msra.mxu0 %v7164_v11  ;;  %6231 = vmatprep.mubr.msk.f32.mxu0 %vm6882_vm1, %v6881_v6 }
0x3674   :  { %6636 = vmatprep.subr.bf16.mxu0 %v6880_v3 }
0x3677   :  { %6638 = vmatpush3.bf16.msra.mxu0 %v7174_v18 }
0x3678   :  { %6645 = vmatprep.subr.bf16.mxu0 %v6880_v3 }
0x367a   :  { %6232 = vmatmul.mubr.msk.f32.vlgmr.msra.gmra.mrb[50].mxu0 %vm135_vm2, %v3627_v42 }
0x367b   :  { %6647 = vmatpush3.bf16.msra.mxu0 %v7223_v45  ;;  %6253 = vmatprep.mubr.msk.f32.mxu0 %vm6882_vm1, %v6881_v6 }
0x367c   :  { %6648 = vmatprep.subr.bf16.mxu0 %v6880_v3 }
0x367f   :  { %6650 = vmatpush3.bf16.msra.mxu0 %v7243_v55 }
0x3680   :  { %6651 = vmatprep.subr.bf16.mxu0 %v6880_v3 }
0x373d   :  { %v3855_v47 = vpop.f32.mrb[46].mxu0 }
0x373e   :  { %v6189_v8 = vpop.f32.mrb[47].mxu0  ;;  %6199 = vmatmul.mubr.msk.f32.vlgmr.msra.gmra.mrb[42].mxu1 %vm135_vm2, %v3855_v47 }
0x373f   :  { %6629 = vmatpush3.bf16.msra.mxu1 %v7154_v7  ;;  %6220 = vmatprep.mubr.msk.f32.mxu1 %vm6882_vm1, %v6881_v6 }
0x3740   :  { %6630 = vmatprep.subr.bf16.mxu1 %v6880_v3 }
0x3743   :  { %6632 = vmatpush3.bf16.msra.mxu1 %v7190_v21 }
0x3744   :  { %6639 = vmatprep.subr.bf16.mxu1 %v6880_v3 }
0x3745   :  { %v3998_v10 = vpop.f32.mrb[48].mxu0 }
0x3746   :  { %v6211_v13 = vpop.f32.mrb[49].mxu0 }
0x374d   :  { %v4143_v15 = vpop.f32.mrb[50].mxu0 }
0x374e   :  { %v4144_v19 = vadd.f32 %v7616_v16, %v4143_v15  ;;  %v6233_v20 = vpop.f32.mrb[51].mxu0 }
0x3750   :  { %4155 = vrot.lane.b32.xlu0 %v4144_v19, %s6883_s22 }
0x37c2   :  { %v4156_v30 = vpop.permute.xlu0 %4155 }
0x3811   :  { %v3928_v27 = vpop.f32.mrb[42].mxu1 }
0x3812   :  { %v3999_v22 = vadd.f32 %v3998_v10, %v3928_v27  ;;  %v6200_v23 = vpop.f32.mrb[43].mxu1 }
0x3814   :  { %v4002_v24 = vadd.f32 %v3999_v22, %v7332_v36 }
0x3816   :  { %v4003_v25 = vmax.f32 %v4002_v24, 0.0 }
0x3818   :  { %6221 = vmatmul.mubr.msk.f32.vlgmr.msra.gmra.mrb[44].mxu1 %vm135_vm2, %v4003_v25 }
0x3819   :  { %6641 = vmatpush3.bf16.msra.mxu1 %v7234_v51  ;;  %6242 = vmatprep.mubr.msk.f32.mxu1 %vm6882_vm1, %v6881_v6 }
0x381a   :  { %6642 = vmatprep.subr.bf16.mxu1 %v6880_v3 }
0x381d   :  { %6644 = vmatpush3.bf16.msra.mxu1 %v7247_v56 }
0x381e   :  { %6256 = vmatprep.subr.mxu1 %v6881_v6 }
0x38eb   :  { %v4073_v28 = vpop.f32.mrb[44].mxu1 }
0x38ec   :  { %v4074_v14 = vadd.f32 %v7631_v12, %v4073_v28  ;;  %v6222_v31 = vpop.f32.mrb[45].mxu1 }
0x38ee   :  { %v4147_v32 = vadd.f32 %v4144_v19, %v4074_v14 }
0x38f0   :  { %v5426_v17 = vmul.f32 -1.442695, %v4147_v32 }
0x38f2   :  { %6825 = vpow2.f32 %v5426_v17 }
0x38fc   :  { %v6826_v33 = vpop.eup %6825 }
0x38fd   :  { %v4151_v9 = vadd.f32 1.0, %v6826_v33 }
0x38ff   :  { %6827 = vrcp.f32 %v4151_v9 }
0x3909   :  { %v6828_v29 = vpop.eup %6827 }
0x390a   :  { %v4158_v35 = vmul.f32 %v6828_v29, %v4156_v30  ;;  %v4165_v43 = vsub.f32 1.0, %v6828_v29  ;;  %v4171_v46 = vmul.f32 %v6828_v29, %v7559_v40 }
0x390c   :  { %4160 = vrot.lane.b32.xlu1 %v4158_v35, %s6883_s22 }
0x397e   :  { %v4161_v38 = vpop.permute.xlu1 %4160 }
0x397f   :  { %v4163_v42 = vadd.f32 %v4161_v38, %v4074_v14 }
0x3981   :  { %6829 = vtanh.f32 %v4163_v42 }
0x398b   :  { %v6830_v34 = vpop.eup %6829 }
0x398c   :  { %4167 = vrot.lane.b32.xlu1 %v6830_v34, %s6884_s25 }
0x39fe   :  { %v4168_v44 = vpop.permute.xlu1 %4167 }
0x39ff   :  { %v4170_v48 = vmul.f32 %v4168_v44, %v4165_v43 }
0x3a01   :  { %v7637_v41 = vadd.f32 %v4171_v46, %v4170_v48 }
0x3a03   :  { %4174 = vrot.lane.b32.xlu0 %v7637_v41, %s6884_s25 }
0x3a75   :  { %v4175_v52 = vpop.permute.xlu0 %4174 }
0x3a76   :  { %6243 = vmatmul.mubr.msk.f32.vlgmr.msra.gmra.mrb[46].mxu1 %vm135_vm2, %v4175_v52  ;;  %6254 = vmatmul.mubr.msk.f32.vlgmr.msra.gmra.mrb[52].mxu0 %vm135_vm2, %v4175_v52 }
0x3a77   :  { %6257 = vmatpush3.msra.mxu1 %v7120_v54  ;;  %6258 = vmatprep.mubr.msk.f32.mxu1 %vm6882_vm1, %v6881_v6 }
0x3a78   :  { %6657 = vmatprep.subr.bf16.mxu1 %v6880_v3  ;;  %6653 = vmatpush3.bf16.msra.mxu0 %v7131_v61 }
0x3a79   :  { %6654 = vmatprep.subr.bf16.mxu0 %v6880_v3  ;;  %6269 = vmatprep.mubr.msk.f32.mxu0 %vm6882_vm1, %v6881_v6 }
0x3a7c   :  { %6656 = vmatpush3.bf16.msra.mxu0 %v7141_v1 }
0x3a7d   :  { %6663 = vmatprep.subr.bf16.mxu0 %v6880_v3 }
0x3b49   :  { %v4244_v40 = vpop.f32.mrb[46].mxu1  ;;  %v4319_v53 = vpop.f32.mrb[52].mxu0 }
0x3b4a   :  { %v4245_v58 = vadd.f32 %v4244_v40, %v7365_v63  ;;  %v4320_v59 = vadd.f32 %v4319_v53, %v7276_v39  ;;  %v6244_v60 = vpop.f32.mrb[47].mxu1  ;;  %v6255_v37 = vpop.f32.mrb[53].mxu0 }
0x3b4b   :  { %v6853_v60 = vld [vmem:[%s7792_s1 + $0x130] sm:$0x1] }
0x3b4c   :  { %v4251_v62 = vrot.slane %v4245_v58, %v6981_v50  ;;  %v4323_v0 = vsel %vm1100_vm11, %v4320_v59, -inf }
0x3b4d   :  { %4324 = vmax.xlane.f32.xlu1 %v4323_v0 }
0x3b4e   :  { %v7660_v2 = vsel %vm794_vm8, %v4251_v62, %v7582_v57 }
0x3bda   :  { %v4325_v5 = vpop.xlane.xlu1 %4324 }
0x3bdb   :  { %v4326_v47 = vsub.f32 %v4320_v59, %v4325_v5 }
0x3bdd   :  { %v4327_v8 = vmul.f32 1.442695, %v4326_v47 }
0x3bdf   :  { %6831 = vpow2.f32 %v4327_v8 }
0x3be9   :  { %v6832_v10 = vpop.eup %6831 }
0x3bea   :  { %v4329_v13 = vsel %vm1100_vm11, %v6832_v10, 0.0 }
0x3beb   :  { %4330 = vadd.xlane.f32.xlu0 %v4329_v13 }
0x3c78   :  { %v4331_v39 = vpop.xlane.xlu0 %4330 }
0x3c79   :  { %6833 = vrcp.f32 %v4331_v39 }
0x3c83   :  { %v6834_v15 = vpop.eup %6833 }
0x3c84   :  { %v4333_v19 = vmul.f32 %v6834_v15, %v6832_v10 }
0x3c86   :  { %6259 = vmatmul.mubr.msk.f32.vlgmr.msra.gmra.mrb[48].mxu1 %vm59_vm0, %v4333_v19 }
0x3c87   :  { %6659 = vmatpush3.bf16.msra.mxu1 %v7289_v26  ;;  %6280 = vmatprep.mubr.msk.f32.mxu1 %vm6882_vm1, %v6881_v6 }
0x3c88   :  { %6660 = vmatprep.subr.bf16.mxu1 %v6880_v3 }
0x3c8b   :  { %6662 = vmatpush3.bf16.msra.mxu1 %v7299_v4 }
0x3c8c   :  { %6669 = vmatprep.subr.bf16.mxu1 %v6880_v3 }
0x3c8e   :  { %6281 = vmatmul.mubr.msk.f32.vlgmr.msra.gmra.mrb[50].mxu1 %vm135_vm2, %v4175_v52 }
0x3c8f   :  { %6671 = vmatpush3.bf16.msra.mxu1 %v7164_v11  ;;  %6302 = vmatprep.mubr.msk.f32.mxu1 %vm6882_vm1, %v6881_v6 }
0x3c90   :  { %6672 = vmatprep.subr.bf16.mxu1 %v6880_v3 }
0x3c93   :  { %6674 = vmatpush3.bf16.msra.mxu1 %v7174_v18 }
0x3c94   :  { %6681 = vmatprep.subr.bf16.mxu1 %v6880_v3 }
0x3c96   :  { %6303 = vmatmul.mubr.msk.f32.vlgmr.msra.gmra.mrb[52].mxu1 %vm135_vm2, %v4175_v52 }
0x3c97   :  { %6683 = vmatpush3.bf16.msra.mxu1 %v7223_v45  ;;  %6324 = vmatprep.mubr.msk.f32.mxu1 %vm6882_vm1, %v6881_v6 }
0x3c98   :  { %6684 = vmatprep.subr.bf16.mxu1 %v6880_v3 }
0x3c9b   :  { %6686 = vmatpush3.bf16.msra.mxu1 %v7243_v55 }
0x3c9c   :  { %6687 = vmatprep.subr.bf16.mxu1 %v6880_v3 }
0x3d59   :  { %v4403_v57 = vpop.f32.mrb[48].mxu1 }
0x3d5a   :  { %v6260_v20 = vpop.f32.mrb[49].mxu1  ;;  %6270 = vmatmul.mubr.msk.f32.vlgmr.msra.gmra.mrb[54].mxu0 %vm135_vm2, %v4403_v57 }
0x3d5b   :  { %6665 = vmatpush3.bf16.msra.mxu0 %v7154_v7  ;;  %6291 = vmatprep.mubr.msk.f32.mxu0 %vm6882_vm1, %v6881_v6 }
0x3d5c   :  { %6666 = vmatprep.subr.bf16.mxu0 %v6880_v3 }
0x3d5f   :  { %6668 = vmatpush3.bf16.msra.mxu0 %v7190_v21 }
0x3d60   :  { %6675 = vmatprep.subr.bf16.mxu0 %v6880_v3 }
0x3d61   :  { %v4546_v45 = vpop.f32.mrb[50].mxu1 }
0x3d62   :  { %v6282_v27 = vpop.f32.mrb[51].mxu1 }
0x3d69   :  { %v4691_v55 = vpop.f32.mrb[52].mxu1 }
0x3d6a   :  { %v4692_v22 = vadd.f32 %v7616_v16, %v4691_v55  ;;  %v6304_v23 = vpop.f32.mrb[53].mxu1  ;;  %v6854_v55 = vld [vmem:[%s7792_s1 + $0x140] sm:$0x1] }
0x3d6c   :  { %4703 = vrot.lane.b32.xlu0 %v4692_v22, %s6883_s22 }
0x3dde   :  { %v4704_v38 = vpop.permute.xlu0 %4703 }
0x3e2d   :  { %v4476_v24 = vpop.f32.mrb[54].mxu0 }
0x3e2e   :  { %v4547_v25 = vadd.f32 %v4546_v45, %v4476_v24  ;;  %v6271_v28 = vpop.f32.mrb[55].mxu0 }
0x3e30   :  { %v4550_v14 = vadd.f32 %v4547_v25, %v7332_v36 }
0x3e32   :  { %v4551_v31 = vmax.f32 %v4550_v14, 0.0 }
0x3e34   :  { %6292 = vmatmul.mubr.msk.f32.vlgmr.msra.gmra.mrb[56].mxu0 %vm135_vm2, %v4551_v31 }
0x3e35   :  { %6677 = vmatpush3.bf16.msra.mxu0 %v7234_v51  ;;  %6313 = vmatprep.mubr.msk.f32.mxu0 %vm6882_vm1, %v6881_v6 }
0x3e36   :  { %6678 = vmatprep.subr.bf16.mxu0 %v6880_v3 }
0x3e39   :  { %6680 = vmatpush3.bf16.msra.mxu0 %v7247_v56 }
0x3e3a   :  { %6327 = vmatprep.subr.mxu0 %v6881_v6 }
0x3f07   :  { %v4621_v32 = vpop.f32.mrb[56].mxu0 }
0x3f08   :  { %v4622_v17 = vadd.f32 %v7631_v12, %v4621_v32  ;;  %v6293_v33 = vpop.f32.mrb[57].mxu0 }
0x3f0a   :  { %v4695_v9 = vadd.f32 %v4692_v22, %v4622_v17 }
0x3f0c   :  { %v5434_v36 = vmul.f32 -1.442695, %v4695_v9 }
0x3f0e   :  { %6835 = vpow2.f32 %v5434_v36 }
0x3f18   :  { %v6836_v29 = vpop.eup %6835 }
0x3f19   :  { %v4699_v30 = vadd.f32 1.0, %v6836_v29 }
0x3f1b   :  { %6837 = vrcp.f32 %v4699_v30 }
0x3f25   :  { %v6838_v35 = vpop.eup %6837 }
0x3f26   :  { %v4706_v42 = vmul.f32 %v6838_v35, %v4704_v38  ;;  %v4713_v46 = vsub.f32 1.0, %v6838_v35  ;;  %v4719_v52 = vmul.f32 %v6838_v35, %v7637_v41  ;;  %v6855_v38 = vld [vmem:[%s7792_s1 + $0x148] sm:$0x1] }
0x3f28   :  { %4708 = vrot.lane.b32.xlu1 %v4706_v42, %s6883_s22 }
0x3f9a   :  { %v4709_v34 = vpop.permute.xlu1 %4708 }
0x3f9b   :  { %v4711_v43 = vadd.f32 %v4709_v34, %v4622_v17 }
0x3f9d   :  { %6839 = vtanh.f32 %v4711_v43 }
0x3fa7   :  { %v6840_v44 = vpop.eup %6839 }
0x3fa8   :  { %4715 = vrot.lane.b32.xlu1 %v6840_v44, %s6884_s25 }
0x401a   :  { %v4716_v48 = vpop.permute.xlu1 %4715 }
0x401b   :  { %v4718_v40 = vmul.f32 %v4716_v48, %v4713_v46 }
0x401d   :  { %v7705_v53 = vadd.f32 %v4719_v52, %v4718_v40 }
0x401f   :  { %4722 = vrot.lane.b32.xlu0 %v7705_v53, %s6884_s25 }
0x4091   :  { %v4723_v58 = vpop.permute.xlu0 %4722 }
0x4092   :  { %6314 = vmatmul.mubr.msk.f32.vlgmr.msra.gmra.mrb[58].mxu0 %vm135_vm2, %v4723_v58  ;;  %6325 = vmatmul.mubr.msk.f32.vlgmr.msra.gmra.mrb[54].mxu1 %vm135_vm2, %v4723_v58 }
0x4093   :  { %6328 = vmatpush3.msra.mxu0 %v7120_v54  ;;  %6329 = vmatprep.mubr.msk.f32.mxu0 %vm6882_vm1, %v6881_v6 }
0x4094   :  { %6693 = vmatprep.subr.bf16.mxu0 %v6880_v3  ;;  %6689 = vmatpush3.bf16.msra.mxu1 %v7131_v61 }
0x4095   :  { %6690 = vmatprep.subr.bf16.mxu1 %v6880_v3  ;;  %6340 = vmatprep.mubr.msk.f32.mxu1 %vm6882_vm1, %v6881_v6 }
0x4098   :  { %6692 = vmatpush3.bf16.msra.mxu1 %v7141_v1 }
0x4099   :  { %6699 = vmatprep.subr.bf16.mxu1 %v6880_v3 }
0x4165   :  { %v4792_v41 = vpop.f32.mrb[58].mxu0  ;;  %v4867_v59 = vpop.f32.mrb[54].mxu1 }
0x4166   :  { %v4793_v54 = vadd.f32 %v4792_v41, %v7365_v63  ;;  %v4868_v37 = vadd.f32 %v6853_v60, %v4867_v59  ;;  %v6315_v62 = vpop.f32.mrb[59].mxu0  ;;  %v6326_v61 = vpop.f32.mrb[55].mxu1 }
0x4168   :  { %v4799_v0 = vrot.slane %v4793_v54, %v6981_v50  ;;  %v4871_v5 = vsel %vm1100_vm11, %v4868_v37, -inf }
0x4169   :  { %4872 = vmax.xlane.f32.xlu1 %v4871_v5 }
0x416a   :  { %v7730_v1 = vsel %vm906_vm9, %v4799_v0, %v7660_v2 }
0x41f6   :  { %v4873_v47 = vpop.xlane.xlu1 %4872 }
0x41f7   :  { %v4874_v8 = vsub.f32 %v4868_v37, %v4873_v47 }
0x41f9   :  { %v4875_v63 = vmul.f32 1.442695, %v4874_v8 }
0x41fb   :  { %6841 = vpow2.f32 %v4875_v63 }
0x4205   :  { %v6842_v10 = vpop.eup %6841 }
0x4206   :  { %v4877_v13 = vsel %vm1100_vm11, %v6842_v10, 0.0 }
0x4207   :  { %4878 = vadd.xlane.f32.xlu0 %v4877_v13 }
0x4294   :  { %v4879_v39 = vpop.xlane.xlu0 %4878 }
0x4295   :  { %6843 = vrcp.f32 %v4879_v39 }
0x429f   :  { %v6844_v15 = vpop.eup %6843 }
0x42a0   :  { %v4881_v19 = vmul.f32 %v6844_v15, %v6842_v10 }
0x42a2   :  { %6330 = vmatmul.mubr.msk.f32.vlgmr.msra.gmra.mrb[60].mxu0 %vm59_vm0, %v4881_v19 }
0x42a3   :  { %6695 = vmatpush3.bf16.msra.mxu0 %v7289_v26  ;;  %6351 = vmatprep.mubr.msk.f32.mxu0 %vm6882_vm1, %v6881_v6 }
0x42a4   :  { %6696 = vmatprep.subr.bf16.mxu0 %v6880_v3 }
0x42a7   :  { %6698 = vmatpush3.bf16.msra.mxu0 %v7299_v4 }
0x42a8   :  { %6705 = vmatprep.subr.bf16.mxu0 %v6880_v3 }
0x42aa   :  { %6352 = vmatmul.mubr.msk.f32.vlgmr.msra.gmra.mrb[62].mxu0 %vm135_vm2, %v4723_v58 }
0x42ab   :  { %6707 = vmatpush3.bf16.msra.mxu0 %v7164_v11  ;;  %6373 = vmatprep.mubr.msk.f32.mxu0 %vm6882_vm1, %v6881_v6 }
0x42ac   :  { %6708 = vmatprep.subr.bf16.mxu0 %v6880_v3 }
0x42af   :  { %6710 = vmatpush3.bf16.msra.mxu0 %v7174_v18 }
0x42b2   :  { %6374 = vmatmul.mubr.msk.f32.vlgmr.msra.gmra.mrb[64].mxu0 %vm135_vm2, %v4723_v58 }
0x4375   :  { %v4951_v26 = vpop.f32.mrb[60].mxu0 }
0x4376   :  { %v6331_v2 = vpop.f32.mrb[61].mxu0  ;;  %6341 = vmatmul.mubr.msk.f32.vlgmr.msra.gmra.mrb[56].mxu1 %vm135_vm2, %v4951_v26 }
0x4377   :  { %6701 = vmatpush3.bf16.msra.mxu1 %v7154_v7  ;;  %6362 = vmatprep.mubr.msk.f32.mxu1 %vm6882_vm1, %v6881_v6 }
0x4378   :  { %6702 = vmatprep.subr.bf16.mxu1 %v6880_v3 }
0x437b   :  { %6704 = vmatpush3.bf16.msra.mxu1 %v7190_v21 }
0x437c   :  { %6711 = vmatprep.subr.bf16.mxu1 %v6880_v3 }
0x437d   :  { %v5094_v11 = vpop.f32.mrb[62].mxu0 }
0x437e   :  { %v6353_v4 = vpop.f32.mrb[63].mxu0 }
0x4385   :  { %v5239_v18 = vpop.f32.mrb[64].mxu0 }
0x4386   :  { %v5240_v57 = vadd.f32 %v7616_v16, %v5239_v18  ;;  %v6375_v20 = vpop.f32.mrb[65].mxu0 }
0x4388   :  { %5251 = vrot.lane.b32.xlu0 %v5240_v57, %s6883_s22 }
0x43fa   :  { %v5252_v17 = vpop.permute.xlu0 %5251 }
0x4449   :  { %v5024_v45 = vpop.f32.mrb[56].mxu1 }
0x444a   :  { %v5095_v27 = vadd.f32 %v5094_v11, %v5024_v45  ;;  %v6342_v7 = vpop.f32.mrb[57].mxu1 }
0x444c   :  { %v5098_v22 = vadd.f32 %v6854_v55, %v5095_v27 }
0x444e   :  { %v5099_v23 = vmax.f32 %v5098_v22, 0.0 }
0x4450   :  { %6363 = vmatmul.mubr.msk.f32.vlgmr.msra.gmra.mrb[58].mxu1 %vm135_vm2, %v5099_v23 }
0x4451   :  { %6713 = vmatpush3.bf16.msra.mxu1 %v7234_v51  ;;  %6384 = vmatprep.mubr.msk.f32.mxu1 %vm6882_vm1, %v6881_v6 }
0x4452   :  { %6714 = vmatprep.subr.bf16.mxu1 %v6880_v3 }
0x4455   :  { %6716 = vmatpush3.bf16.msra.mxu1 %v7247_v56 }
0x4523   :  { %v5169_v21 = vpop.f32.mrb[58].mxu1 }
0x4524   :  { %v5170_v16 = vadd.f32 %v7631_v12, %v5169_v21  ;;  %v6364_v24 = vpop.f32.mrb[59].mxu1 }
0x4526   :  { %v5243_v25 = vadd.f32 %v5240_v57, %v5170_v16 }
0x4528   :  { %v5442_v28 = vmul.f32 -1.442695, %v5243_v25 }
0x452a   :  { %6845 = vpow2.f32 %v5442_v28 }
0x4534   :  { %v6846_v14 = vpop.eup %6845 }
0x4535   :  { %v5247_v31 = vadd.f32 1.0, %v6846_v14 }
0x4537   :  { %6847 = vrcp.f32 %v5247_v31 }
0x4541   :  { %v6848_v32 = vpop.eup %6847 }
0x4542   :  { %v5254_v51 = vmul.f32 %v6848_v32, %v5252_v17  ;;  %v5261_v56 = vsub.f32 1.0, %v6848_v32  ;;  %v5267_v9 = vmul.f32 %v6848_v32, %v7705_v53 }
0x4544   :  { %5256 = vrot.lane.b32.xlu1 %v5254_v51, %s6883_s22 }
0x45b6   :  { %v5257_v6 = vpop.permute.xlu1 %5256 }
0x45b7   :  { %v5259_v33 = vadd.f32 %v5257_v6, %v5170_v16 }
0x45b9   :  { %6849 = vtanh.f32 %v5259_v33 }
0x45c3   :  { %v6850_v3 = vpop.eup %6849 }
0x45c4   :  { %5263 = vrot.lane.b32.xlu1 %v6850_v3, %s6884_s25 }
0x4636   :  { %v5264_v12 = vpop.permute.xlu1 %5263 }
0x4637   :  { %v5266_v36 = vmul.f32 %v5264_v12, %v5261_v56 }
0x4639   :  { %v5268_v29 = vadd.f32 %v5267_v9, %v5266_v36 }
0x463b   :  { %5270 = vrot.lane.b32.xlu0 %v5268_v29, %s6884_s25  ;;  %s6856_s25 = scalar_lea.vmem %s5357_s24, 128 }
0x463c   :  { %p6857_p0 = scmp.ne.s32.totalorder %s5357_s24, %s6856_s25  ;;  %p6862_p2 = scmp.lt.s32.totalorder %s6856_s25, %s6856_s25 }
0x463e   :  { %p6863_p3 = por %p6862_p2, %p6861_p1 }
0x4640   :  { %p6864_p4 = pnand %p6863_p3, %p6857_p0 }
0x46ad   :  { %v5271_v30 = vpop.permute.xlu0 %5270 }
0x46ae   :  { %6385 = vmatmul.mubr.msk.f32.vlgmr.msra.gmra.mrb[60].mxu1 %vm135_vm2, %v5271_v30 }
0x4781   :  { %v5340_v35 = vpop.f32.mrb[60].mxu1 }
0x4782   :  { %v5341_v42 = vadd.f32 %v6855_v38, %v5340_v35  ;;  %v6386_v34 = vpop.f32.mrb[61].mxu1 }
0x4784   :  { %v5347_v43 = vrot.slane %v5341_v42, %v6981_v50 }
0x4786   :  { %v5348_v44 = vsel %vm1018_vm10, %v5347_v43, %v7730_v1 }
0x4787   :  { %5349 = vst.msk [vmem:[#allocation2] sm:$0xff] %vm59_vm0, %v5348_v44 }
0x4788   :  { %6867 = shalt.err (!%p6864_p4)
}
0x4789   :  { %s6868_s27 = scalar_lea.hbm %s7793_s2, 128 }
0x478a   :  { %p6869_p5 = scmp.ne.s32.totalorder %s7793_s2, %s6868_s27  ;;  %p6872_p6 = scmp.lt.u32.totalorder %s6868_s27, %s7793_s2 }
0x478c   :  { %p6874_p7 = pnand %p6872_p6, %p6869_p5 }
0x478e   :  { %6877 = shalt.err (!%p6874_p7)
}
0x478f   :  { %5359 = dma.vmem_to_hbm [thread:$0]  %s5357_s24, 128, %s7793_s2, [#allocation3]  }
0x4790   :  { %6878 = dma.done.wait [#allocation3], 128  }
0x4791   :  { %6879 = vsyncadd [#allocation3], 4294967168 }
0x4792   :  { %5363 = vsyncpa [#allocation3], 1 }

</bundles_post_ra>
